<compile_context>
chip_gen: v7x
topology: tpu7x:2x2x1
jax: 0.10.0
libtpu: 0.0.40
codegen_flags: <defaults>
</compile_context>

<pallas_src>
import functools
import math

import numpy as np
import jax
import jax.numpy as jnp
from jax.experimental import pallas as pl
from jax.experimental.pallas import tpu as pltpu

OUT_DIM = 3
MIN_A = 0.05
MAX_A = 10.0

LANE = 128
SUBLANE = 8

TARGET_STEP_BYTES = 4 << 20    # aim for ~4 MiB of x per grid step
MIN_STEP_BYTES = 512 << 10     # don't shrink steps below ~512 KiB just for step count
MIN_STEPS = 8                  # >= 4 steps per TensorCore on v7x (2 TCs)


def _round_up(v, m):
    return ((v + m - 1) // m) * m


def _down_to_lane(v):
    return max(LANE, (v // LANE) * LANE)


def _choose_tile_n(n, c_pad):
    """Row-tile policy: big (multi-MiB) steps, but enough steps to pipeline."""
    row_bytes = c_pad * 4
    rows_target = _down_to_lane(TARGET_STEP_BYTES // row_bytes)   # ~4 MiB / step
    rows_floor = _down_to_lane(MIN_STEP_BYTES // row_bytes)       # >= ~512 KiB / step
    rows_steps = _down_to_lane(n // MIN_STEPS)                    # >= MIN_STEPS steps
    tile_n = min(rows_target, max(rows_floor, rows_steps))
    tile_n = min(tile_n, _round_up(n, LANE))                      # never exceed padded N
    return max(tile_n, LANE)


def _vmem_budget_bytes(tile_n, c_pad):
    """Actual double-buffered footprint + compiler headroom (lane-dense output)."""
    x_bytes = 2 * tile_n * c_pad * 4                 # input tile, double-buffered
    o_bytes = 2 * SUBLANE * tile_n * 4               # (3, tile_n) pads sublanes 3 -> 8
    p_bytes = 2 * (c_pad + SUBLANE) * LANE * 4       # grid-invariant param slab
    return x_bytes + o_bytes + p_bytes + (8 << 20)   # headroom for compiler scratch


def scale_predictor_kernel(x_ref, wb_ref, out_ref, *, c_pad):
    """One row-tile: out[:, tile] = (sigmoid(x @ W + b) * MAX_A + MIN_A).T (lane-major)."""
    w = wb_ref[:c_pad, :]                    # (c_pad, 128)  static, tile-aligned slice
    b = wb_ref[c_pad:c_pad + 1, :]           # (1, 128)
    h = jnp.dot(x_ref[...], w,
                preferred_element_type=jnp.float32,
                precision=jax.lax.Precision.HIGHEST) + b          # (tile_n, 128)
    # Transpose the small result so the store is lane-dense; XLU work hides
    # under the (much larger) x DMA.  Only the 3 live rows get the epilogue.
    ht = h.T                                                       # (128, tile_n)
    out_ref[...] = (jax.nn.sigmoid(ht[:OUT_DIM, :]) * MAX_A + MIN_A).astype(out_ref.dtype)


@jax.jit
def scale_predictor_pallas(x, w, b):
    """x: (N, C) f32, w: (C, 3) f32 (transposed PyTorch weight), b: (3,) f32.

    Returns (N, 3) f32, matching the PyTorch module's forward.
    """
    n, c = x.shape
    c_pad = _round_up(c, LANE)
    tile_n = _choose_tile_n(n, c_pad)
    n_pad = _round_up(n, tile_n)

    x_p = x
    if (n_pad != n) or (c_pad != c):
        # Zero padding is inert: padded cols hit zero weight rows, padded rows
        # are sliced off below.
        x_p = jnp.pad(x, ((0, n_pad - n), (0, c_pad - c)))

    # Pack weight + bias into a single grid-invariant, tile-aligned slab.
    wb = jnp.zeros((c_pad + SUBLANE, LANE), jnp.float32)
    wb = wb.at[:c, :OUT_DIM].set(w.astype(jnp.float32))
    wb = wb.at[c_pad, :OUT_DIM].set(b.astype(jnp.float32))

    kernel = functools.partial(scale_predictor_kernel, c_pad=c_pad)
    out_t = pl.pallas_call(
        kernel,
        out_shape=jax.ShapeDtypeStruct((OUT_DIM, n_pad), jnp.float32),
        grid=(n_pad // tile_n,),
        in_specs=[
            pl.BlockSpec((tile_n, c_pad), lambda i: (i, 0)),           # row tile of x
            pl.BlockSpec((c_pad + SUBLANE, LANE), lambda i: (0, 0)),   # invariant params
        ],
        out_specs=pl.BlockSpec((OUT_DIM, tile_n), lambda i: (0, i)),   # lane-dense output
        compiler_params=pltpu.CompilerParams(
            dimension_semantics=("parallel",),
            vmem_limit_bytes=int(_vmem_budget_bytes(tile_n, c_pad)),
        ),
    )(x_p, wb)

    # Back to the module's (N, 3) layout.  The (3, N) slab is tiny relative to
    # x, so this wrapper transpose is negligible; consumers that can take the
    # lane-major layout may use out_t[:, :n] directly.
    return out_t[:, :n].T


def _reference(x, w, b):
    h = jnp.dot(x, w, precision=jax.lax.Precision.HIGHEST) + b
    return jax.nn.sigmoid(h) * MAX_A + MIN_A


if __name__ == "__main__":
    key = jax.random.PRNGKey(0)
    k_w, k_b, k_x, k_x2 = jax.random.split(key, 4)

    IN_CHANNELS = 128
    N = 4096   # -> tile_n = 1024, grid = 4 (pipelined; 2 steps per v7x TensorCore)

    # PyTorch nn.Linear default init: U(-1/sqrt(fan_in), 1/sqrt(fan_in)).
    bound = 1.0 / math.sqrt(IN_CHANNELS)
    w = jax.random.uniform(k_w, (IN_CHANNELS, OUT_DIM), jnp.float32, -bound, bound)
    b = jax.random.uniform(k_b, (OUT_DIM,), jnp.float32, -bound, bound)
    x = jax.random.uniform(k_x, (N, IN_CHANNELS), jnp.float32, -1.0, 1.0)

    out = jax.block_until_ready(scale_predictor_pallas(x, w, b))
    ref = jax.block_until_ready(_reference(x, w, b))
    np.testing.assert_allclose(np.asarray(out), np.asarray(ref), rtol=1e-4, atol=1e-4)
    assert out.shape == (N, OUT_DIM) and out.dtype == jnp.float32

    # Ragged / non-128 shapes exercise the wrapper padding path.
    N2, C2 = 1000, 120
    bound2 = 1.0 / math.sqrt(C2)
    w2 = jax.random.uniform(k_w, (C2, OUT_DIM), jnp.float32, -bound2, bound2)
    b2 = jax.random.uniform(k_b, (OUT_DIM,), jnp.float32, -bound2, bound2)
    x2 = jax.random.uniform(k_x2, (N2, C2), jnp.float32, -1.0, 1.0)
    out2 = jax.block_until_ready(scale_predictor_pallas(x2, w2, b2))
    ref2 = jax.block_until_ready(_reference(x2, w2, b2))
    np.testing.assert_allclose(np.asarray(out2), np.asarray(ref2), rtol=1e-4, atol=1e-4)
    assert out2.shape == (N2, OUT_DIM)

    print("KERNEL_OK")
</pallas_src>

<mosaic_0001>
module attributes {stable_mosaic.version = 11 : i64} {
  func.func @scale_predictor_kernel(%arg0: i32, %arg1: memref<1024x128xf32, #tpu.memory_space<vmem>>, %arg2: memref<136x128xf32, #tpu.memory_space<vmem>>, %arg3: memref<3x1024xf32, #tpu.memory_space<vmem>>) attributes {dimension_semantics = [#tpu.dimension_semantics<parallel>], iteration_bounds = array<i64: 4>, scalar_prefetch = 0 : i64, scratch_operands = 0 : i64, tpu.core_type = #tpu.core_type<tc>, window_params = [{transform_indices = @transform_0, window_bounds = array<i64: 1024, 128>}, {pipeline_mode = #tpu.pipeline_mode<synchronous>, transform_indices = @transform_1, window_bounds = array<i64: 136, 128>}, {transform_indices = @transform_2, window_bounds = array<i64: 3, 1024>}]} {
    %c0 = arith.constant 0 : index
    %c0_0 = arith.constant 0 : index
    %0 = vector.load %arg2[%c0, %c0_0] : memref<136x128xf32, #tpu.memory_space<vmem>>, vector<128x128xf32>
    %c128 = arith.constant 128 : index
    %c0_1 = arith.constant 0 : index
    %1 = vector.load %arg2[%c128, %c0_1] : memref<136x128xf32, #tpu.memory_space<vmem>>, vector<1x128xf32>
    %c0_2 = arith.constant 0 : index
    %c0_3 = arith.constant 0 : index
    %2 = vector.load %arg1[%c0_2, %c0_3] : memref<1024x128xf32, #tpu.memory_space<vmem>>, vector<1024x128xf32>
    %cst = arith.constant dense<0.000000e+00> : vector<1024x128xf32>
    %3 = tpu.matmul %2, %0, %cst {dimension_numbers = #tpu.dot_dimension_numbers<[1], [0], [0], [1], [0, 0, 1, 1], [], []>, precision = #tpu.contract_precision<fp32>} : vector<1024x128xf32>, vector<128x128xf32>, vector<1024x128xf32> -> vector<1024x128xf32>
    %4 = vector.broadcast %1 : vector<1x128xf32> to vector<1024x128xf32>
    %5 = arith.addf %3, %4 : vector<1024x128xf32>
    %6 = tpu.transpose %5, [1, 0] : vector<1024x128xf32> -> vector<128x1024xf32>
    %7 = vector.extract_strided_slice %6 {offsets = [0, 0], sizes = [3, 1024], strides = [1, 1]} : vector<128x1024xf32> to vector<3x1024xf32>
    %8 = arith.negf %7 : vector<3x1024xf32>
    %9 = math.exp %8 : vector<3x1024xf32>
    %cst_4 = arith.constant 1.000000e+00 : f32
    %10 = vector.broadcast %cst_4 : f32 to vector<3x1024xf32>
    %11 = arith.addf %10, %9 : vector<3x1024xf32>
    %12 = arith.divf %10, %11 : vector<3x1024xf32>
    %cst_5 = arith.constant 1.000000e+01 : f32
    %13 = vector.broadcast %cst_5 : f32 to vector<3x1024xf32>
    %14 = arith.mulf %12, %13 : vector<3x1024xf32>
    %cst_6 = arith.constant 5.000000e-02 : f32
    %15 = vector.broadcast %cst_6 : f32 to vector<3x1024xf32>
    %16 = arith.addf %14, %15 : vector<3x1024xf32>
    %c0_7 = arith.constant 0 : index
    %c0_8 = arith.constant 0 : index
    %17 = vector.load %arg3[%c0_7, %c0_8] : memref<3x1024xf32, #tpu.memory_space<vmem>>, vector<3x1024xf32>
    tpu.vector_store %arg3[%c0_7, %c0_8], %16 {strides = array<i32>} : memref<3x1024xf32, #tpu.memory_space<vmem>>, vector<3x1024xf32>,
    return
  }
  func.func @transform_0(%arg0: i32) -> (i32, i32) {
    %c0_i32 = arith.constant 0 : i32
    %c0_i32_0 = arith.constant 0 : i32
    return %arg0, %c0_i32 : i32, i32
  }
  func.func @transform_1(%arg0: i32) -> (i32, i32) {
    %c0_i32 = arith.constant 0 : i32
    %c0_i32_0 = arith.constant 0 : i32
    %c0_i32_1 = arith.constant 0 : i32
    return %c0_i32, %c0_i32_0 : i32, i32
  }
  func.func @transform_2(%arg0: i32) -> (i32, i32) {
    %c0_i32 = arith.constant 0 : i32
    %c0_i32_0 = arith.constant 0 : i32
    return %c0_i32, %arg0 : i32, i32
  }
}

</mosaic_0001>

<bundles_post_ra>
// kernel: scale_predictor_pallas.1
= control target key start
LH: loop header
LB: loop body
LE: loop exit
PB: predicated region body
PF: predicated region fallthrough
CT: control target
= control target key end

     0   :  { %7 = vsyncpa [#allocation3], 0  ;;  %s12597_s0 = inlined_call_operand.hbm [shape: f32[4096,128], index: 0, kind: input, shape index: {}]   ;;  %s12598_s1 = inlined_call_operand.vmem [shape: f32[136,128], index: 1, kind: input, shape index: {}]   ;;  %s12599_s2 = inlined_call_operand.hbm [shape: f32[3,4096], index: 2, kind: output, shape index: {}]  }
   0x1   :  { %9 = vsyncpa [#allocation3 + $0x1], 0 }
   0x2   :  { %10 = vsyncpa [#allocation4], 0 }
   0x3   :  { %12 = vsyncpa [#allocation4 + $0x1], 0  ;;  %s10235_s9 = smov 0   ;;  %s10237_s10 = smov 0  }
   0x4   :  { %s10239_s11 = smov 0   ;;  %s10241_s12 = smov 0  }
   0x5 LB: > { %s10256_s13 = sadd.s32 4294967295, %s10214_s12   ;;  %s6840_s14 = sadd.s32 4294967294, %s10214_s12   ;;  %s10214_s12 = sphi %s10241_s12, %s13648_s12   ;;  %s10210_s11 = sphi %s10239_s11, %s13647_s11   ;;  %s10206_s10 = sphi %s10237_s10, %s13646_s10   ;;  %s10202_s9 = sphi %s10235_s9, %s13645_s9  }
   0x6   : > { %s10260_s15 = sadd.s32 1, %s10214_s12   ;;  %s25_s16 = sadd.s32 1, %s10210_s11 }
   0x7   : > { %s22_s17 = ssub.s32 %s10214_s12, %s10260_s15  ;;  %p32_p0 = scmp.ne.s32.totalorder %s10210_s11, %s10206_s10 }
   0x8   : > { %p23_p1 = scmp.eq.s32.totalorder %s22_s17, 0  ;;  %p33_p2 = scmp.eq.s32.totalorder %s10214_s12, 0 }
   0x9   : > { %p38_p3 = scmp.ne.s32.totalorder %s10206_s10, %s10202_s9  ;;  %p39_p4 = scmp.eq.s32.totalorder %s10256_s13, 0 }
   0xa   : > { %s10272_s18 = scalar_select %p23_p1, %s10210_s11, %s25_s16  }
   0xb   : > { %p10274_p5 = por %p33_p2, %p32_p0  ;;  %p10278_p6 = por %p39_p4, %p38_p3 }
   0xc   : > { %p83_p7 = scmp.eq.s32.totalorder %s10256_s13, 3  ;;  %p89_p8 = scmp.eq.s32.totalorder %s6840_s14, 3 }
   0xd   : > { %p10045_p9 = scmp.lt.s32.totalorder %s10214_s12, 4  ;;  %s112_s23 = sand.u32 1, %s10210_s11  }
   0xe   : > { %p10284_p10 = por %p83_p7, %p32_p0  ;;  %p10288_p11 = por %p89_p8, %p38_p3 }
   0xf   : > { %s6863_s24 = sshll.u32 %s10214_s12, 14  ;;  %s6843_s25 = sshll.u32 %s112_s23, 10 }
  0x10   : > { %s13039_s21 = scalar_select %p10284_p10, 1, 0 }
  0x11   : > { %s13040_s22 = scalar_select %p10288_p11, 1, 0 }
  0x12   : > { %s10297_s28 = scalar_lea.hbm %s12597_s0, %s6863_s24  ;;  %s116_s29 = scalar_lea.vmem [#allocation2], %s6843_s25 }
  0x13   : > { %s123_s30 = sshll.u32 %s116_s29, 4  ;;  %p10301_p12 = pnand %p10045_p9, %p10274_p5  ;;  %s10305_s30 = int_to_ptr.vmem [resolvable:$true] %s123_s30 }
  0x14   : > { %s10307_s4 = scalar_lea.sflag [#allocation3], %s112_s23  ;;  %s10118_s5 = scalar_lea.hbm %s10297_s28, 16384 }
  0x15   : > { %p10119_p13 = scmp.ne.s32.totalorder %s10297_s28, %s10118_s5  ;;  %p10120_p0 = pneg %p10301_p12 }
  0x16   : > { %s10123_s8 = scalar_lea.hbm %s12597_s0, 65536  ;;  %p10124_p3 = scmp.lt.u32.totalorder %s10297_s28, %s12597_s0 }
  0x17   : > { %p10121_p1 = pnand %p10120_p0, %p10119_p13  ;;  %p10125_p4 = scmp.lt.u32.totalorder %s10123_s8, %s10118_s5 }
  0x18   : > { %p10127_p7 = scmp.lt.u32.totalorder %s10118_s5, %s10297_s28 }
  0x19   : > { %p10122_p2 = pneg %p10121_p1  ;;  %p10126_p5 = por %p10125_p4, %p10124_p3 }
  0x1b   : > { %p10128_p8 = por %p10127_p7, %p10126_p5 }
  0x1d   : > { %p10129_p9 = pnand %p10128_p8, %p10122_p2 }
  0x1f   : > { %10132 = shalt.err (!%p10129_p9)
}
  0x20   : > { %s10133_s17 = scalar_lea.vmem %s10305_s30, 16384  ;;  %s10216_s19 = smov [#allocation2]  }
  0x21   : > { %p10134_p13 = scmp.ne.s32.totalorder %s10305_s30, %s10133_s17  ;;  %s10138_s23 = sshll.u32 %s10216_s19, 4  ;;  %s10139_s23 = int_to_ptr.vmem [resolvable:$false] %s10138_s23 }
  0x22   : > { %s10140_s24 = scalar_lea.vmem %s10139_s23, 32768  ;;  %p10141_p10 = scmp.lt.s32.totalorder %s10305_s30, %s10139_s23 }
  0x23   : > { %p10136_p1 = pnand %p10134_p13, %p10120_p0  ;;  %p10142_p3 = scmp.lt.s32.totalorder %s10140_s24, %s10133_s17 }
  0x25   : > { %p10137_p11 = pneg %p10136_p1  ;;  %p10143_p4 = por %p10142_p3, %p10141_p10 }
  0x27   : > { %p10144_p5 = pnand %p10143_p4, %p10137_p11 }
  0x29   : > { %10147 = shalt.err (!%p10144_p5)
}
  0x2a   : > { %s10217_s25 = smov 128   ;;  %s10218_s26 = smov 8  }
  0x2b   : > { %10040 = dma.hbm_to_vmem [thread:$0]  (!%p10301_p12), %s10297_s28, 16384, %s10305_s30, %s10307_s4, %s10217_s25, %s10217_s25, %s10218_s26  }
  0x2c   : > { %p6846_p0 = scmp.ge.s32.totalorder %s10214_s12, 1  ;;  %p131_p2 = scmp.lt.s32.totalorder %s10214_s12, 5 }
  0x2e   : > { %p132_p7 = pnand %p6846_p0, %p131_p2 }
  0x30   : > { %135 = sbr.rel (%p132_p7) target bundleno = 1224 (0x4c8), region = 28 }
  0x37   : > { %s10338_s27 = sand.u32 1, %s10206_s10  }
  0x38   : > { %s6847_s29 = sshll.u32 %s10338_s27, 10  ;;  %s138_s5 = scalar_lea.sflag [#allocation3], %s10338_s27 }
  0x39   : > { %s10342_s6 = scalar_lea.vmem [#allocation2], %s6847_s29 }
  0x3a   : > { %10193 = dma.done.wait (%p10278_p6), %s138_s5, 16384  }
  0x3b   : > { %10195 = vsyncadd (%p10278_p6), %s138_s5, 4294950912  ;;  %v164_v0 = vld [vmem:[%s12598_s1] sm:$0xff]  ;;  %v165_v1 = vld [vmem:[%s12598_s1 + $0x8] sm:$0xff]  ;;  %s6848_s17 = sshll.u32 %s10338_s27, 5  ;;  %s6864_s23 = sshll.u32 %s10256_s13, 9 }
  0x3c   : > { %v10357_v2 = vld [vmem:[%s12598_s1 + $0x10] sm:$0xff]  ;;  %v314_v3 = vand.u32 4294901760, %v164_v0  ;;  %v317_v4 = vand.u32 4294901760, %v165_v1  ;;  %v10362_v5 = vld [vmem:[%s12598_s1 + $0x18] sm:$0xff]  ;;  %v10368_v7 = vld [vmem:[%s12598_s1 + $0x20] sm:$0xff]  ;;  %s12487_s19 = scalar_lea.vmem [#allocation5], %s6848_s17  ;;  %s12553_s29 = scalar_lea.hbm %s12599_s2, %s6864_s23 }
  0x3d   : > { %v320_v6 = vand.u32 4294901760, %v10357_v2  ;;  %v10373_v8 = vld [vmem:[%s12598_s1 + $0x28] sm:$0xff]  ;;  %v323_v9 = vand.u32 4294901760, %v10362_v5  ;;  %v12612_v11 = vand.u32 4294901760, %v10368_v7  ;;  %v10389_v14 = vld [vmem:[%s12598_s1 + $0x30] sm:$0xff]  ;;  %v10394_v15 = vld [vmem:[%s12598_s1 + $0x38] sm:$0xff] }
  0x3e   : > { %v10376_v10 = vpack.c.bf16 %v317_v4, %v314_v3  ;;  %v12611_v12 = vand.u32 4294901760, %v10373_v8  ;;  %v181_v16 = vld [vmem:[%s10342_s6] sm:$0xff]  ;;  %v12610_v19 = vand.u32 4294901760, %v10389_v14  ;;  %v12609_v20 = vand.u32 4294901760, %v10394_v15  ;;  %v10421_v22 = vld [vmem:[%s12598_s1 + $0x48] sm:$0xff]  ;;  %v10442_v28 = vld [vmem:[%s12598_s1 + $0x50] sm:$0xff] }
  0x3f   : > { %v10384_v13 = vpack.c.bf16 %v323_v9, %v320_v6  ;;  %v10401_v17 = vand.u32 4294901760, %v181_v16  ;;  %v10416_v21 = vld [vmem:[%s12598_s1 + $0x40] sm:$0xff]  ;;  %v12607_v27 = vand.u32 4294901760, %v10421_v22  ;;  %v10447_v29 = vld [vmem:[%s12598_s1 + $0x58] sm:$0xff]  ;;  %v182_v31 = vld [vmem:[%s10342_s6 + $0x8] sm:$0xff]  ;;  %v12606_v32 = vand.u32 4294901760, %v10442_v28 }
  0x40   : > { %9074 = vmatprep.subr.bf16.mxu1 %v10376_v10  ;;  %9170 = vmatprep.subr.bf16.mxu0 %v10376_v10  ;;  %v10409_v18 = vpack.c.bf16 %v12611_v12, %v12612_v11  ;;  %v10435_v25 = vpack.c.bf16 %v12609_v20, %v12610_v19  ;;  %v12608_v26 = vand.u32 4294901760, %v10416_v21  ;;  %v12605_v33 = vand.u32 4294901760, %v10447_v29  ;;  %v183_v35 = vld [vmem:[%s10342_s6 + $0x10] sm:$0xff]  ;;  %v10467_v37 = vld [vmem:[%s12598_s1 + $0x60] sm:$0xff]  ;;  %v10472_v38 = vld [vmem:[%s12598_s1 + $0x68] sm:$0xff]  ;;  %s6770_s24 = sshll.u32 %s12487_s19, 4  ;;  %s12555_s24 = int_to_ptr.vmem [resolvable:$true] %s6770_s24 }
  0x41   : > { %9076 = vmatpush3.bf16.msra.mxu1 %v10376_v10  ;;  %9172 = vmatpush3.bf16.msra.mxu0 %v10376_v10  ;;  %v10424_v23 = vsub.f32 %v181_v16, %v10401_v17  ;;  %v10474_v39 = vand.u32 4294901760, %v182_v31  ;;  %v10476_v40 = vsub.f32 %v164_v0, %v314_v3  ;;  %v10478_v41 = vsub.f32 %v165_v1, %v317_v4  ;;  %v184_v43 = vld [vmem:[%s10342_s6 + $0x18] sm:$0xff]  ;;  %v185_v44 = vld [vmem:[%s10342_s6 + $0x20] sm:$0xff]  ;;  %v10499_v48 = vld [vmem:[%s12598_s1 + $0x70] sm:$0xff]  ;;  %s6756_s5 = scalar_lea.sflag [#allocation4], %s10338_s27  ;;  %s10148_s28 = scalar_lea.vmem %s12555_s24, 512 }
  0x42   : > { %9078 = vmatprep.subr.bf16.mxu1 %v10384_v13  ;;  %9174 = vmatprep.subr.bf16.mxu0 %v10384_v13  ;;  %v10462_v36 = vpack.c.bf16 %v12607_v27, %v12608_v26  ;;  %v10480_v42 = vand.u32 4294901760, %v183_v35  ;;  %v12602_v45 = vand.u32 4294901760, %v10467_v37  ;;  %v12601_v46 = vand.u32 4294901760, %v10472_v38  ;;  %v10504_v49 = vld [vmem:[%s12598_s1 + $0x78] sm:$0xff]  ;;  %v186_v56 = vld [vmem:[%s10342_s6 + $0x28] sm:$0xff]  ;;  %v187_v63 = vld [vmem:[%s10342_s6 + $0x30] sm:$0xff]  ;;  %p10149_p6 = scmp.ne.s32.totalorder %s12555_s24, %s10148_s28 }
  0x43   : > { %13042 = vst [vmem:[#allocation8_spill] sm:$0xff] %v10424_v23  ;;  %v396_v24 = vand.u32 4294901760, %v10424_v23  ;;  %v10494_v47 = vpack.c.bf16 %v12605_v33, %v12606_v32  ;;  %v10507_v50 = vsub.f32 %v182_v31, %v10474_v39  ;;  %v1677_v51 = vand.u32 4294901760, %v10476_v40  ;;  %v191_v27 = vld [vmem:[%s10342_s6 + $0x50] sm:$0xff]  ;;  %p13643_p10 = scmp.ne.s32.totalorder %s13039_s21, 0  ;;  %s10219_s13 = smov [#allocation5]  }
  0x44   : > { %13043 = vst [vmem:[#allocation9_spill] sm:$0xff] %v10462_v36  ;;  %v1684_v52 = vand.u32 4294901760, %v10478_v41  ;;  %v10511_v53 = vand.u32 4294901760, %v184_v43  ;;  %v10513_v54 = vand.u32 4294901760, %v185_v44  ;;  %v10516_v55 = vsub.f32 %v183_v35, %v10480_v42  ;;  %s10152_s30 = sshll.u32 %s10219_s13, 4  ;;  %s10153_s30 = int_to_ptr.vmem [resolvable:$false] %s10152_s30 }
  0x45   : > { %9080 = vmatpush3.bf16.msra.mxu1 %v10384_v13  ;;  %9176 = vmatpush3.bf16.msra.mxu0 %v10384_v13  ;;  %v397_v30 = vsub.f32 %v10424_v23, %v396_v24  ;;  %13044 = vst [vmem:[#allocation10_spill] sm:$0xff] %v10494_v47  ;;  %13045 = vst [vmem:[#allocation11_spill] sm:$0xff] %v10507_v50  ;;  %v12604_v57 = vand.u32 4294901760, %v10499_v48  ;;  %v12603_v58 = vand.u32 4294901760, %v10504_v49  ;;  %v12616_v60 = vand.u32 4294901760, %v10507_v50  ;;  %p10150_p11 = pnand %p10149_p6, %p13643_p10  ;;  %s10154_s3 = scalar_lea.vmem %s10153_s30, 1024 }
  0x46   : > { %9082 = vmatprep.subr.bf16.mxu1 %v10409_v18  ;;  %9178 = vmatprep.subr.bf16.mxu0 %v10409_v18  ;;  %13046 = vst [vmem:[#allocation12_spill] sm:$0xff] %v10516_v55  ;;  %v10529_v59 = vpack.c.bf16 %v12601_v46, %v12602_v45  ;;  %v1678_v61 = vsub.f32 %v10476_v40, %v1677_v51  ;;  %v10541_v3 = vand.u32 4294901760, %v186_v56  ;;  %v12615_v4 = vand.u32 4294901760, %v10516_v55  ;;  %p10155_p8 = scmp.lt.s32.totalorder %s12555_s24, %s10153_s30  ;;  %p10156_p9 = scmp.lt.s32.totalorder %s10154_s3, %s10148_s28 }
  0x47   : > { %8433 = vmatprep.mubr.f32.mxu0 %v396_v24  ;;  %v398_v34 = vand.u32 4294901760, %v397_v30  ;;  %v1685_v62 = vsub.f32 %v10478_v41, %v1684_v52  ;;  %v10536_v0 = vsub.f32 %v184_v43, %v10511_v53  ;;  %v10539_v1 = vsub.f32 %v185_v44, %v10513_v54  ;;  %v188_v24 = vld [vmem:[%s10342_s6 + $0x38] sm:$0xff]  ;;  %v189_v43 = vld [vmem:[%s10342_s6 + $0x40] sm:$0xff]  ;;  %p10151_p12 = pneg %p10150_p11 }
  0x48   : > { %13047 = vst [vmem:[#allocation13_spill] sm:$0xff] %v10529_v59  ;;  %v10546_v16 = vand.u32 4294901760, %v187_v63  ;;  %v10555_v30 = vpack.c.bf16 %v12603_v58, %v12604_v57  ;;  %v407_v31 = vsub.f32 %v10507_v50, %v12616_v60  ;;  %v10564_v45 = vsub.f32 %v186_v56, %v10541_v3  ;;  %p10157_p13 = por %p10156_p9, %p10155_p8 }
  0x49   : > { %9084 = vmatpush3.bf16.msra.mxu1 %v10409_v18  ;;  %9180 = vmatpush3.bf16.msra.mxu0 %v10409_v18  ;;  %13048 = vst [vmem:[#allocation14_spill] sm:$0xff] %v10536_v0  ;;  %13049 = vst [vmem:[#allocation15_spill] sm:$0xff] %v10539_v1  ;;  %v1686_v35 = vand.u32 4294901760, %v1685_v62  ;;  %v12614_v44 = vand.u32 4294901760, %v10536_v0  ;;  %v12613_v46 = vand.u32 4294901760, %v10539_v1  ;;  %v10569_v58 = vsub.f32 %v10357_v2, %v320_v6  ;;  %v190_v6 = vld [vmem:[%s10342_s6 + $0x48] sm:$0xff] }
  0x4a   : > { %9086 = vmatprep.subr.bf16.mxu1 %v10435_v25  ;;  %9182 = vmatprep.subr.bf16.mxu0 %v10435_v25  ;;  %13050 = vst [vmem:[#allocation16_spill] sm:$0xff] %v10555_v30  ;;  %13051 = vst [vmem:[#allocation17_spill] sm:$0xff] %v10564_v45  ;;  %v417_v57 = vsub.f32 %v10516_v55, %v12615_v4  ;;  %v10579_v62 = vsub.f32 %v10362_v5, %v323_v9  ;;  %v10586_v2 = vand.u32 4294901760, %v189_v43  ;;  %p10158_p1 = pnand %p10157_p13, %p10151_p12 }
  0x4b   : > { %7761 = vmatprep.mubr.f32.mxu1 %v398_v34  ;;  %v1679_v34 = vand.u32 4294901760, %v1678_v61  ;;  %v10574_v61 = vand.u32 4294901760, %v188_v24  ;;  %v10584_v56 = vsub.f32 %v187_v63, %v10546_v16  ;;  %v1691_v33 = vand.u32 4294901760, %v10569_v58 }
  0x4c   : > { %13053 = vst [vmem:[#allocation19_spill] sm:$0xff] %v10586_v2  ;;  %v408_v32 = vand.u32 4294901760, %v407_v31  ;;  %v9201_v9 = vpack.c.bf16 %v1684_v52, %v1677_v51  ;;  %v1698_v26 = vand.u32 4294901760, %v10579_v62  ;;  %v427_v63 = vsub.f32 %v10536_v0, %v12614_v44  ;;  %v192_v52 = vld [vmem:[%s10342_s6 + $0x58] sm:$0xff] }
  0x4d   : > { %9088 = vmatpush3.bf16.msra.mxu1 %v10435_v25  ;;  %9184 = vmatpush3.bf16.msra.mxu0 %v10435_v25  ;;  %13052 = vst [vmem:[#allocation18_spill] sm:$0xff] %v10584_v56  ;;  %v9105_v5 = vpack.c.bf16 %v1686_v35, %v1679_v34  ;;  %v437_v20 = vsub.f32 %v10539_v1, %v12613_v46  ;;  %v446_v19 = vand.u32 4294901760, %v10564_v45  ;;  %v418_v11 = vand.u32 4294901760, %v417_v57  ;;  %v193_v57 = vld [vmem:[%s10342_s6 + $0x60] sm:$0xff] }
  0x4e   : > { %9090 = vmatprep.subr.bf16.mxu1 %v10462_v36  ;;  %9186 = vmatprep.subr.bf16.mxu0 %v10462_v36  ;;  %v1692_v12 = vsub.f32 %v10569_v58, %v1691_v33  ;;  %v10603_v31 = vsub.f32 %v188_v24, %v10574_v61  ;;  %v10605_v51 = vand.u32 4294901760, %v190_v6  ;;  %v1699_v34 = vsub.f32 %v10579_v62, %v1698_v26 }
  0x4f   : > { %v456_v35 = vand.u32 4294901760, %v10584_v56  ;;  %v10613_v46 = vsub.f32 %v189_v43, %v10586_v2  ;;  %v10615_v44 = vand.u32 4294901760, %v191_v27  ;;  %v428_v60 = vand.u32 4294901760, %v427_v63 }
  0x50   : > { %13054 = vst [vmem:[#allocation20_spill] sm:$0xff] %v10603_v31  ;;  %v1693_v24 = vand.u32 4294901760, %v1692_v12  ;;  %v1700_v4 = vand.u32 4294901760, %v1699_v34  ;;  %v447_v23 = vsub.f32 %v10564_v45, %v446_v19  ;;  %v466_v43 = vand.u32 4294901760, %v10603_v31 }
  0x51   : > { %9092 = vmatpush3.bf16.msra.mxu1 %v10462_v36  ;;  %9188 = vmatpush3.bf16.msra.mxu0 %v10462_v36  ;;  %13055 = vst [vmem:[#allocation21_spill] sm:$0xff] %v10613_v46  ;;  %13056 = vst [vmem:[#allocation22_spill] sm:$0xff] %v10615_v44  ;;  %v9205_v36 = vpack.c.bf16 %v1698_v26, %v1691_v33  ;;  %v10626_v12 = vsub.f32 %v190_v6, %v10605_v51  ;;  %v10628_v2 = vand.u32 4294901760, %v193_v57  ;;  %v195_v6 = vld [vmem:[%s10342_s6 + $0x70] sm:$0xff] }
  0x52   : > { %9094 = vmatprep.subr.bf16.mxu1 %v10494_v47  ;;  %9190 = vmatprep.subr.bf16.mxu0 %v10494_v47  ;;  %v9109_v63 = vpack.c.bf16 %v1700_v4, %v1693_v24  ;;  %v438_v34 = vand.u32 4294901760, %v437_v20  ;;  %v457_v45 = vsub.f32 %v10584_v56, %v456_v35  ;;  %v476_v26 = vand.u32 4294901760, %v10613_v46  ;;  %v196_v4 = vld [vmem:[%s10342_s6 + $0x78] sm:$0xff]  ;;  %v197_v24 = vld [vmem:[%s10342_s6 + $0x80] sm:$0xff] }
  0x53   : > { %13059 = vst [vmem:[#allocation24_spill] sm:$0xff] %v10626_v12  ;;  %13060 = vst [vmem:[#allocation25_spill] sm:$0xff] %v10628_v2  ;;  %v13062_v33 = vand.u32 4294901760, %v10516_v55  ;;  %v467_v20 = vsub.f32 %v10603_v31, %v466_v43  ;;  %v10656_v31 = vand.u32 4294901760, %v195_v6 }
  0x55   : > { %9096 = vmatpush3.bf16.msra.mxu1 %v10494_v47  ;;  %9192 = vmatpush3.bf16.msra.mxu0 %v10494_v47  ;;  %v194_v47 = vld [vmem:[%s10342_s6 + $0x68] sm:$0xff]  ;;  %13068 = vst [vmem:[#allocation30_spill] sm:$0xff] %v10656_v31 }
  0x56   : > { %9098 = vmatprep.subr.bf16.mxu1 %v10529_v59  ;;  %9194 = vmatprep.subr.bf16.mxu0 %v10529_v59 }
  0x59   : > { %9100 = vmatpush3.bf16.msra.mxu1 %v10529_v59  ;;  %9196 = vmatpush3.bf16.msra.mxu0 %v10529_v59  ;;  %v10619_v59 = vand.u32 4294901760, %v192_v52 }
  0x5a   : > { %9102 = vmatprep.subr.bf16.mxu1 %v10555_v30  ;;  %9198 = vmatprep.subr.bf16.mxu0 %v10555_v30 }
  0x5b   : > { %13057 = vst [vmem:[#allocation23_spill] sm:$0xff] %v10619_v59 }
  0x5d   : > { %9104 = vmatpush3.bf16.msra.mxu1 %v10555_v30  ;;  %9200 = vmatpush3.bf16.msra.mxu0 %v10555_v30  ;;  %v13058_v30 = vand.u32 4294901760, %v10507_v50  ;;  %v448_v50 = vand.u32 4294901760, %v447_v23  ;;  %v13067_v23 = vand.u32 4294901760, %v10539_v1  ;;  %v198_v1 = vld [vmem:[%s10342_s6 + $0x88] sm:$0xff] }
  0x5e   : > { %9106 = vmatprep.subr.bf16.mxu1 %v9105_v5  ;;  %9202 = vmatprep.subr.bf16.mxu0 %v9201_v9 }
  0x60   : > { %7762 = vmatmul.mubr.f32.vlgmr.msra.gmra.mrb[0].mxu1 %v408_v32  ;;  %8434 = vmatmul.mubr.f32.vlgmr.msra.gmra.mrb[0].mxu0 %v13058_v30  ;;  %v10633_v32 = vsub.f32 %v191_v27, %v10615_v44  ;;  %v10637_v30 = vand.u32 4294901760, %v194_v47  ;;  %v486_v27 = vand.u32 4294901760, %v10626_v12  ;;  %v206_v44 = vld [vmem:[%s10342_s6 + $0xc8] sm:$0xff] }
  0x61   : > { %9108 = vmatpush3.bf16.msra.mxu1 %v9105_v5  ;;  %7764 = vmatprep.mubr.f32.mxu1 %v418_v11  ;;  %v13064_v11 = vand.u32 4294901760, %v10536_v0  ;;  %v10646_v5 = vsub.f32 %v192_v52, %v10619_v59  ;;  %v10661_v52 = vand.u32 4294901760, %v196_v4  ;;  %v10681_v0 = vand.u32 4294901760, %v198_v1 }
  0x62   : > { %13061 = vst [vmem:[#allocation26_spill] sm:$0xff] %v10633_v32  ;;  %8436 = vmatprep.mubr.f32.mxu0 %v13062_v33  ;;  %9204 = vmatpush3.bf16.msra.mxu0 %v9201_v9  ;;  %13063 = vst [vmem:[#allocation27_spill] sm:$0xff] %v10637_v30  ;;  %v10649_v9 = vsub.f32 %v193_v57, %v10628_v2  ;;  %v477_v33 = vsub.f32 %v10613_v46, %v476_v26  ;;  %v10663_v57 = vand.u32 4294901760, %v197_v24 }
  0x63   : > { %9110 = vmatprep.subr.bf16.mxu1 %v9109_v63  ;;  %9206 = vmatprep.subr.bf16.mxu0 %v9205_v36  ;;  %13065 = vst [vmem:[#allocation28_spill] sm:$0xff] %v10646_v5  ;;  %v10659_v56 = vsub.f32 %v194_v47, %v10637_v30  ;;  %13070 = vst [vmem:[#allocation32_spill] sm:$0xff] %v10661_v52 }
  0x64   : > { %7765 = vmatmul.mubr.f32.gmra.mrb[2].mxu1 %v428_v60  ;;  %8437 = vmatmul.mubr.f32.gmra.mrb[2].mxu0 %v13064_v11  ;;  %13066 = vst [vmem:[#allocation29_spill] sm:$0xff] %v10649_v9  ;;  %v458_v60 = vand.u32 4294901760, %v457_v45  ;;  %v496_v11 = vand.u32 4294901760, %v10633_v32  ;;  %13071 = vst [vmem:[#allocation33_spill] sm:$0xff] %v10663_v57  ;;  %v487_v45 = vsub.f32 %v10626_v12, %v486_v27  ;;  %v516_v46 = vand.u32 4294901760, %v10649_v9 }
  0x65   : > { %7767 = vmatprep.mubr.f32.mxu1 %v438_v34  ;;  %8439 = vmatprep.mubr.f32.mxu0 %v13067_v23  ;;  %13069 = vst [vmem:[#allocation31_spill] sm:$0xff] %v10659_v56  ;;  %v468_v34 = vand.u32 4294901760, %v467_v20  ;;  %v506_v23 = vand.u32 4294901760, %v10646_v5  ;;  %v478_v47 = vand.u32 4294901760, %v477_v33  ;;  %v199_v20 = vld [vmem:[%s10342_s6 + $0x90] sm:$0xff]  ;;  %v10679_v12 = vsub.f32 %v197_v24, %v10663_v57  ;;  %13075 = vst [vmem:[#allocation37_spill] sm:$0xff] %v10681_v0 }
  0x66   : > { %9112 = vmatpush3.bf16.msra.mxu1 %v9109_v63  ;;  %9208 = vmatpush3.bf16.msra.mxu0 %v9205_v36  ;;  %v497_v63 = vsub.f32 %v10633_v32, %v496_v11  ;;  %v10671_v36 = vsub.f32 %v195_v6, %v10656_v31  ;;  %v517_v6 = vsub.f32 %v10649_v9, %v516_v46  ;;  %v200_v33 = vld [vmem:[%s10342_s6 + $0x98] sm:$0xff]  ;;  %v10687_v32 = vand.u32 4294901760, %v199_v20  ;;  %v201_v9 = vld [vmem:[%s10342_s6 + $0xa0] sm:$0xff]  ;;  %v202_v57 = vld [vmem:[%s10342_s6 + $0xa8] sm:$0xff] }
  0x67   : > { %13074 = vst [vmem:[#allocation36_spill] sm:$0xff] %v10679_v12  ;;  %v13077_v24 = vand.u32 4294901760, %v10368_v7 }
  0x68   : > { %7768 = vmatmul.mubr.f32.gmra.mrb[4].mxu1 %v448_v50  ;;  %8440 = vmatmul.mubr.f32.gmra.mrb[4].mxu0 %v446_v19  ;;  %13072 = vst [vmem:[#allocation34_spill] sm:$0xff] %v10671_v36  ;;  %v10675_v19 = vsub.f32 %v196_v4, %v10661_v52  ;;  %v498_v50 = vand.u32 4294901760, %v497_v63  ;;  %v536_v4 = vand.u32 4294901760, %v10671_v36  ;;  %13076 = vst [vmem:[#allocation38_spill] sm:$0xff] %v10687_v32  ;;  %v10703_v63 = vand.u32 4294901760, %v200_v33 }
  0x69   : > { %7770 = vmatprep.mubr.f32.mxu1 %v458_v60  ;;  %8442 = vmatprep.mubr.f32.mxu0 %v456_v35  ;;  %v488_v35 = vand.u32 4294901760, %v487_v45  ;;  %v507_v60 = vsub.f32 %v10646_v5, %v506_v23  ;;  %v10692_v55 = vsub.f32 %v10368_v7, %v13077_v24  ;;  %v518_v24 = vand.u32 4294901760, %v517_v6 }
  0x6a   : > { %13073 = vst [vmem:[#allocation35_spill] sm:$0xff] %v10675_v19  ;;  %13080 = vst [vmem:[#allocation40_spill] sm:$0xff] %v10703_v63  ;;  %v13083_v52 = vand.u32 4294901760, %v10675_v19 }
  0x6b   : > { %v1705_v5 = vand.u32 4294901760, %v10692_v55  ;;  %v508_v7 = vand.u32 4294901760, %v507_v60  ;;  %v203_v60 = vld [vmem:[%s10342_s6 + $0xb0] sm:$0xff] }
  0x6c   : > { %7771 = vmatmul.mubr.f32.gmra.mrb[6].mxu1 %v468_v34  ;;  %8443 = vmatmul.mubr.f32.gmra.mrb[6].mxu0 %v466_v43  ;;  %v13078_v43 = vand.u32 4294901760, %v10659_v56 }
  0x6d   : > { %7773 = vmatprep.mubr.f32.mxu1 %v478_v47  ;;  %8445 = vmatprep.mubr.f32.mxu0 %v476_v26  ;;  %v10701_v47 = vsub.f32 %v198_v1, %v10681_v0  ;;  %v537_v26 = vsub.f32 %v10671_v36, %v536_v4  ;;  %v10713_v1 = vsub.f32 %v199_v20, %v10687_v32  ;;  %v10715_v0 = vand.u32 4294901760, %v201_v9 }
  0x6e   : > { %v527_v34 = vsub.f32 %v10659_v56, %v13078_v43  ;;  %v13081_v43 = vand.u32 4294901760, %v10373_v8 }
  0x6f   : > { %13079 = vst [vmem:[#allocation39_spill] sm:$0xff] %v10701_v47  ;;  %13082 = vst [vmem:[#allocation41_spill] sm:$0xff] %v10713_v1  ;;  %v566_v20 = vand.u32 4294901760, %v10701_v47  ;;  %v538_v31 = vand.u32 4294901760, %v537_v26  ;;  %v10736_v30 = vsub.f32 %v201_v9, %v10715_v0 }
  0x70   : > { %7774 = vmatmul.mubr.f32.gmra.mrb[8].mxu1 %v488_v35  ;;  %8446 = vmatmul.mubr.f32.gmra.mrb[8].mxu0 %v486_v27  ;;  %v10709_v45 = vsub.f32 %v10373_v8, %v13081_v43  ;;  %v1706_v35 = vsub.f32 %v10692_v55, %v1705_v5  ;;  %v528_v27 = vand.u32 4294901760, %v527_v34  ;;  %v547_v8 = vsub.f32 %v10675_v19, %v13083_v52 }
  0x71   : > { %7776 = vmatprep.mubr.f32.mxu1 %v498_v50  ;;  %8448 = vmatprep.mubr.f32.mxu0 %v496_v11  ;;  %v13084_v11 = vand.u32 4294901760, %v10679_v12  ;;  %v10729_v43 = vsub.f32 %v200_v33, %v10703_v63  ;;  %v10731_v34 = vand.u32 4294901760, %v202_v57  ;;  %13087 = vst [vmem:[#allocation44_spill] sm:$0xff] %v10736_v30  ;;  %v10738_v33 = vand.u32 4294901760, %v203_v60 }
  0x72   : > { %v1712_v6 = vand.u32 4294901760, %v10709_v45  ;;  %v1707_v36 = vand.u32 4294901760, %v1706_v35  ;;  %v548_v35 = vand.u32 4294901760, %v547_v8  ;;  %v567_v59 = vsub.f32 %v10701_v47, %v566_v20 }
  0x73   : > { %v557_v50 = vsub.f32 %v10679_v12, %v13084_v11  ;;  %13085 = vst [vmem:[#allocation42_spill] sm:$0xff] %v10729_v43  ;;  %13086 = vst [vmem:[#allocation43_spill] sm:$0xff] %v10731_v34  ;;  %v576_v11 = vand.u32 4294901760, %v10713_v1  ;;  %v586_v9 = vand.u32 4294901760, %v10729_v43  ;;  %v10749_v26 = vsub.f32 %v202_v57, %v10731_v34 }
  0x74   : > { %7777 = vmatmul.mubr.f32.gmra.mrb[10].mxu1 %v508_v7  ;;  %8449 = vmatmul.mubr.f32.gmra.mrb[10].mxu0 %v506_v23  ;;  %v1713_v32 = vsub.f32 %v10709_v45, %v1712_v6  ;;  %v9209_v52 = vpack.c.bf16 %v1712_v6, %v1705_v5  ;;  %13088 = vst [vmem:[#allocation45_spill] sm:$0xff] %v10738_v33  ;;  %v204_v7 = vld [vmem:[%s10342_s6 + $0xb8] sm:$0xff]  ;;  %v205_v23 = vld [vmem:[%s10342_s6 + $0xc0] sm:$0xff]  ;;  %v207_v5 = vld [vmem:[%s10342_s6 + $0xd0] sm:$0xff]  ;;  %v596_v8 = vand.u32 4294901760, %v10736_v30  ;;  %v568_v57 = vand.u32 4294901760, %v567_v59 }
  0x75   : > { %7779 = vmatprep.mubr.f32.mxu1 %v518_v24  ;;  %8451 = vmatprep.mubr.f32.mxu0 %v516_v46  ;;  %v558_v2 = vand.u32 4294901760, %v557_v50  ;;  %v13089_v46 = vand.u32 4294901760, %v10659_v56  ;;  %13090 = vst [vmem:[#allocation46_spill] sm:$0xff] %v10749_v26  ;;  %v10751_v24 = vand.u32 4294901760, %v204_v7  ;;  %v577_v6 = vsub.f32 %v10713_v1, %v576_v11  ;;  %v211_v56 = vld [vmem:[%s10342_s6 + $0xf0] sm:$0xff] }
  0x76   : > { %v1714_v63 = vand.u32 4294901760, %v1713_v32  ;;  %9210 = vmatprep.subr.bf16.mxu0 %v9209_v52  ;;  %v10758_v50 = vand.u32 4294901760, %v205_v23  ;;  %v13098_v1 = vand.u32 4294901760, %v10679_v12 }
  0x77   : > { %9212 = vmatpush3.bf16.msra.mxu0 %v9209_v52  ;;  %13091 = vst [vmem:[#allocation47_spill] sm:$0xff] %v10751_v24  ;;  %v10760_v52 = vand.u32 4294901760, %v206_v44  ;;  %v578_v47 = vand.u32 4294901760, %v577_v6 }
  0x78   : > { %7780 = vmatmul.mubr.f32.gmra.mrb[12].mxu1 %v528_v27  ;;  %8452 = vmatmul.mubr.f32.gmra.mrb[12].mxu0 %v13089_v46  ;;  %v9113_v32 = vpack.c.bf16 %v1714_v63, %v1707_v36  ;;  %v10756_v27 = vsub.f32 %v203_v60, %v10738_v33  ;;  %13093 = vst [vmem:[#allocation49_spill] sm:$0xff] %v10758_v50  ;;  %v10762_v46 = vand.u32 4294901760, %v207_v5  ;;  %v208_v60 = vld [vmem:[%s10342_s6 + $0xd8] sm:$0xff] }
  0x79   : > { %7782 = vmatprep.mubr.f32.mxu1 %v538_v31  ;;  %8454 = vmatprep.mubr.f32.mxu0 %v536_v4  ;;  %13094 = vst [vmem:[#allocation50_spill] sm:$0xff] %v10760_v52  ;;  %v13096_v31 = vand.u32 4294901760, %v10675_v19  ;;  %v587_v36 = vsub.f32 %v10729_v43, %v586_v9  ;;  %v606_v4 = vand.u32 4294901760, %v10749_v26  ;;  %v10769_v63 = vsub.f32 %v204_v7, %v10751_v24  ;;  %v210_v19 = vld [vmem:[%s10342_s6 + $0xe8] sm:$0xff]  ;;  %v217_v24 = vld [vmem:[%s10342_s6 + $0x120] sm:$0xff] }
  0x7a   : > { %13092 = vst [vmem:[#allocation48_spill] sm:$0xff] %v10756_v27  ;;  %13095 = vst [vmem:[#allocation51_spill] sm:$0xff] %v10762_v46  ;;  %9114 = vmatprep.subr.bf16.mxu1 %v9113_v32  ;;  %v10780_v59 = vsub.f32 %v206_v44, %v10760_v52  ;;  %v10783_v7 = vsub.f32 %v207_v5, %v10762_v46  ;;  %v10786_v43 = vand.u32 4294901760, %v208_v60 }
  0x7b   : > { %9116 = vmatpush3.bf16.msra.mxu1 %v9113_v32  ;;  %13097 = vst [vmem:[#allocation52_spill] sm:$0xff] %v10769_v63  ;;  %v597_v32 = vsub.f32 %v10736_v30, %v596_v8  ;;  %v607_v6 = vsub.f32 %v10749_v26, %v606_v4  ;;  %v626_v30 = vand.u32 4294901760, %v10769_v63  ;;  %v212_v26 = vld [vmem:[%s10342_s6 + $0xf8] sm:$0xff] }
  0x7c   : > { %7783 = vmatmul.mubr.f32.gmra.mrb[14].mxu1 %v548_v35  ;;  %8455 = vmatmul.mubr.f32.gmra.mrb[14].mxu0 %v13096_v31  ;;  %v616_v35 = vand.u32 4294901760, %v10756_v27  ;;  %v10777_v31 = vsub.f32 %v205_v23, %v10758_v50  ;;  %13100 = vst [vmem:[#allocation54_spill] sm:$0xff] %v10780_v59  ;;  %13101 = vst [vmem:[#allocation55_spill] sm:$0xff] %v10783_v7 }
  0x7d   : > { %7785 = vmatprep.mubr.f32.mxu1 %v558_v2  ;;  %8457 = vmatprep.mubr.f32.mxu0 %v13098_v1  ;;  %v209_v2 = vld [vmem:[%s10342_s6 + $0xe0] sm:$0xff]  ;;  %13102 = vst [vmem:[#allocation56_spill] sm:$0xff] %v10786_v43  ;;  %v588_v1 = vand.u32 4294901760, %v587_v36  ;;  %v598_v23 = vand.u32 4294901760, %v597_v32  ;;  %v10799_v36 = vsub.f32 %v208_v60, %v10786_v43  ;;  %v10802_v32 = vand.u32 4294901760, %v210_v19 }
  0x7e   : > { %13099 = vst [vmem:[#allocation53_spill] sm:$0xff] %v10777_v31  ;;  %v617_v44 = vsub.f32 %v10756_v27, %v616_v35  ;;  %v636_v12 = vand.u32 4294901760, %v10777_v31  ;;  %v10792_v5 = vand.u32 4294901760, %v209_v2  ;;  %v10804_v27 = vand.u32 4294901760, %v211_v56 }
  0x7f   : > { %13104 = vst [vmem:[#allocation58_spill] sm:$0xff] %v10799_v36  ;;  %13105 = vst [vmem:[#allocation59_spill] sm:$0xff] %v10802_v32 }
  0x80   : > { %7786 = vmatmul.mubr.f32.gmra.mrb[16].mxu1 %v568_v57  ;;  %8458 = vmatmul.mubr.f32.gmra.mrb[16].mxu0 %v566_v20  ;;  %13103 = vst [vmem:[#allocation57_spill] sm:$0xff] %v10792_v5  ;;  %v646_v57 = vand.u32 4294901760, %v10780_v59  ;;  %13106 = vst [vmem:[#allocation60_spill] sm:$0xff] %v10804_v27  ;;  %v618_v46 = vand.u32 4294901760, %v617_v44  ;;  %v637_v52 = vsub.f32 %v10777_v31, %v636_v12 }
  0x81   : > { %7788 = vmatprep.mubr.f32.mxu1 %v578_v47  ;;  %8460 = vmatprep.mubr.f32.mxu0 %v576_v11  ;;  %v608_v47 = vand.u32 4294901760, %v607_v6  ;;  %v627_v11 = vsub.f32 %v10769_v63, %v626_v30  ;;  %v10809_v20 = vsub.f32 %v209_v2, %v10792_v5  ;;  %v213_v6 = vld [vmem:[%s10342_s6 + $0x100] sm:$0xff]  ;;  %v13109_v63 = vand.u32 4294901760, %v10389_v14 }
  0x82   : > { %v647_v60 = vsub.f32 %v10780_v59, %v646_v57  ;;  %v13111_v2 = vand.u32 4294901760, %v10394_v15  ;;  %v10830_v59 = vsub.f32 %v210_v19, %v10802_v32 }
  0x83   : > { %13107 = vst [vmem:[#allocation61_spill] sm:$0xff] %v10809_v20  ;;  %v10819_v43 = vsub.f32 %v10389_v14, %v13109_v63  ;;  %v10833_v14 = vsub.f32 %v211_v56, %v10804_v27  ;;  %v676_v31 = vand.u32 4294901760, %v10809_v20  ;;  %v13115_v56 = vand.u32 4294901760, %v10799_v36 }
  0x84   : > { %7789 = vmatmul.mubr.f32.gmra.mrb[18].mxu1 %v588_v1  ;;  %8461 = vmatmul.mubr.f32.gmra.mrb[18].mxu0 %v586_v9  ;;  %v13108_v9 = vand.u32 4294901760, %v10783_v7  ;;  %v10827_v44 = vsub.f32 %v10394_v15, %v13111_v2  ;;  %13112 = vst [vmem:[#allocation63_spill] sm:$0xff] %v10830_v59  ;;  %v10837_v15 = vand.u32 4294901760, %v213_v6  ;;  %v214_v2 = vld [vmem:[%s10342_s6 + $0x108] sm:$0xff]  ;;  %v686_v50 = vand.u32 4294901760, %v10830_v59 }
  0x85   : > { %7791 = vmatprep.mubr.f32.mxu1 %v598_v23  ;;  %8463 = vmatprep.mubr.f32.mxu0 %v596_v8  ;;  %v10822_v23 = vand.u32 4294901760, %v212_v26  ;;  %13113 = vst [vmem:[#allocation64_spill] sm:$0xff] %v10833_v14  ;;  %v1719_v63 = vand.u32 4294901760, %v10819_v43  ;;  %v638_v8 = vand.u32 4294901760, %v637_v52  ;;  %v667_v27 = vsub.f32 %v10799_v36, %v13115_v56  ;;  %v216_v52 = vld [vmem:[%s10342_s6 + $0x118] sm:$0xff] }
  0x86   : > { %v657_v1 = vsub.f32 %v10783_v7, %v13108_v9  ;;  %v628_v9 = vand.u32 4294901760, %v627_v11  ;;  %13114 = vst [vmem:[#allocation65_spill] sm:$0xff] %v10837_v15  ;;  %v215_v11 = vld [vmem:[%s10342_s6 + $0x110] sm:$0xff]  ;;  %v10858_v56 = vsub.f32 %v213_v6, %v10837_v15 }
  0x87   : > { %13110 = vst [vmem:[#allocation62_spill] sm:$0xff] %v10822_v23  ;;  %v1720_v32 = vsub.f32 %v10819_v43, %v1719_v63 }
  0x88   : > { %7792 = vmatmul.mubr.f32.gmra.mrb[20].mxu1 %v608_v47  ;;  %8464 = vmatmul.mubr.f32.gmra.mrb[20].mxu0 %v606_v4  ;;  %v1726_v4 = vand.u32 4294901760, %v10827_v44  ;;  %v648_v47 = vand.u32 4294901760, %v647_v60  ;;  %v658_v19 = vand.u32 4294901760, %v657_v1  ;;  %v696_v60 = vand.u32 4294901760, %v10833_v14  ;;  %13118 = vst [vmem:[#allocation68_spill] sm:$0xff] %v10858_v56 }
  0x89   : > { %7794 = vmatprep.mubr.f32.mxu1 %v618_v46  ;;  %8466 = vmatprep.mubr.f32.mxu0 %v616_v35  ;;  %v10847_v46 = vsub.f32 %v212_v26, %v10822_v23  ;;  %v10853_v1 = vand.u32 4294901760, %v214_v2  ;;  %v1721_v33 = vand.u32 4294901760, %v1720_v32  ;;  %v677_v26 = vsub.f32 %v10809_v20, %v676_v31 }
  0x8a   : > { %v1727_v35 = vsub.f32 %v10827_v44, %v1726_v4  ;;  %v9213_v5 = vpack.c.bf16 %v1726_v4, %v1719_v63  ;;  %v10860_v23 = vand.u32 4294901760, %v215_v11  ;;  %v10864_v63 = vand.u32 4294901760, %v217_v24 }
  0x8b   : > { %13116 = vst [vmem:[#allocation66_spill] sm:$0xff] %v10847_v46  ;;  %13117 = vst [vmem:[#allocation67_spill] sm:$0xff] %v10853_v1  ;;  %v687_v32 = vsub.f32 %v10830_v59, %v686_v50  ;;  %v706_v6 = vand.u32 4294901760, %v10847_v46  ;;  %v13123_v20 = vand.u32 4294901760, %v10783_v7  ;;  %v678_v15 = vand.u32 4294901760, %v677_v26 }
  0x8c   : > { %7795 = vmatmul.mubr.f32.gmra.mrb[22].mxu1 %v628_v9  ;;  %8467 = vmatmul.mubr.f32.gmra.mrb[22].mxu0 %v626_v30  ;;  %13119 = vst [vmem:[#allocation69_spill] sm:$0xff] %v10860_v23  ;;  %v1728_v9 = vand.u32 4294901760, %v1727_v35  ;;  %v10862_v30 = vand.u32 4294901760, %v216_v52  ;;  %13121 = vst [vmem:[#allocation71_spill] sm:$0xff] %v10864_v63  ;;  %v218_v35 = vld [vmem:[%s10342_s6 + $0x128] sm:$0xff]  ;;  %v13128_v26 = vand.u32 4294901760, %v10799_v36 }
  0x8d   : > { %7797 = vmatprep.mubr.f32.mxu1 %v638_v8  ;;  %8469 = vmatprep.mubr.f32.mxu0 %v636_v12  ;;  %v668_v12 = vand.u32 4294901760, %v667_v27  ;;  %v10869_v8 = vsub.f32 %v214_v2, %v10853_v1  ;;  %v10877_v27 = vsub.f32 %v215_v11, %v10860_v23  ;;  %v10884_v2 = vsub.f32 %v217_v24, %v10864_v63 }
  0x8e   : > { %13120 = vst [vmem:[#allocation70_spill] sm:$0xff] %v10862_v30  ;;  %9214 = vmatprep.subr.bf16.mxu0 %v9213_v5  ;;  %v9117_v4 = vpack.c.bf16 %v1728_v9, %v1721_v33  ;;  %v697_v33 = vsub.f32 %v10833_v14, %v696_v60  ;;  %v688_v11 = vand.u32 4294901760, %v687_v32  ;;  %v707_v9 = vsub.f32 %v10847_v46, %v706_v6  ;;  %v222_v46 = vld [vmem:[%s10342_s6 + $0x148] sm:$0xff] }
  0x8f   : > { %9216 = vmatpush3.bf16.msra.mxu0 %v9213_v5  ;;  %13122 = vst [vmem:[#allocation72_spill] sm:$0xff] %v10869_v8  ;;  %v716_v5 = vand.u32 4294901760, %v10858_v56  ;;  %13124 = vst [vmem:[#allocation73_spill] sm:$0xff] %v10877_v27  ;;  %v736_v7 = vand.u32 4294901760, %v10877_v27 }
  0x90   : > { %7798 = vmatmul.mubr.f32.gmra.mrb[24].mxu1 %v648_v47  ;;  %8470 = vmatmul.mubr.f32.gmra.mrb[24].mxu0 %v646_v57  ;;  %v219_v57 = vld [vmem:[%s10342_s6 + $0x130] sm:$0xff]  ;;  %v10881_v47 = vsub.f32 %v216_v52, %v10862_v30  ;;  %13126 = vst [vmem:[#allocation75_spill] sm:$0xff] %v10884_v2  ;;  %v726_v52 = vand.u32 4294901760, %v10869_v8  ;;  %v698_v24 = vand.u32 4294901760, %v697_v33 }
  0x91   : > { %7800 = vmatprep.mubr.f32.mxu1 %v658_v19  ;;  %8472 = vmatprep.mubr.f32.mxu0 %v13123_v20  ;;  %v10886_v19 = vand.u32 4294901760, %v218_v35  ;;  %v220_v20 = vld [vmem:[%s10342_s6 + $0x138] sm:$0xff]  ;;  %v10893_v14 = vand.u32 4294901760, %v219_v57  ;;  %v717_v59 = vsub.f32 %v10858_v56, %v716_v5  ;;  %v737_v32 = vsub.f32 %v10877_v27, %v736_v7 }
  0x92   : > { %13125 = vst [vmem:[#allocation74_spill] sm:$0xff] %v10881_v47  ;;  %9118 = vmatprep.subr.bf16.mxu1 %v9117_v4  ;;  %v10899_v36 = vand.u32 4294901760, %v220_v20 }
  0x93   : > { %13127 = vst [vmem:[#allocation76_spill] sm:$0xff] %v10886_v19  ;;  %9120 = vmatpush3.bf16.msra.mxu1 %v9117_v4  ;;  %13129 = vst [vmem:[#allocation77_spill] sm:$0xff] %v10893_v14  ;;  %v221_v4 = vld [vmem:[%s10342_s6 + $0x140] sm:$0xff]  ;;  %v10908_v33 = vsub.f32 %v219_v57, %v10893_v14  ;;  %v718_v63 = vand.u32 4294901760, %v717_v59  ;;  %v13136_v57 = vand.u32 4294901760, %v10884_v2  ;;  %v13137_v59 = vand.u32 4294901760, %v10416_v21 }
  0x94   : > { %7801 = vmatmul.mubr.f32.gmra.mrb[26].mxu1 %v668_v12  ;;  %8473 = vmatmul.mubr.f32.gmra.mrb[26].mxu0 %v13128_v26  ;;  %v746_v12 = vand.u32 4294901760, %v10881_v47  ;;  %13130 = vst [vmem:[#allocation78_spill] sm:$0xff] %v10899_v36  ;;  %v10903_v26 = vsub.f32 %v218_v35, %v10886_v19  ;;  %v10910_v56 = vand.u32 4294901760, %v221_v4  ;;  %v10915_v35 = vsub.f32 %v220_v20, %v10899_v36  ;;  %v225_v14 = vld [vmem:[%s10342_s6 + $0x160] sm:$0xff] }
  0x95   : > { %7803 = vmatprep.mubr.f32.mxu1 %v678_v15  ;;  %8475 = vmatprep.mubr.f32.mxu0 %v676_v31  ;;  %v708_v31 = vand.u32 4294901760, %v707_v9  ;;  %v727_v15 = vsub.f32 %v10869_v8, %v726_v52  ;;  %13132 = vst [vmem:[#allocation80_spill] sm:$0xff] %v10908_v33  ;;  %v757_v9 = vsub.f32 %v10884_v2, %v13136_v57  ;;  %v776_v20 = vand.u32 4294901760, %v10908_v33  ;;  %v224_v57 = vld [vmem:[%s10342_s6 + $0x158] sm:$0xff] }
  0x96   : > { %13131 = vst [vmem:[#allocation79_spill] sm:$0xff] %v10903_v26  ;;  %13133 = vst [vmem:[#allocation81_spill] sm:$0xff] %v10910_v56  ;;  %v747_v30 = vsub.f32 %v10881_v47, %v746_v12  ;;  %v10931_v27 = vsub.f32 %v221_v4, %v10910_v56  ;;  %v738_v8 = vand.u32 4294901760, %v737_v32  ;;  %v10954_v56 = vand.u32 4294901760, %v225_v14 }
  0x97   : > { %13134 = vst [vmem:[#allocation82_spill] sm:$0xff] %v10915_v35  ;;  %v728_v47 = vand.u32 4294901760, %v727_v15  ;;  %v786_v15 = vand.u32 4294901760, %v10915_v35 }
  0x98   : > { %7804 = vmatmul.mubr.f32.gmra.mrb[28].mxu1 %v688_v11  ;;  %8476 = vmatmul.mubr.f32.gmra.mrb[28].mxu0 %v686_v50  ;;  %v10917_v50 = vand.u32 4294901760, %v222_v46  ;;  %v223_v11 = vld [vmem:[%s10342_s6 + $0x150] sm:$0xff]  ;;  %13138 = vst [vmem:[#allocation84_spill] sm:$0xff] %v10931_v27  ;;  %13143 = vst [vmem:[#allocation88_spill] sm:$0xff] %v10954_v56 }
  0x99   : > { %7806 = vmatprep.mubr.f32.mxu1 %v698_v24  ;;  %8478 = vmatprep.mubr.f32.mxu0 %v696_v60  ;;  %v766_v24 = vand.u32 4294901760, %v10903_v26  ;;  %v10927_v60 = vsub.f32 %v10416_v21, %v13137_v59  ;;  %v10933_v36 = vand.u32 4294901760, %v223_v11  ;;  %v13140_v21 = vand.u32 4294901760, %v10421_v22 }
  0x9a   : > { %13135 = vst [vmem:[#allocation83_spill] sm:$0xff] %v10917_v50  ;;  %v10945_v4 = vsub.f32 %v222_v46, %v10917_v50  ;;  %v227_v50 = vld [vmem:[%s10342_s6 + $0x170] sm:$0xff]  ;;  %v787_v23 = vsub.f32 %v10915_v35, %v786_v15  ;;  %v230_v35 = vld [vmem:[%s10342_s6 + $0x188] sm:$0xff] }
  0x9b   : > { %13139 = vst [vmem:[#allocation85_spill] sm:$0xff] %v10933_v36  ;;  %v1733_v19 = vand.u32 4294901760, %v10927_v60  ;;  %v10957_v46 = vsub.f32 %v223_v11, %v10933_v36  ;;  %v228_v36 = vld [vmem:[%s10342_s6 + $0x178] sm:$0xff] }
  0x9c   : > { %7807 = vmatmul.mubr.f32.gmra.mrb[30].mxu1 %v708_v31  ;;  %8479 = vmatmul.mubr.f32.gmra.mrb[30].mxu0 %v706_v6  ;;  %v10941_v31 = vsub.f32 %v10421_v22, %v13140_v21  ;;  %v748_v6 = vand.u32 4294901760, %v747_v30  ;;  %13141 = vst [vmem:[#allocation86_spill] sm:$0xff] %v10945_v4  ;;  %v777_v22 = vsub.f32 %v10908_v33, %v776_v20  ;;  %v796_v30 = vand.u32 4294901760, %v10931_v27 }
  0x9d   : > { %7809 = vmatprep.mubr.f32.mxu1 %v718_v63  ;;  %8481 = vmatprep.mubr.f32.mxu0 %v716_v5  ;;  %v758_v63 = vand.u32 4294901760, %v757_v9  ;;  %v767_v5 = vsub.f32 %v10903_v26, %v766_v24  ;;  %v1734_v32 = vsub.f32 %v10927_v60, %v1733_v19  ;;  %v10952_v21 = vand.u32 4294901760, %v224_v57  ;;  %13144 = vst [vmem:[#allocation89_spill] sm:$0xff] %v10957_v46  ;;  %v226_v9 = vld [vmem:[%s10342_s6 + $0x168] sm:$0xff] }
  0x9e   : > { %v1740_v59 = vand.u32 4294901760, %v10941_v31  ;;  %v806_v1 = vand.u32 4294901760, %v10945_v4 }
  0x9f   : > { %13142 = vst [vmem:[#allocation87_spill] sm:$0xff] %v10952_v21  ;;  %v1735_v26 = vand.u32 4294901760, %v1734_v32  ;;  %v768_v33 = vand.u32 4294901760, %v767_v5  ;;  %v10966_v11 = vsub.f32 %v224_v57, %v10952_v21  ;;  %v10968_v32 = vand.u32 4294901760, %v226_v9 }
  0xa0   : > { %7810 = vmatmul.mubr.f32.gmra.mrb[32].mxu1 %v728_v47  ;;  %8482 = vmatmul.mubr.f32.gmra.mrb[32].mxu0 %v726_v52  ;;  %v1741_v47 = vsub.f32 %v10941_v31, %v1740_v59  ;;  %v9217_v52 = vpack.c.bf16 %v1740_v59, %v1733_v19  ;;  %v229_v19 = vld [vmem:[%s10342_s6 + $0x180] sm:$0xff]  ;;  %v13147_v5 = vand.u32 4294901760, %v10884_v2  ;;  %v816_v59 = vand.u32 4294901760, %v10957_v46 }
  0xa1   : > { %7812 = vmatprep.mubr.f32.mxu1 %v738_v8  ;;  %8484 = vmatprep.mubr.f32.mxu0 %v736_v7  ;;  %v778_v7 = vand.u32 4294901760, %v777_v22  ;;  %v797_v8 = vsub.f32 %v10931_v27, %v796_v30  ;;  %13145 = vst [vmem:[#allocation90_spill] sm:$0xff] %v10966_v11  ;;  %13146 = vst [vmem:[#allocation91_spill] sm:$0xff] %v10968_v32  ;;  %v10980_v57 = vand.u32 4294901760, %v228_v36  ;;  %v826_v27 = vand.u32 4294901760, %v10966_v11 }
  0xa2   : > { %v1742_v34 = vand.u32 4294901760, %v1741_v47  ;;  %9218 = vmatprep.subr.bf16.mxu0 %v9217_v52  ;;  %v10982_v47 = vand.u32 4294901760, %v229_v19 }
  0xa3   : > { %9220 = vmatpush3.bf16.msra.mxu0 %v9217_v52  ;;  %13150 = vst [vmem:[#allocation94_spill] sm:$0xff] %v10980_v57 }
  0xa4   : > { %7813 = vmatmul.mubr.f32.gmra.mrb[34].mxu1 %v748_v6  ;;  %8485 = vmatmul.mubr.f32.gmra.mrb[34].mxu0 %v746_v12  ;;  %v10976_v6 = vsub.f32 %v225_v14, %v10954_v56  ;;  %v10978_v12 = vand.u32 4294901760, %v227_v50  ;;  %v9121_v22 = vpack.c.bf16 %v1742_v34, %v1735_v26  ;;  %13151 = vst [vmem:[#allocation95_spill] sm:$0xff] %v10982_v47  ;;  %v798_v34 = vand.u32 4294901760, %v797_v8 }
  0xa5   : > { %7815 = vmatprep.mubr.f32.mxu1 %v758_v63  ;;  %8487 = vmatprep.mubr.f32.mxu0 %v13147_v5  ;;  %v788_v63 = vand.u32 4294901760, %v787_v23  ;;  %v807_v5 = vsub.f32 %v10945_v4, %v806_v1  ;;  %v10987_v14 = vsub.f32 %v226_v9, %v10968_v32  ;;  %v817_v26 = vsub.f32 %v10957_v46, %v816_v59  ;;  %v233_v4 = vld [vmem:[%s10342_s6 + $0x1a0] sm:$0xff] }
  0xa6   : > { %13148 = vst [vmem:[#allocation92_spill] sm:$0xff] %v10976_v6  ;;  %13149 = vst [vmem:[#allocation93_spill] sm:$0xff] %v10978_v12  ;;  %9122 = vmatprep.subr.bf16.mxu1 %v9121_v22  ;;  %v836_v52 = vand.u32 4294901760, %v10976_v6  ;;  %v10993_v2 = vsub.f32 %v227_v50, %v10978_v12  ;;  %v10997_v23 = vsub.f32 %v228_v36, %v10980_v57  ;;  %v11002_v9 = vand.u32 4294901760, %v230_v35 }
  0xa7   : > { %13152 = vst [vmem:[#allocation96_spill] sm:$0xff] %v10987_v14  ;;  %9124 = vmatpush3.bf16.msra.mxu1 %v9121_v22  ;;  %v846_v50 = vand.u32 4294901760, %v10987_v14  ;;  %v818_v8 = vand.u32 4294901760, %v817_v26 }
  0xa8   : > { %7816 = vmatmul.mubr.f32.gmra.mrb[36].mxu1 %v768_v33  ;;  %8488 = vmatmul.mubr.f32.gmra.mrb[36].mxu0 %v766_v24  ;;  %13153 = vst [vmem:[#allocation97_spill] sm:$0xff] %v10993_v2  ;;  %v231_v33 = vld [vmem:[%s10342_s6 + $0x190] sm:$0xff]  ;;  %13154 = vst [vmem:[#allocation98_spill] sm:$0xff] %v10997_v23  ;;  %v11000_v24 = vsub.f32 %v229_v19, %v10982_v47  ;;  %v837_v22 = vsub.f32 %v10976_v6, %v836_v52  ;;  %v856_v36 = vand.u32 4294901760, %v10993_v2  ;;  %v232_v19 = vld [vmem:[%s10342_s6 + $0x198] sm:$0xff] }
  0xa9   : > { %7818 = vmatprep.mubr.f32.mxu1 %v778_v7  ;;  %8490 = vmatprep.mubr.f32.mxu0 %v776_v20  ;;  %13156 = vst [vmem:[#allocation100_spill] sm:$0xff] %v11002_v9  ;;  %v808_v20 = vand.u32 4294901760, %v807_v5  ;;  %v827_v7 = vsub.f32 %v10966_v11, %v826_v27  ;;  %v11008_v46 = vand.u32 4294901760, %v231_v33  ;;  %v11015_v5 = vsub.f32 %v230_v35, %v11002_v9  ;;  %v234_v6 = vld [vmem:[%s10342_s6 + $0x1a8] sm:$0xff]  ;;  %v235_v35 = vld [vmem:[%s10342_s6 + $0x1b0] sm:$0xff] }
  0xaa   : > { %13155 = vst [vmem:[#allocation99_spill] sm:$0xff] %v11000_v24  ;;  %v11018_v26 = vand.u32 4294901760, %v232_v19  ;;  %v838_v11 = vand.u32 4294901760, %v837_v22  ;;  %v857_v47 = vsub.f32 %v10993_v2, %v856_v36  ;;  %v11056_v57 = vand.u32 4294901760, %v235_v35 }
  0xab   : > { %13157 = vst [vmem:[#allocation101_spill] sm:$0xff] %v11008_v46  ;;  %13158 = vst [vmem:[#allocation102_spill] sm:$0xff] %v11015_v5  ;;  %v886_v2 = vand.u32 4294901760, %v11015_v5 }
  0xac   : > { %7819 = vmatmul.mubr.f32.gmra.mrb[38].mxu1 %v788_v63  ;;  %8491 = vmatmul.mubr.f32.gmra.mrb[38].mxu0 %v786_v15  ;;  %13159 = vst [vmem:[#allocation103_spill] sm:$0xff] %v11018_v26  ;;  %v11023_v15 = vsub.f32 %v231_v33, %v11008_v46  ;;  %v11025_v63 = vand.u32 4294901760, %v233_v4  ;;  %v13165_v33 = vand.u32 4294901760, %v11000_v24  ;;  %v11045_v46 = vand.u32 4294901760, %v234_v6  ;;  %13169 = vst [vmem:[#allocation109_spill] sm:$0xff] %v11056_v57 }
  0xad   : > { %7821 = vmatprep.mubr.f32.mxu1 %v798_v34  ;;  %8493 = vmatprep.mubr.f32.mxu0 %v796_v30  ;;  %v828_v30 = vand.u32 4294901760, %v827_v7  ;;  %v847_v34 = vsub.f32 %v10987_v14, %v846_v50  ;;  %v13163_v7 = vand.u32 4294901760, %v10447_v29 }
  0xae   : > { %13160 = vst [vmem:[#allocation104_spill] sm:$0xff] %v11023_v15  ;;  %13161 = vst [vmem:[#allocation105_spill] sm:$0xff] %v11025_v63  ;;  %v877_v22 = vsub.f32 %v11000_v24, %v13165_v33  ;;  %v896_v33 = vand.u32 4294901760, %v11023_v15  ;;  %v11054_v9 = vsub.f32 %v233_v4, %v11025_v63  ;;  %v238_v63 = vld [vmem:[%s10342_s6 + $0x1c8] sm:$0xff] }
  0xaf   : > { %v11036_v14 = vsub.f32 %v10447_v29, %v13163_v7  ;;  %13166 = vst [vmem:[#allocation106_spill] sm:$0xff] %v11045_v46  ;;  %v11048_v29 = vsub.f32 %v232_v19, %v11018_v26 }
  0xb0   : > { %7822 = vmatmul.mubr.f32.gmra.mrb[40].mxu1 %v808_v20  ;;  %8494 = vmatmul.mubr.f32.gmra.mrb[40].mxu0 %v806_v1  ;;  %v13162_v20 = vand.u32 4294901760, %v10442_v28  ;;  %13168 = vst [vmem:[#allocation108_spill] sm:$0xff] %v11054_v9  ;;  %v878_v32 = vand.u32 4294901760, %v877_v22  ;;  %v916_v22 = vand.u32 4294901760, %v11054_v9 }
  0xb1   : > { %7824 = vmatprep.mubr.f32.mxu1 %v818_v8  ;;  %8496 = vmatprep.mubr.f32.mxu0 %v816_v59  ;;  %v13164_v59 = vand.u32 4294901760, %v10997_v23  ;;  %13167 = vst [vmem:[#allocation107_spill] sm:$0xff] %v11048_v29  ;;  %v1754_v7 = vand.u32 4294901760, %v11036_v14  ;;  %v906_v4 = vand.u32 4294901760, %v11048_v29 }
  0xb2   : > { %v11031_v1 = vsub.f32 %v10442_v28, %v13162_v20  ;;  %v848_v28 = vand.u32 4294901760, %v847_v34 }
  0xb3   : > { %v867_v8 = vsub.f32 %v10997_v23, %v13164_v59  ;;  %v858_v59 = vand.u32 4294901760, %v857_v47  ;;  %v1755_v34 = vsub.f32 %v11036_v14, %v1754_v7  ;;  %v11064_v47 = vsub.f32 %v234_v6, %v11045_v46  ;;  %v251_v46 = vld [vmem:[%s10342_s6 + $0x230] sm:$0xff] }
  0xb4   : > { %7825 = vmatmul.mubr.f32.gmra.mrb[42].mxu1 %v828_v30  ;;  %8497 = vmatmul.mubr.f32.gmra.mrb[42].mxu0 %v826_v27  ;;  %v1747_v20 = vand.u32 4294901760, %v11031_v1  ;;  %v236_v27 = vld [vmem:[%s10342_s6 + $0x1b8] sm:$0xff]  ;;  %v237_v30 = vld [vmem:[%s10342_s6 + $0x1c0] sm:$0xff] }
  0xb5   : > { %7827 = vmatprep.mubr.f32.mxu1 %v838_v11  ;;  %8499 = vmatprep.mubr.f32.mxu0 %v836_v52  ;;  %v868_v12 = vand.u32 4294901760, %v867_v8  ;;  %v887_v11 = vsub.f32 %v11015_v5, %v886_v2  ;;  %13170 = vst [vmem:[#allocation110_spill] sm:$0xff] %v11064_v47  ;;  %v11067_v52 = vand.u32 4294901760, %v236_v27  ;;  %v1756_v21 = vand.u32 4294901760, %v1755_v34 }
  0xb6   : > { %v1748_v19 = vsub.f32 %v11031_v1, %v1747_v20  ;;  %v9221_v26 = vpack.c.bf16 %v1754_v7, %v1747_v20  ;;  %v897_v8 = vsub.f32 %v11023_v15, %v896_v33  ;;  %v11073_v20 = vsub.f32 %v235_v35, %v11056_v57 }
  0xb7   : > { %13171 = vst [vmem:[#allocation111_spill] sm:$0xff] %v11067_v52  ;;  %v11075_v6 = vand.u32 4294901760, %v237_v30  ;;  %v926_v7 = vand.u32 4294901760, %v11064_v47  ;;  %v11079_v5 = vand.u32 4294901760, %v238_v63  ;;  %v907_v35 = vsub.f32 %v11048_v29, %v906_v4 }
  0xb8   : > { %7828 = vmatmul.mubr.f32.gmra.mrb[44].mxu1 %v848_v28  ;;  %8500 = vmatmul.mubr.f32.gmra.mrb[44].mxu0 %v846_v50  ;;  %v1749_v56 = vand.u32 4294901760, %v1748_v19  ;;  %13172 = vst [vmem:[#allocation112_spill] sm:$0xff] %v11073_v20  ;;  %v239_v50 = vld [vmem:[%s10342_s6 + $0x1d0] sm:$0xff]  ;;  %v240_v19 = vld [vmem:[%s10342_s6 + $0x1d8] sm:$0xff]  ;;  %v11086_v34 = vsub.f32 %v236_v27, %v11067_v52  ;;  %v898_v15 = vand.u32 4294901760, %v897_v8 }
  0xb9   : > { %7830 = vmatprep.mubr.f32.mxu1 %v858_v59  ;;  %8502 = vmatprep.mubr.f32.mxu0 %v856_v36  ;;  %13173 = vst [vmem:[#allocation113_spill] sm:$0xff] %v11075_v6  ;;  %13174 = vst [vmem:[#allocation114_spill] sm:$0xff] %v11079_v5  ;;  %v13175_v36 = vand.u32 4294901760, %v10997_v23  ;;  %v888_v59 = vand.u32 4294901760, %v887_v11  ;;  %v241_v11 = vld [vmem:[%s10342_s6 + $0x1e0] sm:$0xff]  ;;  %v11098_v23 = vand.u32 4294901760, %v240_v19  ;;  %v927_v27 = vsub.f32 %v11064_v47, %v926_v7 }
  0xba   : > { %v9125_v28 = vpack.c.bf16 %v1756_v21, %v1749_v56  ;;  %9222 = vmatprep.subr.bf16.mxu0 %v9221_v26  ;;  %13176 = vst [vmem:[#allocation115_spill] sm:$0xff] %v11086_v34  ;;  %v11088_v56 = vand.u32 4294901760, %v239_v50  ;;  %v13178_v21 = vand.u32 4294901760, %v11000_v24  ;;  %v11102_v29 = vsub.f32 %v238_v63, %v11079_v5 }
  0xbb   : > { %9224 = vmatpush3.bf16.msra.mxu0 %v9221_v26  ;;  %v917_v26 = vsub.f32 %v11054_v9, %v916_v22  ;;  %13180 = vst [vmem:[#allocation118_spill] sm:$0xff] %v11098_v23  ;;  %v908_v8 = vand.u32 4294901760, %v907_v35  ;;  %v11109_v9 = vand.u32 4294901760, %v241_v11  ;;  %v928_v35 = vand.u32 4294901760, %v927_v27  ;;  %v245_v27 = vld [vmem:[%s10342_s6 + $0x200] sm:$0xff] }
  0xbc   : > { %7831 = vmatmul.mubr.f32.gmra.mrb[46].mxu1 %v868_v12  ;;  %8503 = vmatmul.mubr.f32.gmra.mrb[46].mxu0 %v13175_v36  ;;  %13177 = vst [vmem:[#allocation116_spill] sm:$0xff] %v11088_v56  ;;  %v936_v12 = vand.u32 4294901760, %v11073_v20  ;;  %v11095_v36 = vsub.f32 %v237_v30, %v11075_v6  ;;  %13181 = vst [vmem:[#allocation119_spill] sm:$0xff] %v11102_v29  ;;  %v11107_v30 = vsub.f32 %v239_v50, %v11088_v56 }
  0xbd   : > { %7833 = vmatprep.mubr.f32.mxu1 %v878_v32  ;;  %8505 = vmatprep.mubr.f32.mxu0 %v13178_v21  ;;  %v242_v32 = vld [vmem:[%s10342_s6 + $0x1e8] sm:$0xff]  ;;  %v946_v21 = vand.u32 4294901760, %v11086_v34  ;;  %13183 = vst [vmem:[#allocation121_spill] sm:$0xff] %v11109_v9  ;;  %v918_v47 = vand.u32 4294901760, %v917_v26  ;;  %v966_v50 = vand.u32 4294901760, %v11102_v29  ;;  %v11123_v26 = vsub.f32 %v241_v11, %v11109_v9 }
  0xbe   : > { %13179 = vst [vmem:[#allocation117_spill] sm:$0xff] %v11095_v36  ;;  %9126 = vmatprep.subr.bf16.mxu1 %v9125_v28  ;;  %13182 = vst [vmem:[#allocation120_spill] sm:$0xff] %v11107_v30  ;;  %v937_v63 = vsub.f32 %v11073_v20, %v936_v12  ;;  %v956_v24 = vand.u32 4294901760, %v11095_v36  ;;  %v244_v20 = vld [vmem:[%s10342_s6 + $0x1f8] sm:$0xff] }
  0xbf   : > { %9128 = vmatpush3.bf16.msra.mxu1 %v9125_v28  ;;  %v11114_v28 = vsub.f32 %v240_v19, %v11098_v23  ;;  %13186 = vst [vmem:[#allocation124_spill] sm:$0xff] %v11123_v26 }
  0xc0   : > { %7834 = vmatmul.mubr.f32.gmra.mrb[48].mxu1 %v888_v59  ;;  %8506 = vmatmul.mubr.f32.gmra.mrb[48].mxu0 %v886_v2  ;;  %v11116_v2 = vand.u32 4294901760, %v242_v32  ;;  %v243_v59 = vld [vmem:[%s10342_s6 + $0x1f0] sm:$0xff]  ;;  %v938_v19 = vand.u32 4294901760, %v937_v63  ;;  %v957_v23 = vsub.f32 %v11095_v36, %v956_v24  ;;  %v10113_v63 = vld [vmem:[%s12598_s1 + $0x60] sm:$0xff] }
  0xc1   : > { %7836 = vmatprep.mubr.f32.mxu1 %v898_v15  ;;  %8508 = vmatprep.mubr.f32.mxu0 %v896_v33  ;;  %13184 = vst [vmem:[#allocation122_spill] sm:$0xff] %v11114_v28  ;;  %v947_v15 = vsub.f32 %v11086_v34, %v946_v21  ;;  %v976_v33 = vand.u32 4294901760, %v11107_v30  ;;  %v11127_v56 = vand.u32 4294901760, %v243_v59  ;;  %v11135_v34 = vand.u32 4294901760, %v244_v20 }
  0xc2   : > { %13185 = vst [vmem:[#allocation123_spill] sm:$0xff] %v11116_v2 }
  0xc3   : > { %13187 = vst [vmem:[#allocation125_spill] sm:$0xff] %v11127_v56  ;;  %13189 = vst [vmem:[#allocation127_spill] sm:$0xff] %v11135_v34  ;;  %v11147_v36 = vsub.f32 %v243_v59, %v11127_v56  ;;  %v13195_v59 = vand.u32 4294901760, %v10472_v38 }
  0xc4   : > { %7837 = vmatmul.mubr.f32.gmra.mrb[50].mxu1 %v908_v8  ;;  %8509 = vmatmul.mubr.f32.gmra.mrb[50].mxu0 %v906_v4  ;;  %v11131_v4 = vsub.f32 %v242_v32, %v11116_v2  ;;  %v967_v8 = vsub.f32 %v11102_v29, %v966_v50  ;;  %v13190_v32 = vand.u32 4294901760, %v10467_v37  ;;  %v958_v29 = vand.u32 4294901760, %v957_v23  ;;  %v247_v2 = vld [vmem:[%s10342_s6 + $0x210] sm:$0xff] }
  0xc5   : > { %7839 = vmatprep.mubr.f32.mxu1 %v918_v47  ;;  %8511 = vmatprep.mubr.f32.mxu0 %v916_v22  ;;  %v948_v47 = vand.u32 4294901760, %v947_v15  ;;  %v977_v22 = vsub.f32 %v11107_v30, %v976_v33  ;;  %13191 = vst [vmem:[#allocation128_spill] sm:$0xff] %v11147_v36  ;;  %v13193_v15 = vand.u32 4294901760, %v11114_v28  ;;  %v11159_v23 = vsub.f32 %v244_v20, %v11135_v34 }
  0xc6   : > { %13188 = vst [vmem:[#allocation126_spill] sm:$0xff] %v11131_v4  ;;  %v11144_v5 = vsub.f32 %v10113_v63, %v13190_v32  ;;  %v968_v63 = vand.u32 4294901760, %v967_v8  ;;  %v1016_v34 = vand.u32 4294901760, %v11147_v36 }
  0xc7   : > { %v987_v11 = vsub.f32 %v11114_v28, %v13193_v15  ;;  %13194 = vst [vmem:[#allocation130_spill] sm:$0xff] %v11159_v23  ;;  %v978_v32 = vand.u32 4294901760, %v977_v22  ;;  %v13196_v15 = vand.u32 4294901760, %v11123_v26 }
  0xc8   : > { %7840 = vmatmul.mubr.f32.gmra.mrb[52].mxu1 %v928_v35  ;;  %8512 = vmatmul.mubr.f32.gmra.mrb[52].mxu0 %v926_v7  ;;  %v11149_v7 = vand.u32 4294901760, %v245_v27  ;;  %v246_v35 = vld [vmem:[%s10342_s6 + $0x208] sm:$0xff]  ;;  %v1761_v37 = vand.u32 4294901760, %v11144_v5 }
  0xc9   : > { %7842 = vmatprep.mubr.f32.mxu1 %v938_v19  ;;  %8514 = vmatprep.mubr.f32.mxu0 %v936_v12  ;;  %v10114_v12 = vld [vmem:[%s12598_s1 + $0x68] sm:$0xff]  ;;  %v997_v8 = vsub.f32 %v11123_v26, %v13196_v15  ;;  %v11171_v30 = vand.u32 4294901760, %v246_v35  ;;  %v13200_v15 = vand.u32 4294901760, %v11131_v4 }
  0xca   : > { %13192 = vst [vmem:[#allocation129_spill] sm:$0xff] %v11149_v7  ;;  %v11166_v19 = vsub.f32 %v10114_v12, %v13195_v59  ;;  %v1762_v20 = vsub.f32 %v11144_v5, %v1761_v37  ;;  %v11176_v38 = vsub.f32 %v245_v27, %v11149_v7  ;;  %v11178_v12 = vand.u32 4294901760, %v247_v2 }
  0xcb   : > { %13197 = vst [vmem:[#allocation131_spill] sm:$0xff] %v11171_v30  ;;  %v988_v59 = vand.u32 4294901760, %v987_v11  ;;  %v1007_v56 = vsub.f32 %v11131_v4, %v13200_v15  ;;  %v998_v7 = vand.u32 4294901760, %v997_v8  ;;  %v11190_v52 = vsub.f32 %v246_v35, %v11171_v30 }
  0xcc   : > { %7843 = vmatmul.mubr.f32.gmra.mrb[54].mxu1 %v948_v47  ;;  %8515 = vmatmul.mubr.f32.gmra.mrb[54].mxu0 %v946_v21  ;;  %13198 = vst [vmem:[#allocation132_spill] sm:$0xff] %v11176_v38  ;;  %13199 = vst [vmem:[#allocation133_spill] sm:$0xff] %v11178_v12  ;;  %v248_v21 = vld [vmem:[%s10342_s6 + $0x218] sm:$0xff]  ;;  %v249_v47 = vld [vmem:[%s10342_s6 + $0x220] sm:$0xff]  ;;  %v1768_v22 = vand.u32 4294901760, %v11166_v19  ;;  %v1763_v9 = vand.u32 4294901760, %v1762_v20  ;;  %v1017_v15 = vsub.f32 %v11147_v36, %v1016_v34 }
  0xcd   : > { %7845 = vmatprep.mubr.f32.mxu1 %v958_v29  ;;  %8517 = vmatprep.mubr.f32.mxu0 %v956_v24  ;;  %v1026_v29 = vand.u32 4294901760, %v11159_v23  ;;  %v250_v24 = vld [vmem:[%s10342_s6 + $0x228] sm:$0xff]  ;;  %13201 = vst [vmem:[#allocation134_spill] sm:$0xff] %v11190_v52  ;;  %v11192_v57 = vand.u32 4294901760, %v248_v21  ;;  %v11194_v11 = vand.u32 4294901760, %v249_v47  ;;  %v1036_v20 = vand.u32 4294901760, %v11176_v38 }
  0xce   : > { %v1769_v6 = vsub.f32 %v11166_v19, %v1768_v22  ;;  %v9225_v27 = vpack.c.bf16 %v1768_v22, %v1761_v37  ;;  %v11200_v37 = vsub.f32 %v247_v2, %v11178_v12  ;;  %v1008_v35 = vand.u32 4294901760, %v1007_v56  ;;  %v252_v22 = vld [vmem:[%s10342_s6 + $0x238] sm:$0xff] }
  0xcf   : > { %13202 = vst [vmem:[#allocation135_spill] sm:$0xff] %v11192_v57  ;;  %13203 = vst [vmem:[#allocation136_spill] sm:$0xff] %v11194_v11  ;;  %v11204_v8 = vand.u32 4294901760, %v251_v46  ;;  %v1046_v2 = vand.u32 4294901760, %v11190_v52  ;;  %v11215_v36 = vsub.f32 %v249_v47, %v11194_v11  ;;  %v13210_v56 = vand.u32 4294901760, %v11123_v26 }
  0xd0   : > { %7846 = vmatmul.mubr.f32.gmra.mrb[56].mxu1 %v968_v63  ;;  %8518 = vmatmul.mubr.f32.gmra.mrb[56].mxu0 %v966_v50  ;;  %13204 = vst [vmem:[#allocation137_spill] sm:$0xff] %v11200_v37  ;;  %v1770_v50 = vand.u32 4294901760, %v1769_v6  ;;  %v11202_v63 = vand.u32 4294901760, %v250_v24  ;;  %v11212_v6 = vsub.f32 %v248_v21, %v11192_v57  ;;  %v253_v21 = vld [vmem:[%s10342_s6 + $0x240] sm:$0xff] }
  0xd1   : > { %7848 = vmatprep.mubr.f32.mxu1 %v978_v32  ;;  %8520 = vmatprep.mubr.f32.mxu0 %v976_v33  ;;  %13206 = vst [vmem:[#allocation139_spill] sm:$0xff] %v11204_v8  ;;  %v13207_v33 = vand.u32 4294901760, %v11114_v28  ;;  %v1027_v32 = vsub.f32 %v11159_v23, %v1026_v29  ;;  %13209 = vst [vmem:[#allocation141_spill] sm:$0xff] %v11215_v36  ;;  %v11228_v47 = vsub.f32 %v251_v46, %v11204_v8 }
  0xd2   : > { %13205 = vst [vmem:[#allocation138_spill] sm:$0xff] %v11202_v63  ;;  %9226 = vmatprep.subr.bf16.mxu0 %v9225_v27  ;;  %v9129_v30 = vpack.c.bf16 %v1770_v50, %v1763_v9  ;;  %13208 = vst [vmem:[#allocation140_spill] sm:$0xff] %v11212_v6  ;;  %v1018_v9 = vand.u32 4294901760, %v1017_v15  ;;  %v11222_v50 = vsub.f32 %v250_v24, %v11202_v63  ;;  %v1066_v24 = vand.u32 4294901760, %v11212_v6 }
  0xd3   : > { %9228 = vmatpush3.bf16.msra.mxu0 %v9225_v27  ;;  %v1056_v27 = vand.u32 4294901760, %v11200_v37  ;;  %13213 = vst [vmem:[#allocation144_spill] sm:$0xff] %v11228_v47  ;;  %v1028_v15 = vand.u32 4294901760, %v1027_v32  ;;  %v11236_v26 = vand.u32 4294901760, %v253_v21  ;;  %v255_v32 = vld [vmem:[%s10342_s6 + $0x250] sm:$0xff]  ;;  %v13225_v8 = vand.u32 4294901760, %v10504_v49 }
  0xd4   : > { %7849 = vmatmul.mubr.f32.gmra.mrb[58].mxu1 %v988_v59  ;;  %8521 = vmatmul.mubr.f32.gmra.mrb[58].mxu0 %v13207_v33  ;;  %v1037_v59 = vsub.f32 %v11176_v38, %v1036_v20  ;;  %13211 = vst [vmem:[#allocation142_spill] sm:$0xff] %v11222_v50  ;;  %v11224_v33 = vand.u32 4294901760, %v252_v22  ;;  %v1076_v38 = vand.u32 4294901760, %v11215_v36  ;;  %v11253_v28 = vand.u32 4294901760, %v255_v32 }
  0xd5   : > { %7851 = vmatprep.mubr.f32.mxu1 %v998_v7  ;;  %8523 = vmatprep.mubr.f32.mxu0 %v13210_v56  ;;  %v13214_v7 = vand.u32 4294901760, %v11131_v4  ;;  %v1047_v56 = vsub.f32 %v11190_v52, %v1046_v2  ;;  %v1057_v46 = vsub.f32 %v11200_v37, %v1056_v27  ;;  %13215 = vst [vmem:[#allocation145_spill] sm:$0xff] %v11236_v26  ;;  %v256_v4 = vld [vmem:[%s10342_s6 + $0x258] sm:$0xff]  ;;  %v257_v52 = vld [vmem:[%s10342_s6 + $0x260] sm:$0xff] }
  0xd6   : > { %13212 = vst [vmem:[#allocation143_spill] sm:$0xff] %v11224_v33  ;;  %9130 = vmatprep.subr.bf16.mxu1 %v9129_v30  ;;  %v1038_v23 = vand.u32 4294901760, %v1037_v59  ;;  %v1077_v59 = vsub.f32 %v11215_v36, %v1076_v38  ;;  %13219 = vst [vmem:[#allocation149_spill] sm:$0xff] %v11253_v28  ;;  %v13221_v36 = vand.u32 4294901760, %v11228_v47 }
  0xd7   : > { %9132 = vmatpush3.bf16.msra.mxu1 %v9129_v30  ;;  %v254_v30 = vld [vmem:[%s10342_s6 + $0x248] sm:$0xff] }
  0xd8   : > { %7852 = vmatmul.mubr.f32.gmra.mrb[60].mxu1 %v1008_v35  ;;  %8524 = vmatmul.mubr.f32.gmra.mrb[60].mxu0 %v13214_v7  ;;  %v11241_v7 = vsub.f32 %v252_v22, %v11224_v33  ;;  %v11247_v37 = vand.u32 4294901760, %v254_v30  ;;  %v1058_v35 = vand.u32 4294901760, %v1057_v46  ;;  %v11251_v22 = vsub.f32 %v253_v21, %v11236_v26  ;;  %v258_v33 = vld [vmem:[%s10342_s6 + $0x268] sm:$0xff] }
  0xd9   : > { %7854 = vmatprep.mubr.f32.mxu1 %v1018_v9  ;;  %8526 = vmatprep.mubr.f32.mxu0 %v1016_v34  ;;  %v1048_v9 = vand.u32 4294901760, %v1047_v56  ;;  %v1067_v34 = vsub.f32 %v11212_v6, %v1066_v24  ;;  %v1097_v6 = vsub.f32 %v11228_v47, %v13221_v36  ;;  %v13223_v21 = vand.u32 4294901760, %v10499_v48  ;;  %v10116_v36 = vld [vmem:[%s12598_s1 + $0x78] sm:$0xff] }
  0xda   : > { %13216 = vst [vmem:[#allocation146_spill] sm:$0xff] %v11241_v7  ;;  %13217 = vst [vmem:[#allocation147_spill] sm:$0xff] %v11247_v37  ;;  %v1078_v56 = vand.u32 4294901760, %v1077_v59  ;;  %v11273_v26 = vsub.f32 %v254_v30, %v11247_v37  ;;  %v11281_v63 = vsub.f32 %v10116_v36, %v13225_v8  ;;  %v1116_v48 = vand.u32 4294901760, %v11251_v22  ;;  %v259_v30 = vld [vmem:[%s10342_s6 + $0x270] sm:$0xff] }
  0xdb   : > { %13218 = vst [vmem:[#allocation148_spill] sm:$0xff] %v11251_v22 }
  0xdc   : > { %7855 = vmatmul.mubr.f32.gmra.mrb[62].mxu1 %v1028_v15  ;;  %8527 = vmatmul.mubr.f32.gmra.mrb[62].mxu0 %v1026_v29  ;;  %v13220_v15 = vand.u32 4294901760, %v11222_v50  ;;  %13224 = vst [vmem:[#allocation151_spill] sm:$0xff] %v11273_v26  ;;  %v1782_v8 = vand.u32 4294901760, %v11281_v63  ;;  %v1126_v36 = vand.u32 4294901760, %v11273_v26 }
  0xdd   : > { %7857 = vmatprep.mubr.f32.mxu1 %v1038_v23  ;;  %8529 = vmatprep.mubr.f32.mxu0 %v1036_v20  ;;  %v11263_v23 = vand.u32 4294901760, %v256_v4  ;;  %v10115_v20 = vld [vmem:[%s12598_s1 + $0x70] sm:$0xff] }
  0xde   : > { %v1087_v29 = vsub.f32 %v11222_v50, %v13220_v15  ;;  %v11270_v46 = vsub.f32 %v10115_v20, %v13223_v21  ;;  %v1068_v15 = vand.u32 4294901760, %v1067_v34  ;;  %v13228_v20 = vand.u32 4294901760, %v11241_v7 }
  0xdf   : > { %13222 = vst [vmem:[#allocation150_spill] sm:$0xff] %v11263_v23  ;;  %v11298_v21 = vand.u32 4294901760, %v258_v33 }
  0xe0   : > { %7858 = vmatmul.mubr.f32.gmra.mrb[64].mxu1 %v1048_v9  ;;  %8530 = vmatmul.mubr.f32.gmra.mrb[64].mxu0 %v1046_v2  ;;  %v11285_v2 = vsub.f32 %v255_v32, %v11253_v28  ;;  %v11287_v9 = vand.u32 4294901760, %v257_v52  ;;  %v1775_v34 = vand.u32 4294901760, %v11270_v46  ;;  %v1088_v59 = vand.u32 4294901760, %v1087_v29  ;;  %v260_v28 = vld [vmem:[%s10342_s6 + $0x278] sm:$0xff] }
  0xe1   : > { %7860 = vmatprep.mubr.f32.mxu1 %v1058_v35  ;;  %8532 = vmatprep.mubr.f32.mxu0 %v1056_v27  ;;  %v1107_v49 = vsub.f32 %v11241_v7, %v13228_v20  ;;  %v1098_v35 = vand.u32 4294901760, %v1097_v6  ;;  %v11296_v27 = vsub.f32 %v256_v4, %v11263_v23  ;;  %13230 = vst [vmem:[#allocation155_spill] sm:$0xff] %v11298_v21  ;;  %v11302_v29 = vand.u32 4294901760, %v259_v30 }
  0xe2   : > { %13226 = vst [vmem:[#allocation152_spill] sm:$0xff] %v11285_v2  ;;  %13227 = vst [vmem:[#allocation153_spill] sm:$0xff] %v11287_v9  ;;  %v1776_v32 = vsub.f32 %v11270_v46, %v1775_v34  ;;  %v1783_v20 = vsub.f32 %v11281_v63, %v1782_v8  ;;  %v9229_v37 = vpack.c.bf16 %v1782_v8, %v1775_v34  ;;  %v1136_v6 = vand.u32 4294901760, %v11285_v2 }
  0xe3   : > { %13229 = vst [vmem:[#allocation154_spill] sm:$0xff] %v11296_v27  ;;  %13231 = vst [vmem:[#allocation156_spill] sm:$0xff] %v11302_v29  ;;  %v1117_v4 = vsub.f32 %v11251_v22, %v1116_v48  ;;  %v11309_v23 = vsub.f32 %v257_v52, %v11287_v9  ;;  %v1108_v57 = vand.u32 4294901760, %v1107_v49  ;;  %v11313_v12 = vsub.f32 %v258_v33, %v11298_v21  ;;  %v263_v22 = vld [vmem:[%s10342_s6 + $0x290] sm:$0xff] }
  0xe4   : > { %7861 = vmatmul.mubr.f32.gmra.mrb[66].mxu1 %v1068_v15  ;;  %8533 = vmatmul.mubr.f32.gmra.mrb[66].mxu0 %v1066_v24  ;;  %v1777_v11 = vand.u32 4294901760, %v1776_v32  ;;  %v261_v15 = vld [vmem:[%s10342_s6 + $0x280] sm:$0xff]  ;;  %v1784_v24 = vand.u32 4294901760, %v1783_v20  ;;  %v11315_v34 = vand.u32 4294901760, %v260_v28  ;;  %v1127_v52 = vsub.f32 %v11273_v26, %v1126_v36 }
  0xe5   : > { %7863 = vmatprep.mubr.f32.mxu1 %v1078_v56  ;;  %8535 = vmatprep.mubr.f32.mxu0 %v1076_v38  ;;  %13232 = vst [vmem:[#allocation157_spill] sm:$0xff] %v11309_v23  ;;  %13233 = vst [vmem:[#allocation158_spill] sm:$0xff] %v11313_v12  ;;  %v13235_v38 = vand.u32 4294901760, %v11222_v50  ;;  %v1146_v56 = vand.u32 4294901760, %v11296_v27  ;;  %v11322_v8 = vsub.f32 %v259_v30, %v11302_v29  ;;  %v13237_v33 = vand.u32 4294901760, %v11228_v47 }
  0xe6   : > { %9230 = vmatprep.subr.bf16.mxu0 %v9229_v37  ;;  %13234 = vst [vmem:[#allocation159_spill] sm:$0xff] %v11315_v34  ;;  %v9133_v49 = vpack.c.bf16 %v1784_v24, %v1777_v11  ;;  %v1118_v32 = vand.u32 4294901760, %v1117_v4  ;;  %v1137_v20 = vsub.f32 %v11285_v2, %v1136_v6  ;;  %v1166_v30 = vand.u32 4294901760, %v11313_v12 }
  0xe7   : > { %9232 = vmatpush3.bf16.msra.mxu0 %v9229_v37  ;;  %13236 = vst [vmem:[#allocation160_spill] sm:$0xff] %v11322_v8  ;;  %v1156_v37 = vand.u32 4294901760, %v11309_v23  ;;  %v11335_v11 = vsub.f32 %v260_v28, %v11315_v34  ;;  %v1128_v4 = vand.u32 4294901760, %v1127_v52  ;;  %v1147_v24 = vsub.f32 %v11296_v27, %v1146_v56 }
  0xe8   : > { %7864 = vmatmul.mubr.f32.gmra.mrb[68].mxu1 %v1088_v59  ;;  %8536 = vmatmul.mubr.f32.gmra.mrb[68].mxu0 %v13235_v38  ;;  %v11328_v59 = vand.u32 4294901760, %v261_v15  ;;  %v262_v38 = vld [vmem:[%s10342_s6 + $0x288] sm:$0xff]  ;;  %v1138_v26 = vand.u32 4294901760, %v1137_v20  ;;  %v1167_v52 = vsub.f32 %v11313_v12, %v1166_v30 }
  0xe9   : > { %7866 = vmatprep.mubr.f32.mxu1 %v1098_v35  ;;  %8538 = vmatprep.mubr.f32.mxu0 %v13237_v33  ;;  %13239 = vst [vmem:[#allocation162_spill] sm:$0xff] %v11335_v11  ;;  %v13240_v35 = vand.u32 4294901760, %v11241_v7  ;;  %v1176_v33 = vand.u32 4294901760, %v11322_v8  ;;  %v11341_v2 = vand.u32 4294901760, %v262_v38  ;;  %v1157_v47 = vsub.f32 %v11309_v23, %v1156_v37 }
  0xea   : > { %13238 = vst [vmem:[#allocation161_spill] sm:$0xff] %v11328_v59  ;;  %9134 = vmatprep.subr.bf16.mxu1 %v9133_v49  ;;  %9234 = vmatprep.subr.bf16.mxu0 %v10376_v10  ;;  %v11345_v28 = vsub.f32 %v261_v15, %v11328_v59  ;;  %v1186_v27 = vand.u32 4294901760, %v11335_v11 }
  0xeb   : > { %9136 = vmatpush3.bf16.msra.mxu1 %v9133_v49  ;;  %13241 = vst [vmem:[#allocation163_spill] sm:$0xff] %v11341_v2  ;;  %v11347_v49 = vand.u32 4294901760, %v263_v22  ;;  %v11355_v20 = vsub.f32 %v262_v38, %v11341_v2  ;;  %v1158_v23 = vand.u32 4294901760, %v1157_v47 }
  0xec   : > { %7867 = vmatmul.mubr.f32.gmra.mrb[70].mxu1 %v1108_v57  ;;  %8539 = vmatmul.mubr.f32.gmra.mrb[70].mxu0 %v13240_v35  ;;  %13242 = vst [vmem:[#allocation164_spill] sm:$0xff] %v11345_v28  ;;  %v264_v57 = vld [vmem:[%s10342_s6 + $0x298] sm:$0xff]  ;;  %v265_v35 = vld [vmem:[%s10342_s6 + $0x2a0] sm:$0xff]  ;;  %v1196_v7 = vand.u32 4294901760, %v11345_v28  ;;  %v1187_v38 = vsub.f32 %v11335_v11, %v1186_v27 }
  0xed   : > { %7869 = vmatprep.mubr.f32.mxu1 %v1118_v32  ;;  %8541 = vmatprep.mubr.f32.mxu0 %v1116_v48  ;;  %13243 = vst [vmem:[#allocation165_spill] sm:$0xff] %v11347_v49  ;;  %v1148_v32 = vand.u32 4294901760, %v1147_v24  ;;  %v1177_v48 = vsub.f32 %v11322_v8, %v1176_v33  ;;  %13244 = vst [vmem:[#allocation166_spill] sm:$0xff] %v11355_v20  ;;  %v11357_v15 = vand.u32 4294901760, %v264_v57  ;;  %v11363_v50 = vand.u32 4294901760, %v265_v35 }
  0xee   : > { %v11361_v12 = vsub.f32 %v263_v22, %v11347_v49  ;;  %v1168_v24 = vand.u32 4294901760, %v1167_v52  ;;  %v11370_v8 = vpack.c.bf16 %v10478_v41, %v10476_v40  ;;  %v1206_v47 = vand.u32 4294901760, %v11355_v20  ;;  %v268_v49 = vld [vmem:[%s10342_s6 + $0x2b8] sm:$0xff] }
  0xef   : > { %13245 = vst [vmem:[#allocation167_spill] sm:$0xff] %v11357_v15  ;;  %13247 = vst [vmem:[#allocation169_spill] sm:$0xff] %v11363_v50  ;;  %v11374_v22 = vsub.f32 %v264_v57, %v11357_v15  ;;  %v1197_v52 = vsub.f32 %v11345_v28, %v1196_v7  ;;  %v11382_v40 = vsub.f32 %v265_v35, %v11363_v50  ;;  %v1188_v57 = vand.u32 4294901760, %v1187_v38  ;;  %v270_v28 = vld [vmem:[%s10342_s6 + $0x2c8] sm:$0xff] }
  0xf0   : > { %7870 = vmatmul.mubr.f32.gmra.mrb[72].mxu1 %v1128_v4  ;;  %8542 = vmatmul.mubr.f32.gmra.mrb[72].mxu0 %v1126_v36  ;;  %13246 = vst [vmem:[#allocation168_spill] sm:$0xff] %v11361_v12  ;;  %v266_v36 = vld [vmem:[%s10342_s6 + $0x2a8] sm:$0xff]  ;;  %v267_v4 = vld [vmem:[%s10342_s6 + $0x2b0] sm:$0xff]  ;;  %v1216_v11 = vand.u32 4294901760, %v11361_v12 }
  0xf1   : > { %7872 = vmatprep.mubr.f32.mxu1 %v1138_v26  ;;  %8544 = vmatprep.mubr.f32.mxu0 %v1136_v6  ;;  %v1178_v26 = vand.u32 4294901760, %v1177_v48  ;;  %13248 = vst [vmem:[#allocation170_spill] sm:$0xff] %v11374_v22  ;;  %v11376_v6 = vand.u32 4294901760, %v266_v36  ;;  %13250 = vst [vmem:[#allocation172_spill] sm:$0xff] %v11382_v40  ;;  %v11384_v41 = vand.u32 4294901760, %v267_v4  ;;  %v1198_v50 = vand.u32 4294901760, %v1197_v52 }
  0xf2   : > { %9138 = vmatprep.subr.bf16.mxu1 %v11370_v8  ;;  %v1217_v15 = vsub.f32 %v11361_v12, %v1216_v11  ;;  %v1236_v38 = vand.u32 4294901760, %v11382_v40 }
  0xf3   : > { %13249 = vst [vmem:[#allocation171_spill] sm:$0xff] %v11376_v6  ;;  %13251 = vst [vmem:[#allocation173_spill] sm:$0xff] %v11384_v41  ;;  %v11393_v48 = vsub.f32 %v266_v36, %v11376_v6  ;;  %v11407_v36 = vand.u32 4294901760, %v270_v28  ;;  %v272_v6 = vld [vmem:[%s10342_s6 + $0x2d8] sm:$0xff] }
  0xf4   : > { %7873 = vmatmul.mubr.f32.gmra.mrb[74].mxu1 %v1148_v32  ;;  %8545 = vmatmul.mubr.f32.gmra.mrb[74].mxu0 %v1146_v56  ;;  %v269_v56 = vld [vmem:[%s10342_s6 + $0x2c0] sm:$0xff]  ;;  %v11388_v32 = vand.u32 4294901760, %v268_v49 }
  0xf5   : > { %7875 = vmatprep.mubr.f32.mxu1 %v1158_v23  ;;  %8547 = vmatprep.mubr.f32.mxu0 %v1156_v37  ;;  %v1207_v23 = vsub.f32 %v11355_v20, %v1206_v47  ;;  %v1226_v37 = vand.u32 4294901760, %v11374_v22  ;;  %13253 = vst [vmem:[#allocation175_spill] sm:$0xff] %v11393_v48  ;;  %v11395_v35 = vand.u32 4294901760, %v269_v56  ;;  %13257 = vst [vmem:[#allocation179_spill] sm:$0xff] %v11407_v36  ;;  %v1246_v52 = vand.u32 4294901760, %v11393_v48 }
  0xf6   : > { %13252 = vst [vmem:[#allocation174_spill] sm:$0xff] %v11388_v32  ;;  %v11405_v20 = vsub.f32 %v268_v49, %v11388_v32 }
  0xf7   : > { %13254 = vst [vmem:[#allocation176_spill] sm:$0xff] %v11395_v35  ;;  %v11412_v12 = vsub.f32 %v269_v56, %v11395_v35  ;;  %v11426_v56 = vand.u32 4294901760, %v272_v6 }
  0xf8   : > { %7876 = vmatmul.mubr.f32.gmra.mrb[76].mxu1 %v1168_v24  ;;  %8548 = vmatmul.mubr.f32.gmra.mrb[76].mxu0 %v1166_v30  ;;  %v11401_v24 = vsub.f32 %v267_v4, %v11384_v41  ;;  %v271_v30 = vld [vmem:[%s10342_s6 + $0x2d0] sm:$0xff]  ;;  %13256 = vst [vmem:[#allocation178_spill] sm:$0xff] %v11405_v20  ;;  %v1218_v4 = vand.u32 4294901760, %v1217_v15  ;;  %v1237_v41 = vsub.f32 %v11382_v40, %v1236_v38 }
  0xf9   : > { %7878 = vmatprep.mubr.f32.mxu1 %v1178_v26  ;;  %8550 = vmatprep.mubr.f32.mxu0 %v1176_v33  ;;  %v1208_v26 = vand.u32 4294901760, %v1207_v23  ;;  %v1227_v33 = vsub.f32 %v11374_v22, %v1226_v37  ;;  %13258 = vst [vmem:[#allocation180_spill] sm:$0xff] %v11412_v12  ;;  %v11416_v32 = vand.u32 4294901760, %v271_v30  ;;  %v11422_v23 = vsub.f32 %v270_v28, %v11407_v36  ;;  %v274_v28 = vld [vmem:[%s10342_s6 + $0x2e8] sm:$0xff] }
  0xfa   : > { %13255 = vst [vmem:[#allocation177_spill] sm:$0xff] %v11401_v24  ;;  %v1256_v49 = vand.u32 4294901760, %v11401_v24  ;;  %v1276_v15 = vand.u32 4294901760, %v11412_v12  ;;  %13261 = vst [vmem:[#allocation183_spill] sm:$0xff] %v11426_v56  ;;  %v1238_v40 = vand.u32 4294901760, %v1237_v41  ;;  %v11440_v41 = vsub.f32 %v272_v6, %v11426_v56 }
  0xfb   : > { %13259 = vst [vmem:[#allocation181_spill] sm:$0xff] %v11416_v32  ;;  %13260 = vst [vmem:[#allocation182_spill] sm:$0xff] %v11422_v23  ;;  %v11430_v35 = vsub.f32 %v271_v30, %v11416_v32  ;;  %v11442_v30 = vand.u32 4294901760, %v274_v28 }
  0xfc   : > { %7879 = vmatmul.mubr.f32.gmra.mrb[78].mxu1 %v1188_v57  ;;  %8551 = vmatmul.mubr.f32.gmra.mrb[78].mxu0 %v1186_v27  ;;  %v273_v27 = vld [vmem:[%s10342_s6 + $0x2e0] sm:$0xff]  ;;  %v1266_v57 = vand.u32 4294901760, %v11405_v20  ;;  %v1257_v22 = vsub.f32 %v11401_v24, %v1256_v49  ;;  %13264 = vst [vmem:[#allocation186_spill] sm:$0xff] %v11440_v41 }
  0xfd   : > { %7881 = vmatprep.mubr.f32.mxu1 %v1198_v50  ;;  %8553 = vmatprep.mubr.f32.mxu0 %v1196_v7  ;;  %v1228_v50 = vand.u32 4294901760, %v1227_v33  ;;  %v1247_v7 = vsub.f32 %v11393_v48, %v1246_v52  ;;  %13262 = vst [vmem:[#allocation184_spill] sm:$0xff] %v11430_v35  ;;  %v11432_v2 = vand.u32 4294901760, %v273_v27  ;;  %v1286_v33 = vand.u32 4294901760, %v11422_v23  ;;  %13265 = vst [vmem:[#allocation187_spill] sm:$0xff] %v11442_v30 }
  0xfe   : > { %v1258_v24 = vand.u32 4294901760, %v1257_v22  ;;  %v1296_v48 = vand.u32 4294901760, %v11430_v35  ;;  %v11455_v22 = vsub.f32 %v274_v28, %v11442_v30 }
  0xff   : > { %13263 = vst [vmem:[#allocation185_spill] sm:$0xff] %v11432_v2  ;;  %v1287_v6 = vsub.f32 %v11422_v23, %v1286_v33 }
 0x100   : > { %7882 = vmatmul.mubr.f32.gmra.mrb[80].mxu1 %v1208_v26  ;;  %8554 = vmatmul.mubr.f32.gmra.mrb[80].mxu0 %v1206_v47  ;;  %v275_v47 = vld [vmem:[%s10342_s6 + $0x2f0] sm:$0xff]  ;;  %v1267_v26 = vsub.f32 %v11405_v20, %v1266_v57  ;;  %v11446_v20 = vsub.f32 %v273_v27, %v11432_v2  ;;  %13268 = vst [vmem:[#allocation190_spill] sm:$0xff] %v11455_v22  ;;  %v278_v27 = vld [vmem:[%s10342_s6 + $0x308] sm:$0xff] }
 0x101   : > { %7884 = vmatprep.mubr.f32.mxu1 %v1218_v4  ;;  %8556 = vmatprep.mubr.f32.mxu0 %v1216_v11  ;;  %v1248_v4 = vand.u32 4294901760, %v1247_v7  ;;  %v1277_v11 = vsub.f32 %v11412_v12, %v1276_v15  ;;  %v11448_v32 = vand.u32 4294901760, %v275_v47  ;;  %v1297_v2 = vsub.f32 %v11430_v35, %v1296_v48 }
 0x102   : > { %13266 = vst [vmem:[#allocation188_spill] sm:$0xff] %v11446_v20  ;;  %v1268_v7 = vand.u32 4294901760, %v1267_v26  ;;  %v1316_v26 = vand.u32 4294901760, %v11446_v20  ;;  %v11468_v28 = vand.u32 4294901760, %v278_v27 }
 0x103   : > { %13267 = vst [vmem:[#allocation189_spill] sm:$0xff] %v11448_v32  ;;  %v1278_v12 = vand.u32 4294901760, %v1277_v11  ;;  %v11463_v23 = vsub.f32 %v275_v47, %v11448_v32  ;;  %v1288_v11 = vand.u32 4294901760, %v1287_v6  ;;  %v280_v47 = vld [vmem:[%s10342_s6 + $0x318] sm:$0xff]  ;;  %v1298_v32 = vand.u32 4294901760, %v1297_v2 }
 0x104   : > { %7885 = vmatmul.mubr.f32.gmra.mrb[82].mxu1 %v1228_v50  ;;  %8557 = vmatmul.mubr.f32.gmra.mrb[82].mxu0 %v1226_v37  ;;  %v276_v37 = vld [vmem:[%s10342_s6 + $0x2f8] sm:$0xff]  ;;  %v277_v50 = vld [vmem:[%s10342_s6 + $0x300] sm:$0xff]  ;;  %13272 = vst [vmem:[#allocation194_spill] sm:$0xff] %v11468_v28  ;;  %v1317_v56 = vsub.f32 %v11446_v20, %v1316_v26 }
 0x105   : > { %7887 = vmatprep.mubr.f32.mxu1 %v1238_v40  ;;  %8559 = vmatprep.mubr.f32.mxu0 %v1236_v38  ;;  %v1306_v40 = vand.u32 4294901760, %v11440_v41  ;;  %v11457_v38 = vand.u32 4294901760, %v276_v37  ;;  %13270 = vst [vmem:[#allocation192_spill] sm:$0xff] %v11463_v23  ;;  %v1336_v6 = vand.u32 4294901760, %v11463_v23 }
 0x107   : > { %13269 = vst [vmem:[#allocation191_spill] sm:$0xff] %v11457_v38  ;;  %v1307_v30 = vsub.f32 %v11440_v41, %v1306_v40  ;;  %v11485_v41 = vsub.f32 %v278_v27, %v11468_v28 }
 0x108   : > { %7888 = vmatmul.mubr.f32.gmra.mrb[84].mxu1 %v1248_v4  ;;  %8560 = vmatmul.mubr.f32.gmra.mrb[84].mxu0 %v1246_v52  ;;  %v11465_v52 = vand.u32 4294901760, %v277_v50  ;;  %v279_v4 = vld [vmem:[%s10342_s6 + $0x310] sm:$0xff] }
 0x109   : > { %7890 = vmatprep.mubr.f32.mxu1 %v1258_v24  ;;  %8562 = vmatprep.mubr.f32.mxu0 %v1256_v49  ;;  %v1326_v24 = vand.u32 4294901760, %v11455_v22  ;;  %v11473_v49 = vsub.f32 %v276_v37, %v11457_v38  ;;  %v11475_v35 = vand.u32 4294901760, %v279_v4  ;;  %13276 = vst [vmem:[#allocation198_spill] sm:$0xff] %v11485_v41  ;;  %v11487_v37 = vand.u32 4294901760, %v280_v47  ;;  %v282_v38 = vld [vmem:[%s10342_s6 + $0x328] sm:$0xff] }
 0x10a   : > { %13271 = vst [vmem:[#allocation193_spill] sm:$0xff] %v11465_v52 }
 0x10b   : > { %13273 = vst [vmem:[#allocation195_spill] sm:$0xff] %v11473_v49  ;;  %13274 = vst [vmem:[#allocation196_spill] sm:$0xff] %v11475_v35  ;;  %v1327_v2 = vsub.f32 %v11455_v22, %v1326_v24  ;;  %v11492_v20 = vsub.f32 %v279_v4, %v11475_v35  ;;  %v11506_v4 = vand.u32 4294901760, %v282_v38 }
 0x10c   : > { %7891 = vmatmul.mubr.f32.gmra.mrb[86].mxu1 %v1268_v7  ;;  %8563 = vmatmul.mubr.f32.gmra.mrb[86].mxu0 %v1266_v57  ;;  %v11481_v7 = vsub.f32 %v277_v50, %v11465_v52  ;;  %v281_v57 = vld [vmem:[%s10342_s6 + $0x320] sm:$0xff]  ;;  %13277 = vst [vmem:[#allocation199_spill] sm:$0xff] %v11487_v37  ;;  %v1318_v50 = vand.u32 4294901760, %v1317_v56  ;;  %v1337_v52 = vsub.f32 %v11463_v23, %v1336_v6 }
 0x10d   : > { %7893 = vmatprep.mubr.f32.mxu1 %v1278_v12  ;;  %8565 = vmatprep.mubr.f32.mxu0 %v1276_v15  ;;  %v1308_v12 = vand.u32 4294901760, %v1307_v30  ;;  %v1346_v15 = vand.u32 4294901760, %v11473_v49  ;;  %13278 = vst [vmem:[#allocation200_spill] sm:$0xff] %v11492_v20  ;;  %v11496_v28 = vand.u32 4294901760, %v281_v57  ;;  %v1366_v30 = vand.u32 4294901760, %v11485_v41  ;;  %13281 = vst [vmem:[#allocation203_spill] sm:$0xff] %v11506_v4 }
 0x10e   : > { %13275 = vst [vmem:[#allocation197_spill] sm:$0xff] %v11481_v7  ;;  %v1356_v27 = vand.u32 4294901760, %v11481_v7  ;;  %v1376_v56 = vand.u32 4294901760, %v11492_v20  ;;  %v1338_v23 = vand.u32 4294901760, %v1337_v52  ;;  %v11520_v52 = vsub.f32 %v282_v38, %v11506_v4 }
 0x10f   : > { %13279 = vst [vmem:[#allocation201_spill] sm:$0xff] %v11496_v28  ;;  %v11510_v35 = vsub.f32 %v281_v57, %v11496_v28 }
 0x110   : > { %7894 = vmatmul.mubr.f32.gmra.mrb[88].mxu1 %v1288_v11  ;;  %8566 = vmatmul.mubr.f32.gmra.mrb[88].mxu0 %v1286_v33  ;;  %v283_v33 = vld [vmem:[%s10342_s6 + $0x330] sm:$0xff]  ;;  %v11502_v11 = vsub.f32 %v280_v47, %v11487_v37  ;;  %v1357_v22 = vsub.f32 %v11481_v7, %v1356_v27  ;;  %v284_v47 = vld [vmem:[%s10342_s6 + $0x338] sm:$0xff]  ;;  %13284 = vst [vmem:[#allocation206_spill] sm:$0xff] %v11520_v52 }
 0x111   : > { %7896 = vmatprep.mubr.f32.mxu1 %v1298_v32  ;;  %8568 = vmatprep.mubr.f32.mxu0 %v1296_v48  ;;  %v1328_v32 = vand.u32 4294901760, %v1327_v2  ;;  %v1347_v48 = vsub.f32 %v11473_v49, %v1346_v15  ;;  %13282 = vst [vmem:[#allocation204_spill] sm:$0xff] %v11510_v35  ;;  %v11512_v36 = vand.u32 4294901760, %v283_v33  ;;  %v11522_v57 = vand.u32 4294901760, %v284_v47 }
 0x112   : > { %13280 = vst [vmem:[#allocation202_spill] sm:$0xff] %v11502_v11  ;;  %v1386_v2 = vand.u32 4294901760, %v11502_v11  ;;  %v1358_v7 = vand.u32 4294901760, %v1357_v22  ;;  %v1396_v49 = vand.u32 4294901760, %v11510_v35 }
 0x113   : > { %13283 = vst [vmem:[#allocation205_spill] sm:$0xff] %v11512_v36  ;;  %13285 = vst [vmem:[#allocation207_spill] sm:$0xff] %v11522_v57  ;;  %v11535_v22 = vsub.f32 %v284_v47, %v11522_v57 }
 0x114   : > { %7897 = vmatmul.mubr.f32.gmra.mrb[90].mxu1 %v1308_v12  ;;  %8569 = vmatmul.mubr.f32.gmra.mrb[90].mxu0 %v1306_v40  ;;  %v285_v40 = vld [vmem:[%s10342_s6 + $0x340] sm:$0xff]  ;;  %v1367_v12 = vsub.f32 %v11485_v41, %v1366_v30  ;;  %v11526_v41 = vsub.f32 %v283_v33, %v11512_v36  ;;  %v1387_v38 = vsub.f32 %v11502_v11, %v1386_v2  ;;  %v288_v33 = vld [vmem:[%s10342_s6 + $0x358] sm:$0xff] }
 0x115   : > { %7899 = vmatprep.mubr.f32.mxu1 %v1318_v50  ;;  %8571 = vmatprep.mubr.f32.mxu0 %v1316_v26  ;;  %v1348_v50 = vand.u32 4294901760, %v1347_v48  ;;  %v1377_v26 = vsub.f32 %v11492_v20, %v1376_v56  ;;  %v11528_v28 = vand.u32 4294901760, %v285_v40  ;;  %13288 = vst [vmem:[#allocation210_spill] sm:$0xff] %v11535_v22  ;;  %v1397_v36 = vsub.f32 %v11510_v35, %v1396_v49 }
 0x116   : > { %13286 = vst [vmem:[#allocation208_spill] sm:$0xff] %v11526_v41  ;;  %v1368_v48 = vand.u32 4294901760, %v1367_v12  ;;  %v1416_v12 = vand.u32 4294901760, %v11526_v41  ;;  %v11548_v47 = vand.u32 4294901760, %v288_v33 }
 0x117   : > { %13287 = vst [vmem:[#allocation209_spill] sm:$0xff] %v11528_v28  ;;  %v1378_v20 = vand.u32 4294901760, %v1377_v26  ;;  %v11543_v11 = vsub.f32 %v285_v40, %v11528_v28  ;;  %v1388_v26 = vand.u32 4294901760, %v1387_v38  ;;  %v290_v40 = vld [vmem:[%s10342_s6 + $0x368] sm:$0xff]  ;;  %v1398_v28 = vand.u32 4294901760, %v1397_v36 }
 0x118   : > { %7900 = vmatmul.mubr.f32.gmra.mrb[92].mxu1 %v1328_v32  ;;  %8572 = vmatmul.mubr.f32.gmra.mrb[92].mxu0 %v1326_v24  ;;  %v286_v24 = vld [vmem:[%s10342_s6 + $0x348] sm:$0xff]  ;;  %v287_v32 = vld [vmem:[%s10342_s6 + $0x350] sm:$0xff]  ;;  %13292 = vst [vmem:[#allocation214_spill] sm:$0xff] %v11548_v47  ;;  %v1417_v4 = vsub.f32 %v11526_v41, %v1416_v12 }
 0x119   : > { %7902 = vmatprep.mubr.f32.mxu1 %v1338_v23  ;;  %8574 = vmatprep.mubr.f32.mxu0 %v1336_v6  ;;  %v1406_v23 = vand.u32 4294901760, %v11520_v52  ;;  %v11537_v6 = vand.u32 4294901760, %v286_v24  ;;  %13290 = vst [vmem:[#allocation212_spill] sm:$0xff] %v11543_v11  ;;  %v1436_v38 = vand.u32 4294901760, %v11543_v11 }
 0x11b   : > { %13289 = vst [vmem:[#allocation211_spill] sm:$0xff] %v11537_v6  ;;  %v1407_v57 = vsub.f32 %v11520_v52, %v1406_v23  ;;  %v11565_v52 = vsub.f32 %v288_v33, %v11548_v47 }
 0x11c   : > { %7903 = vmatmul.mubr.f32.gmra.mrb[94].mxu1 %v1348_v50  ;;  %8575 = vmatmul.mubr.f32.gmra.mrb[94].mxu0 %v1346_v15  ;;  %v11545_v15 = vand.u32 4294901760, %v287_v32  ;;  %v289_v50 = vld [vmem:[%s10342_s6 + $0x360] sm:$0xff] }
 0x11d   : > { %7905 = vmatprep.mubr.f32.mxu1 %v1358_v7  ;;  %8577 = vmatprep.mubr.f32.mxu0 %v1356_v27  ;;  %v1426_v7 = vand.u32 4294901760, %v11535_v22  ;;  %v11553_v27 = vsub.f32 %v286_v24, %v11537_v6  ;;  %v11555_v35 = vand.u32 4294901760, %v289_v50  ;;  %13296 = vst [vmem:[#allocation218_spill] sm:$0xff] %v11565_v52  ;;  %v11567_v24 = vand.u32 4294901760, %v290_v40  ;;  %v292_v6 = vld [vmem:[%s10342_s6 + $0x378] sm:$0xff] }
 0x11e   : > { %13291 = vst [vmem:[#allocation213_spill] sm:$0xff] %v11545_v15 }
 0x11f   : > { %13293 = vst [vmem:[#allocation215_spill] sm:$0xff] %v11553_v27  ;;  %13294 = vst [vmem:[#allocation216_spill] sm:$0xff] %v11555_v35  ;;  %v1427_v36 = vsub.f32 %v11535_v22, %v1426_v7  ;;  %v11572_v41 = vsub.f32 %v289_v50, %v11555_v35  ;;  %v11586_v50 = vand.u32 4294901760, %v292_v6 }
 0x120   : > { %7906 = vmatmul.mubr.f32.gmra.mrb[96].mxu1 %v1368_v48  ;;  %8578 = vmatmul.mubr.f32.gmra.mrb[96].mxu0 %v1366_v30  ;;  %v11561_v48 = vsub.f32 %v287_v32, %v11545_v15  ;;  %v291_v30 = vld [vmem:[%s10342_s6 + $0x370] sm:$0xff]  ;;  %13297 = vst [vmem:[#allocation219_spill] sm:$0xff] %v11567_v24  ;;  %v1418_v32 = vand.u32 4294901760, %v1417_v4  ;;  %v1437_v15 = vsub.f32 %v11543_v11, %v1436_v38 }
 0x121   : > { %7908 = vmatprep.mubr.f32.mxu1 %v1378_v20  ;;  %8580 = vmatprep.mubr.f32.mxu0 %v1376_v56  ;;  %v1408_v20 = vand.u32 4294901760, %v1407_v57  ;;  %v1446_v56 = vand.u32 4294901760, %v11553_v27  ;;  %13298 = vst [vmem:[#allocation220_spill] sm:$0xff] %v11572_v41  ;;  %v11576_v47 = vand.u32 4294901760, %v291_v30  ;;  %v1466_v57 = vand.u32 4294901760, %v11565_v52  ;;  %13301 = vst [vmem:[#allocation223_spill] sm:$0xff] %v11586_v50 }
 0x122   : > { %13295 = vst [vmem:[#allocation217_spill] sm:$0xff] %v11561_v48  ;;  %v1456_v33 = vand.u32 4294901760, %v11561_v48  ;;  %v1476_v4 = vand.u32 4294901760, %v11572_v41  ;;  %v1438_v11 = vand.u32 4294901760, %v1437_v15  ;;  %v11600_v15 = vsub.f32 %v292_v6, %v11586_v50 }
 0x123   : > { %13299 = vst [vmem:[#allocation221_spill] sm:$0xff] %v11576_v47  ;;  %v11590_v35 = vsub.f32 %v291_v30, %v11576_v47 }
 0x124   : > { %7909 = vmatmul.mubr.f32.gmra.mrb[98].mxu1 %v1388_v26  ;;  %8581 = vmatmul.mubr.f32.gmra.mrb[98].mxu0 %v1386_v2  ;;  %v293_v2 = vld [vmem:[%s10342_s6 + $0x380] sm:$0xff]  ;;  %v11582_v26 = vsub.f32 %v290_v40, %v11567_v24  ;;  %v1457_v22 = vsub.f32 %v11561_v48, %v1456_v33  ;;  %v294_v40 = vld [vmem:[%s10342_s6 + $0x388] sm:$0xff]  ;;  %13304 = vst [vmem:[#allocation226_spill] sm:$0xff] %v11600_v15 }
 0x125   : > { %7911 = vmatprep.mubr.f32.mxu1 %v1398_v28  ;;  %8583 = vmatprep.mubr.f32.mxu0 %v1396_v49  ;;  %v1428_v28 = vand.u32 4294901760, %v1427_v36  ;;  %v1447_v49 = vsub.f32 %v11553_v27, %v1446_v56  ;;  %13302 = vst [vmem:[#allocation224_spill] sm:$0xff] %v11590_v35  ;;  %v11592_v37 = vand.u32 4294901760, %v293_v2  ;;  %v11602_v30 = vand.u32 4294901760, %v294_v40 }
 0x126   : > { %13300 = vst [vmem:[#allocation222_spill] sm:$0xff] %v11582_v26  ;;  %v1486_v36 = vand.u32 4294901760, %v11582_v26  ;;  %v1458_v48 = vand.u32 4294901760, %v1457_v22  ;;  %v1496_v27 = vand.u32 4294901760, %v11590_v35 }
 0x127   : > { %13303 = vst [vmem:[#allocation225_spill] sm:$0xff] %v11592_v37  ;;  %13305 = vst [vmem:[#allocation227_spill] sm:$0xff] %v11602_v30  ;;  %v11615_v22 = vsub.f32 %v294_v40, %v11602_v30 }
 0x128   : > { %7912 = vmatmul.mubr.f32.gmra.mrb[100].mxu1 %v1408_v20  ;;  %8584 = vmatmul.mubr.f32.gmra.mrb[100].mxu0 %v1406_v23  ;;  %v295_v23 = vld [vmem:[%s10342_s6 + $0x390] sm:$0xff]  ;;  %v1467_v20 = vsub.f32 %v11565_v52, %v1466_v57  ;;  %v11606_v52 = vsub.f32 %v293_v2, %v11592_v37  ;;  %v1487_v6 = vsub.f32 %v11582_v26, %v1486_v36  ;;  %v298_v2 = vld [vmem:[%s10342_s6 + $0x3a8] sm:$0xff] }
 0x129   : > { %7914 = vmatprep.mubr.f32.mxu1 %v1418_v32  ;;  %8586 = vmatprep.mubr.f32.mxu0 %v1416_v12  ;;  %v1448_v32 = vand.u32 4294901760, %v1447_v49  ;;  %v1477_v12 = vsub.f32 %v11572_v41, %v1476_v4  ;;  %v11608_v47 = vand.u32 4294901760, %v295_v23  ;;  %13308 = vst [vmem:[#allocation230_spill] sm:$0xff] %v11615_v22  ;;  %v1497_v37 = vsub.f32 %v11590_v35, %v1496_v27 }
 0x12a   : > { %13306 = vst [vmem:[#allocation228_spill] sm:$0xff] %v11606_v52  ;;  %v1468_v49 = vand.u32 4294901760, %v1467_v20  ;;  %v1516_v20 = vand.u32 4294901760, %v11606_v52  ;;  %v11628_v40 = vand.u32 4294901760, %v298_v2 }
 0x12b   : > { %13307 = vst [vmem:[#allocation229_spill] sm:$0xff] %v11608_v47  ;;  %v1478_v41 = vand.u32 4294901760, %v1477_v12  ;;  %v11623_v26 = vsub.f32 %v295_v23, %v11608_v47  ;;  %v1488_v12 = vand.u32 4294901760, %v1487_v6  ;;  %v300_v23 = vld [vmem:[%s10342_s6 + $0x3b8] sm:$0xff]  ;;  %v1498_v47 = vand.u32 4294901760, %v1497_v37 }
 0x12c   : > { %7915 = vmatmul.mubr.f32.gmra.mrb[102].mxu1 %v1428_v28  ;;  %8587 = vmatmul.mubr.f32.gmra.mrb[102].mxu0 %v1426_v7  ;;  %v296_v7 = vld [vmem:[%s10342_s6 + $0x398] sm:$0xff]  ;;  %v297_v28 = vld [vmem:[%s10342_s6 + $0x3a0] sm:$0xff]  ;;  %13312 = vst [vmem:[#allocation234_spill] sm:$0xff] %v11628_v40  ;;  %v1517_v50 = vsub.f32 %v11606_v52, %v1516_v20 }
 0x12d   : > { %7917 = vmatprep.mubr.f32.mxu1 %v1438_v11  ;;  %8589 = vmatprep.mubr.f32.mxu0 %v1436_v38  ;;  %v1506_v11 = vand.u32 4294901760, %v11600_v15  ;;  %v11617_v38 = vand.u32 4294901760, %v296_v7  ;;  %13310 = vst [vmem:[#allocation232_spill] sm:$0xff] %v11623_v26  ;;  %v1536_v6 = vand.u32 4294901760, %v11623_v26 }
 0x12f   : > { %13309 = vst [vmem:[#allocation231_spill] sm:$0xff] %v11617_v38  ;;  %v1507_v30 = vsub.f32 %v11600_v15, %v1506_v11  ;;  %v11645_v15 = vsub.f32 %v298_v2, %v11628_v40 }
 0x130   : > { %7918 = vmatmul.mubr.f32.gmra.mrb[104].mxu1 %v1448_v32  ;;  %8590 = vmatmul.mubr.f32.gmra.mrb[104].mxu0 %v1446_v56  ;;  %v11625_v56 = vand.u32 4294901760, %v297_v28  ;;  %v299_v32 = vld [vmem:[%s10342_s6 + $0x3b0] sm:$0xff] }
 0x131   : > { %7920 = vmatprep.mubr.f32.mxu1 %v1458_v48  ;;  %8592 = vmatprep.mubr.f32.mxu0 %v1456_v33  ;;  %v1526_v48 = vand.u32 4294901760, %v11615_v22  ;;  %v11633_v33 = vsub.f32 %v296_v7, %v11617_v38  ;;  %v11635_v35 = vand.u32 4294901760, %v299_v32  ;;  %13316 = vst [vmem:[#allocation238_spill] sm:$0xff] %v11645_v15  ;;  %v11647_v7 = vand.u32 4294901760, %v300_v23  ;;  %v302_v38 = vld [vmem:[%s10342_s6 + $0x3c8] sm:$0xff] }
 0x132   : > { %13311 = vst [vmem:[#allocation233_spill] sm:$0xff] %v11625_v56 }
 0x133   : > { %13313 = vst [vmem:[#allocation235_spill] sm:$0xff] %v11633_v33  ;;  %13314 = vst [vmem:[#allocation236_spill] sm:$0xff] %v11635_v35  ;;  %v1527_v37 = vsub.f32 %v11615_v22, %v1526_v48  ;;  %v11652_v52 = vsub.f32 %v299_v32, %v11635_v35  ;;  %v11666_v32 = vand.u32 4294901760, %v302_v38 }
 0x134   : > { %7921 = vmatmul.mubr.f32.gmra.mrb[106].mxu1 %v1468_v49  ;;  %8593 = vmatmul.mubr.f32.gmra.mrb[106].mxu0 %v1466_v57  ;;  %v11641_v49 = vsub.f32 %v297_v28, %v11625_v56  ;;  %v301_v57 = vld [vmem:[%s10342_s6 + $0x3c0] sm:$0xff]  ;;  %v1518_v28 = vand.u32 4294901760, %v1517_v50  ;;  %v1537_v56 = vsub.f32 %v11623_v26, %v1536_v6 }
 0x135   : > { %7923 = vmatprep.mubr.f32.mxu1 %v1478_v41  ;;  %8595 = vmatprep.mubr.f32.mxu0 %v1476_v4  ;;  %v1508_v41 = vand.u32 4294901760, %v1507_v30  ;;  %v1546_v4 = vand.u32 4294901760, %v11633_v33  ;;  %13317 = vst [vmem:[#allocation239_spill] sm:$0xff] %v11652_v52  ;;  %v11656_v40 = vand.u32 4294901760, %v301_v57  ;;  %v1566_v30 = vand.u32 4294901760, %v11645_v15 }
 0x136   : > { %13315 = vst [vmem:[#allocation237_spill] sm:$0xff] %v11641_v49  ;;  %v1556_v2 = vand.u32 4294901760, %v11641_v49  ;;  %v1576_v50 = vand.u32 4294901760, %v11652_v52  ;;  %v1538_v26 = vand.u32 4294901760, %v1537_v56  ;;  %v11680_v56 = vsub.f32 %v302_v38, %v11666_v32 }
 0x137   : > { %13318 = vst [vmem:[#allocation240_spill] sm:$0xff] %v11656_v40  ;;  %v11670_v35 = vsub.f32 %v301_v57, %v11656_v40 }
 0x138   : > { %7924 = vmatmul.mubr.f32.gmra.mrb[108].mxu1 %v1488_v12  ;;  %8596 = vmatmul.mubr.f32.gmra.mrb[108].mxu0 %v1486_v36  ;;  %v303_v36 = vld [vmem:[%s10342_s6 + $0x3d0] sm:$0xff]  ;;  %v11662_v12 = vsub.f32 %v300_v23, %v11647_v7  ;;  %v1557_v22 = vsub.f32 %v11641_v49, %v1556_v2  ;;  %v304_v23 = vld [vmem:[%s10342_s6 + $0x3d8] sm:$0xff]  ;;  %13322 = vst [vmem:[#allocation244_spill] sm:$0xff] %v11680_v56 }
 0x139   : > { %7926 = vmatprep.mubr.f32.mxu1 %v1498_v47  ;;  %8598 = vmatprep.mubr.f32.mxu0 %v1496_v27  ;;  %v1528_v47 = vand.u32 4294901760, %v1527_v37  ;;  %v1547_v27 = vsub.f32 %v11633_v33, %v1546_v4  ;;  %13320 = vst [vmem:[#allocation242_spill] sm:$0xff] %v11670_v35  ;;  %v11672_v24 = vand.u32 4294901760, %v303_v36  ;;  %v11682_v57 = vand.u32 4294901760, %v304_v23 }
 0x13a   : > { %13319 = vst [vmem:[#allocation241_spill] sm:$0xff] %v11662_v12  ;;  %v1586_v37 = vand.u32 4294901760, %v11662_v12  ;;  %v1558_v49 = vand.u32 4294901760, %v1557_v22  ;;  %v1596_v33 = vand.u32 4294901760, %v11670_v35 }
 0x13b   : > { %13321 = vst [vmem:[#allocation243_spill] sm:$0xff] %v11672_v24  ;;  %13323 = vst [vmem:[#allocation245_spill] sm:$0xff] %v11682_v57  ;;  %v11686_v40 = vsub.f32 %v303_v36, %v11672_v24  ;;  %v11695_v22 = vsub.f32 %v304_v23, %v11682_v57 }
 0x13c   : > { %7927 = vmatmul.mubr.f32.gmra.mrb[110].mxu1 %v1508_v41  ;;  %8599 = vmatmul.mubr.f32.gmra.mrb[110].mxu0 %v1506_v11  ;;  %v305_v11 = vld [vmem:[%s10342_s6 + $0x3e0] sm:$0xff]  ;;  %v1567_v41 = vsub.f32 %v11645_v15, %v1566_v30  ;;  %v1597_v36 = vsub.f32 %v11670_v35, %v1596_v33 }
 0x13d   : > { %7929 = vmatprep.mubr.f32.mxu1 %v1518_v28  ;;  %8601 = vmatprep.mubr.f32.mxu0 %v1516_v20  ;;  %v1548_v28 = vand.u32 4294901760, %v1547_v27  ;;  %v1577_v20 = vsub.f32 %v11652_v52, %v1576_v50  ;;  %13324 = vst [vmem:[#allocation246_spill] sm:$0xff] %v11686_v40  ;;  %v11688_v15 = vand.u32 4294901760, %v305_v11  ;;  %v1587_v52 = vsub.f32 %v11662_v12, %v1586_v37 }
 0x13e   : > { %v1568_v27 = vand.u32 4294901760, %v1567_v41  ;;  %13326 = vst [vmem:[#allocation248_spill] sm:$0xff] %v11695_v22  ;;  %v1616_v24 = vand.u32 4294901760, %v11686_v40  ;;  %v1598_v35 = vand.u32 4294901760, %v1597_v36 }
 0x13f   : > { %13325 = vst [vmem:[#allocation247_spill] sm:$0xff] %v11688_v15  ;;  %v1578_v38 = vand.u32 4294901760, %v1577_v20  ;;  %v11702_v41 = vsub.f32 %v305_v11, %v11688_v15  ;;  %v1626_v20 = vand.u32 4294901760, %v11695_v22 }
 0x140   : > { %7930 = vmatmul.mubr.f32.gmra.mrb[112].mxu1 %v1528_v47  ;;  %8602 = vmatmul.mubr.f32.gmra.mrb[112].mxu0 %v1526_v48  ;;  %v306_v47 = vld [vmem:[%s10342_s6 + $0x3e8] sm:$0xff]  ;;  %v307_v48 = vld [vmem:[%s10342_s6 + $0x3f0] sm:$0xff]  ;;  %v1617_v11 = vsub.f32 %v11686_v40, %v1616_v24  ;;  %v9165_v40 = vpack.c.bf16 %v11281_v63, %v11270_v46  ;;  %v13383_v63 = vld [vmem:[#allocation111_spill] sm:$0xff] }
 0x141   : > { %7932 = vmatprep.mubr.f32.mxu1 %v1538_v26  ;;  %8604 = vmatprep.mubr.f32.mxu0 %v1536_v6  ;;  %v1606_v26 = vand.u32 4294901760, %v11680_v56  ;;  %v11697_v6 = vand.u32 4294901760, %v306_v47  ;;  %13328 = vst [vmem:[#allocation250_spill] sm:$0xff] %v11702_v41  ;;  %v11704_v12 = vand.u32 4294901760, %v307_v48  ;;  %v1636_v15 = vand.u32 4294901760, %v11702_v41  ;;  %v13384_v46 = vld [vmem:[#allocation113_spill] sm:$0xff] }
 0x143   : > { %13327 = vst [vmem:[#allocation249_spill] sm:$0xff] %v11697_v6  ;;  %13329 = vst [vmem:[#allocation251_spill] sm:$0xff] %v11704_v12  ;;  %v1607_v23 = vsub.f32 %v11680_v56, %v1606_v26 }
 0x144   : > { %7933 = vmatmul.mubr.f32.gmra.mrb[114].mxu1 %v1548_v28  ;;  %8605 = vmatmul.mubr.f32.gmra.mrb[114].mxu0 %v1546_v4  ;;  %v308_v4 = vld [vmem:[%s10342_s6 + $0x3f8] sm:$0xff]  ;;  %v1588_v28 = vand.u32 4294901760, %v1587_v52  ;;  %v11717_v52 = vsub.f32 %v307_v48, %v11704_v12 }
 0x145   : > { %7935 = vmatprep.mubr.f32.mxu1 %v1558_v49  ;;  %8607 = vmatprep.mubr.f32.mxu0 %v1556_v2  ;;  %v11710_v49 = vsub.f32 %v306_v47, %v11697_v6  ;;  %v11712_v2 = vand.u32 4294901760, %v308_v4 }
 0x146   : > { %13332 = vst [vmem:[#allocation254_spill] sm:$0xff] %v11717_v52  ;;  %v1656_v36 = vand.u32 4294901760, %v11717_v52 }
 0x147   : > { %13330 = vst [vmem:[#allocation252_spill] sm:$0xff] %v11710_v49  ;;  %13331 = vst [vmem:[#allocation253_spill] sm:$0xff] %v11712_v2  ;;  %v1646_v47 = vand.u32 4294901760, %v11710_v49  ;;  %v11722_v56 = vsub.f32 %v308_v4, %v11712_v2 }
 0x148   : > { %7936 = vmatmul.mubr.f32.gmra.mrb[116].mxu1 %v1568_v27  ;;  %8608 = vmatmul.mubr.f32.gmra.mrb[116].mxu0 %v1566_v30  ;;  %v1608_v30 = vand.u32 4294901760, %v1607_v23  ;;  %v1627_v27 = vsub.f32 %v11695_v22, %v1626_v20  ;;  %v1657_v4 = vsub.f32 %v11717_v52, %v1656_v36  ;;  %v13374_v52 = vld [vmem:[#allocation93_spill] sm:$0xff]  ;;  %v13377_v22 = vld [vmem:[#allocation100_spill] sm:$0xff] }
 0x149   : > { %7938 = vmatprep.mubr.f32.mxu1 %v1578_v38  ;;  %8610 = vmatprep.mubr.f32.mxu0 %v1576_v50  ;;  %13333 = vst [vmem:[#allocation255_spill] sm:$0xff] %v11722_v56  ;;  %v1618_v50 = vand.u32 4294901760, %v1617_v11  ;;  %v1637_v38 = vsub.f32 %v11702_v41, %v1636_v15  ;;  %v13376_v41 = vld [vmem:[#allocation95_spill] sm:$0xff] }
 0x14a   : > { %v1628_v48 = vand.u32 4294901760, %v1627_v27  ;;  %v1658_v11 = vand.u32 4294901760, %v1657_v4  ;;  %v9157_v27 = vpack.c.bf16 %v11036_v14, %v11031_v1  ;;  %v13351_v14 = vld [vmem:[#allocation47_spill] sm:$0xff]  ;;  %v13352_v1 = vld [vmem:[#allocation49_spill] sm:$0xff] }
 0x14b   : > { %v1638_v23 = vand.u32 4294901760, %v1637_v38  ;;  %v13349_v38 = vld [vmem:[#allocation43_spill] sm:$0xff] }
 0x14c   : > { %7939 = vmatmul.mubr.f32.gmra.mrb[118].mxu1 %v1588_v28  ;;  %8611 = vmatmul.mubr.f32.gmra.mrb[118].mxu0 %v1586_v37  ;;  %v1647_v37 = vsub.f32 %v11710_v49, %v1646_v47  ;;  %v1666_v28 = vand.u32 4294901760, %v11722_v56  ;;  %v13357_v4 = vld [vmem:[#allocation59_spill] sm:$0xff]  ;;  %v13375_v49 = vld [vmem:[#allocation94_spill] sm:$0xff] }
 0x14d   : > { %7941 = vmatprep.mubr.f32.mxu1 %v1598_v35  ;;  %8613 = vmatprep.mubr.f32.mxu0 %v1596_v33 }
 0x14e   : > { %v1648_v35 = vand.u32 4294901760, %v1647_v37  ;;  %v1667_v33 = vsub.f32 %v11722_v56, %v1666_v28  ;;  %v13354_v37 = vld [vmem:[#allocation51_spill] sm:$0xff] }
 0x14f   : > { %v13373_v56 = vld [vmem:[#allocation91_spill] sm:$0xff] }
 0x150   : > { %7942 = vmatmul.mubr.f32.gmra.mrb[120].mxu1 %v1608_v30  ;;  %8614 = vmatmul.mubr.f32.gmra.mrb[120].mxu0 %v1606_v26  ;;  %v1668_v26 = vand.u32 4294901760, %v1667_v33  ;;  %v13346_v30 = vld [vmem:[#allocation37_spill] sm:$0xff]  ;;  %v13359_v33 = vld [vmem:[#allocation62_spill] sm:$0xff] }
 0x151   : > { %7944 = vmatprep.mubr.f32.mxu1 %v1618_v50  ;;  %8616 = vmatprep.mubr.f32.mxu0 %v1616_v24  ;;  %v9141_v24 = vpack.c.bf16 %v10579_v62, %v10569_v58  ;;  %v13335_v58 = vld [vmem:[#allocation9_spill] sm:$0xff]  ;;  %v13337_v62 = vld [vmem:[#allocation10_spill] sm:$0xff]  ;;  %v13348_v50 = vld [vmem:[#allocation40_spill] sm:$0xff] }
 0x154   : > { %7945 = vmatmul.mubr.f32.gmra.mrb[122].mxu1 %v1628_v48  ;;  %8617 = vmatmul.mubr.f32.gmra.mrb[122].mxu0 %v1626_v20  ;;  %v13345_v20 = vld [vmem:[#allocation33_spill] sm:$0xff]  ;;  %v13353_v48 = vld [vmem:[#allocation50_spill] sm:$0xff] }
 0x155   : > { %7947 = vmatprep.mubr.f32.mxu1 %v1638_v23  ;;  %8619 = vmatprep.mubr.f32.mxu0 %v1636_v15  ;;  %v9145_v15 = vpack.c.bf16 %v10709_v45, %v10692_v55  ;;  %v13334_v55 = vld [vmem:[#allocation19_spill] sm:$0xff]  ;;  %v13356_v23 = vld [vmem:[#allocation57_spill] sm:$0xff] }
 0x156   : > { %v13338_v45 = vld [vmem:[#allocation23_spill] sm:$0xff] }
 0x158   : > { %7948 = vmatmul.mubr.f32.gmra.mrb[124].mxu1 %v1648_v35  ;;  %8620 = vmatmul.mubr.f32.gmra.mrb[124].mxu0 %v1646_v47  ;;  %v13347_v47 = vld [vmem:[#allocation38_spill] sm:$0xff]  ;;  %v13358_v35 = vld [vmem:[#allocation60_spill] sm:$0xff] }
 0x159   : > { %7950 = vmatprep.mubr.f32.mxu1 %v1658_v11  ;;  %8622 = vmatprep.mubr.f32.mxu0 %v1656_v36  ;;  %v13350_v36 = vld [vmem:[#allocation45_spill] sm:$0xff] }
 0x15a   : > { %v13360_v11 = vld [vmem:[#allocation65_spill] sm:$0xff] }
 0x15c   : > { %7951 = vmatmul.mubr.f32.gmra.mrb[126].mxu1 %v1668_v26  ;;  %8623 = vmatmul.mubr.f32.gmra.mrb[126].mxu0 %v1666_v28  ;;  %v13355_v28 = vld [vmem:[#allocation56_spill] sm:$0xff]  ;;  %v13361_v26 = vld [vmem:[#allocation67_spill] sm:$0xff] }
 0x15d   : > { %7985 = vmatprep.mubr.f32.mxu1 %v10401_v17  ;;  %8657 = vmatprep.mubr.f32.mxu0 %v10401_v17 }
 0x160   : > { %7986 = vmatmul.mubr.f32.vlgmr.msra.gmra.mrb[0].mxu1 %v10474_v39  ;;  %8658 = vmatmul.mubr.f32.vlgmr.msra.gmra.mrb[0].mxu0 %v10474_v39 }
 0x161   : > { %9140 = vmatpush3.bf16.msra.mxu1 %v11370_v8  ;;  %7988 = vmatprep.mubr.f32.mxu1 %v10480_v42  ;;  %v13344_v8 = vld [vmem:[#allocation32_spill] sm:$0xff] }
 0x162   : > { %8660 = vmatprep.mubr.f32.mxu0 %v10480_v42  ;;  %9236 = vmatpush3.bf16.msra.mxu0 %v10376_v10  ;;  %v9149_v10 = vpack.c.bf16 %v10827_v44, %v10819_v43  ;;  %v13340_v43 = vld [vmem:[#allocation13_spill] sm:$0xff]  ;;  %v13341_v44 = vld [vmem:[#allocation27_spill] sm:$0xff] }
 0x163   : > { %9142 = vmatprep.subr.bf16.mxu1 %v9141_v24  ;;  %9238 = vmatprep.subr.bf16.mxu0 %v10384_v13 }
 0x164   : > { %7989 = vmatmul.mubr.f32.gmra.mrb[2].mxu1 %v10511_v53  ;;  %8661 = vmatmul.mubr.f32.gmra.mrb[2].mxu0 %v10511_v53 }
 0x165   : > { %7991 = vmatprep.mubr.f32.mxu1 %v10513_v54  ;;  %8663 = vmatprep.mubr.f32.mxu0 %v10513_v54 }
 0x166   : > { %9144 = vmatpush3.bf16.msra.mxu1 %v9141_v24  ;;  %9240 = vmatpush3.bf16.msra.mxu0 %v10384_v13  ;;  %v9153_v13 = vpack.c.bf16 %v10941_v31, %v10927_v60  ;;  %v13342_v60 = vld [vmem:[#allocation30_spill] sm:$0xff]  ;;  %v13343_v31 = vld [vmem:[#allocation16_spill] sm:$0xff]  ;;  %v9161_v24 = vpack.c.bf16 %v11166_v19, %v11144_v5  ;;  %v13368_v19 = vld [vmem:[#allocation81_spill] sm:$0xff] }
 0x167   : > { %9146 = vmatprep.subr.bf16.mxu1 %v9145_v15  ;;  %9242 = vmatprep.subr.bf16.mxu0 %v10409_v18  ;;  %v13367_v5 = vld [vmem:[#allocation78_spill] sm:$0xff] }
 0x168   : > { %7992 = vmatmul.mubr.f32.gmra.mrb[4].mxu1 %v10541_v3  ;;  %8664 = vmatmul.mubr.f32.gmra.mrb[4].mxu0 %v10541_v3 }
 0x169   : > { %7994 = vmatprep.mubr.f32.mxu1 %v10546_v16  ;;  %8666 = vmatprep.mubr.f32.mxu0 %v10546_v16 }
 0x16a   : > { %9148 = vmatpush3.bf16.msra.mxu1 %v9145_v15  ;;  %9244 = vmatpush3.bf16.msra.mxu0 %v10409_v18  ;;  %v13336_v18 = vld [vmem:[#allocation22_spill] sm:$0xff]  ;;  %v13362_v15 = vld [vmem:[#allocation69_spill] sm:$0xff] }
 0x16b   : > { %9150 = vmatprep.subr.bf16.mxu1 %v9149_v10  ;;  %9246 = vmatprep.subr.bf16.mxu0 %v10435_v25 }
 0x16c   : > { %7995 = vmatmul.mubr.f32.gmra.mrb[6].mxu1 %v10574_v61  ;;  %8667 = vmatmul.mubr.f32.gmra.mrb[6].mxu0 %v10574_v61 }
 0x16d   : > { %7997 = vmatprep.mubr.f32.mxu1 %v13334_v55  ;;  %8669 = vmatprep.mubr.f32.mxu0 %v13334_v55 }
 0x16e   : > { %9152 = vmatpush3.bf16.msra.mxu1 %v9149_v10  ;;  %9248 = vmatpush3.bf16.msra.mxu0 %v10435_v25  ;;  %v13339_v25 = vld [vmem:[#allocation25_spill] sm:$0xff]  ;;  %v13363_v10 = vld [vmem:[#allocation70_spill] sm:$0xff] }
 0x16f   : > { %9154 = vmatprep.subr.bf16.mxu1 %v9153_v13  ;;  %9250 = vmatprep.subr.bf16.mxu0 %v13335_v58 }
 0x170   : > { %7998 = vmatmul.mubr.f32.gmra.mrb[8].mxu1 %v10605_v51  ;;  %8670 = vmatmul.mubr.f32.gmra.mrb[8].mxu0 %v10605_v51 }
 0x171   : > { %8000 = vmatprep.mubr.f32.mxu1 %v13336_v18  ;;  %8672 = vmatprep.mubr.f32.mxu0 %v13336_v18 }
 0x172   : > { %9156 = vmatpush3.bf16.msra.mxu1 %v9153_v13  ;;  %9252 = vmatpush3.bf16.msra.mxu0 %v13335_v58  ;;  %v13364_v13 = vld [vmem:[#allocation71_spill] sm:$0xff]  ;;  %v13365_v58 = vld [vmem:[#allocation76_spill] sm:$0xff] }
 0x173   : > { %9254 = vmatprep.subr.bf16.mxu0 %v13337_v62  ;;  %9158 = vmatprep.subr.bf16.mxu1 %v9157_v27 }
 0x174   : > { %8001 = vmatmul.mubr.f32.gmra.mrb[10].mxu1 %v13338_v45  ;;  %8673 = vmatmul.mubr.f32.gmra.mrb[10].mxu0 %v13338_v45 }
 0x175   : > { %8003 = vmatprep.mubr.f32.mxu1 %v13339_v25  ;;  %8675 = vmatprep.mubr.f32.mxu0 %v13339_v25 }
 0x176   : > { %9256 = vmatpush3.bf16.msra.mxu0 %v13337_v62  ;;  %9160 = vmatpush3.bf16.msra.mxu1 %v9157_v27  ;;  %v13366_v62 = vld [vmem:[#allocation77_spill] sm:$0xff]  ;;  %v13371_v27 = vld [vmem:[#allocation87_spill] sm:$0xff] }
 0x177   : > { %9258 = vmatprep.subr.bf16.mxu0 %v13340_v43  ;;  %9162 = vmatprep.subr.bf16.mxu1 %v9161_v24 }
 0x178   : > { %8004 = vmatmul.mubr.f32.gmra.mrb[12].mxu1 %v13341_v44  ;;  %8676 = vmatmul.mubr.f32.gmra.mrb[12].mxu0 %v13341_v44 }
 0x179   : > { %8006 = vmatprep.mubr.f32.mxu1 %v13342_v60  ;;  %8678 = vmatprep.mubr.f32.mxu0 %v13342_v60 }
 0x17a   : > { %9260 = vmatpush3.bf16.msra.mxu0 %v13340_v43  ;;  %9164 = vmatpush3.bf16.msra.mxu1 %v9161_v24  ;;  %v13369_v43 = vld [vmem:[#allocation83_spill] sm:$0xff]  ;;  %v13372_v24 = vld [vmem:[#allocation88_spill] sm:$0xff] }
 0x17b   : > { %9262 = vmatprep.subr.bf16.mxu0 %v13343_v31  ;;  %9166 = vmatprep.subr.bf16.mxu1 %v9165_v40 }
 0x17c   : > { %8007 = vmatmul.mubr.f32.gmra.mrb[14].mxu1 %v13344_v8  ;;  %8679 = vmatmul.mubr.f32.gmra.mrb[14].mxu0 %v13344_v8 }
 0x17d   : > { %8009 = vmatprep.mubr.f32.mxu1 %v13345_v20  ;;  %8681 = vmatprep.mubr.f32.mxu0 %v13345_v20 }
 0x17e   : > { %9264 = vmatpush3.bf16.msra.mxu0 %v13343_v31  ;;  %v13370_v31 = vld [vmem:[#allocation85_spill] sm:$0xff]  ;;  %9168 = vmatpush3.bf16.msra.mxu1 %v9165_v40  ;;  %v13385_v40 = vld [vmem:[#allocation114_spill] sm:$0xff] }
 0x180   : > { %8010 = vmatmul.mubr.f32.gmra.mrb[16].mxu1 %v13346_v30  ;;  %8682 = vmatmul.mubr.f32.gmra.mrb[16].mxu0 %v13346_v30 }
 0x181   : > { %8012 = vmatprep.mubr.f32.mxu1 %v13347_v47  ;;  %8684 = vmatprep.mubr.f32.mxu0 %v13347_v47 }
 0x184   : > { %8013 = vmatmul.mubr.f32.gmra.mrb[18].mxu1 %v13348_v50  ;;  %8685 = vmatmul.mubr.f32.gmra.mrb[18].mxu0 %v13348_v50 }
 0x185   : > { %8015 = vmatprep.mubr.f32.mxu1 %v10715_v0  ;;  %8687 = vmatprep.mubr.f32.mxu0 %v10715_v0 }
 0x188   : > { %8016 = vmatmul.mubr.f32.gmra.mrb[20].mxu1 %v13349_v38  ;;  %8688 = vmatmul.mubr.f32.gmra.mrb[20].mxu0 %v13349_v38 }
 0x189   : > { %8018 = vmatprep.mubr.f32.mxu1 %v13350_v36  ;;  %8690 = vmatprep.mubr.f32.mxu0 %v13350_v36 }
 0x18c   : > { %8019 = vmatmul.mubr.f32.gmra.mrb[22].mxu1 %v13351_v14  ;;  %8691 = vmatmul.mubr.f32.gmra.mrb[22].mxu0 %v13351_v14 }
 0x18d   : > { %8021 = vmatprep.mubr.f32.mxu1 %v13352_v1  ;;  %8693 = vmatprep.mubr.f32.mxu0 %v13352_v1 }
 0x190   : > { %8022 = vmatmul.mubr.f32.gmra.mrb[24].mxu1 %v13353_v48  ;;  %8694 = vmatmul.mubr.f32.gmra.mrb[24].mxu0 %v13353_v48 }
 0x191   : > { %8024 = vmatprep.mubr.f32.mxu1 %v13354_v37  ;;  %8696 = vmatprep.mubr.f32.mxu0 %v13354_v37 }
 0x194   : > { %8025 = vmatmul.mubr.f32.gmra.mrb[26].mxu1 %v13355_v28  ;;  %8697 = vmatmul.mubr.f32.gmra.mrb[26].mxu0 %v13355_v28 }
 0x195   : > { %8027 = vmatprep.mubr.f32.mxu1 %v13356_v23  ;;  %8699 = vmatprep.mubr.f32.mxu0 %v13356_v23 }
 0x198   : > { %8028 = vmatmul.mubr.f32.gmra.mrb[28].mxu1 %v13357_v4  ;;  %8700 = vmatmul.mubr.f32.gmra.mrb[28].mxu0 %v13357_v4 }
 0x199   : > { %8030 = vmatprep.mubr.f32.mxu1 %v13358_v35  ;;  %8702 = vmatprep.mubr.f32.mxu0 %v13358_v35 }
 0x19c   : > { %8031 = vmatmul.mubr.f32.gmra.mrb[30].mxu1 %v13359_v33  ;;  %8703 = vmatmul.mubr.f32.gmra.mrb[30].mxu0 %v13359_v33 }
 0x19d   : > { %8033 = vmatprep.mubr.f32.mxu1 %v13360_v11  ;;  %8705 = vmatprep.mubr.f32.mxu0 %v13360_v11 }
 0x1a0   : > { %8034 = vmatmul.mubr.f32.gmra.mrb[32].mxu1 %v13361_v26  ;;  %8706 = vmatmul.mubr.f32.gmra.mrb[32].mxu0 %v13361_v26 }
 0x1a1   : > { %8036 = vmatprep.mubr.f32.mxu1 %v13362_v15  ;;  %8708 = vmatprep.mubr.f32.mxu0 %v13362_v15 }
 0x1a4   : > { %8037 = vmatmul.mubr.f32.gmra.mrb[34].mxu1 %v13363_v10  ;;  %8709 = vmatmul.mubr.f32.gmra.mrb[34].mxu0 %v13363_v10 }
 0x1a5   : > { %8039 = vmatprep.mubr.f32.mxu1 %v13364_v13  ;;  %8711 = vmatprep.mubr.f32.mxu0 %v13364_v13 }
 0x1a8   : > { %8040 = vmatmul.mubr.f32.gmra.mrb[36].mxu1 %v13365_v58  ;;  %8712 = vmatmul.mubr.f32.gmra.mrb[36].mxu0 %v13365_v58 }
 0x1a9   : > { %8042 = vmatprep.mubr.f32.mxu1 %v13366_v62  ;;  %8714 = vmatprep.mubr.f32.mxu0 %v13366_v62 }
 0x1ac   : > { %8043 = vmatmul.mubr.f32.gmra.mrb[38].mxu1 %v13367_v5  ;;  %8715 = vmatmul.mubr.f32.gmra.mrb[38].mxu0 %v13367_v5 }
 0x1ad   : > { %8045 = vmatprep.mubr.f32.mxu1 %v13368_v19  ;;  %8717 = vmatprep.mubr.f32.mxu0 %v13368_v19 }
 0x1b0   : > { %8046 = vmatmul.mubr.f32.gmra.mrb[40].mxu1 %v13369_v43  ;;  %8718 = vmatmul.mubr.f32.gmra.mrb[40].mxu0 %v13369_v43 }
 0x1b1   : > { %8048 = vmatprep.mubr.f32.mxu1 %v13370_v31  ;;  %8720 = vmatprep.mubr.f32.mxu0 %v13370_v31 }
 0x1b4   : > { %8049 = vmatmul.mubr.f32.gmra.mrb[42].mxu1 %v13371_v27  ;;  %8721 = vmatmul.mubr.f32.gmra.mrb[42].mxu0 %v13371_v27 }
 0x1b5   : > { %8051 = vmatprep.mubr.f32.mxu1 %v13372_v24  ;;  %8723 = vmatprep.mubr.f32.mxu0 %v13372_v24 }
 0x1b8   : > { %8052 = vmatmul.mubr.f32.gmra.mrb[44].mxu1 %v13373_v56  ;;  %8724 = vmatmul.mubr.f32.gmra.mrb[44].mxu0 %v13373_v56  ;;  %v13378_v56 = vld [vmem:[#allocation101_spill] sm:$0xff] }
 0x1b9   : > { %8054 = vmatprep.mubr.f32.mxu1 %v13374_v52  ;;  %8726 = vmatprep.mubr.f32.mxu0 %v13374_v52  ;;  %v13379_v52 = vld [vmem:[#allocation103_spill] sm:$0xff] }
 0x1bc   : > { %8055 = vmatmul.mubr.f32.gmra.mrb[46].mxu1 %v13375_v49  ;;  %8727 = vmatmul.mubr.f32.gmra.mrb[46].mxu0 %v13375_v49  ;;  %v13380_v49 = vld [vmem:[#allocation105_spill] sm:$0xff] }
 0x1bd   : > { %8057 = vmatprep.mubr.f32.mxu1 %v13376_v41  ;;  %8729 = vmatprep.mubr.f32.mxu0 %v13376_v41  ;;  %v13381_v41 = vld [vmem:[#allocation106_spill] sm:$0xff] }
 0x1c0   : > { %8058 = vmatmul.mubr.f32.gmra.mrb[48].mxu1 %v13377_v22  ;;  %8730 = vmatmul.mubr.f32.gmra.mrb[48].mxu0 %v13377_v22  ;;  %v13382_v22 = vld [vmem:[#allocation109_spill] sm:$0xff] }
 0x1c1   : > { %8060 = vmatprep.mubr.f32.mxu1 %v13378_v56  ;;  %8732 = vmatprep.mubr.f32.mxu0 %v13378_v56 }
 0x1c4   : > { %8061 = vmatmul.mubr.f32.gmra.mrb[50].mxu1 %v13379_v52  ;;  %8733 = vmatmul.mubr.f32.gmra.mrb[50].mxu0 %v13379_v52 }
 0x1c5   : > { %8063 = vmatprep.mubr.f32.mxu1 %v13380_v49  ;;  %8735 = vmatprep.mubr.f32.mxu0 %v13380_v49  ;;  %v13386_v49 = vld [vmem:[#allocation116_spill] sm:$0xff] }
 0x1c8   : > { %8064 = vmatmul.mubr.f32.gmra.mrb[52].mxu1 %v13381_v41  ;;  %8736 = vmatmul.mubr.f32.gmra.mrb[52].mxu0 %v13381_v41  ;;  %v13387_v41 = vld [vmem:[#allocation118_spill] sm:$0xff] }
 0x1c9   : > { %8066 = vmatprep.mubr.f32.mxu1 %v13382_v22  ;;  %8738 = vmatprep.mubr.f32.mxu0 %v13382_v22  ;;  %v13388_v22 = vld [vmem:[#allocation121_spill] sm:$0xff] }
 0x1cc   : > { %8067 = vmatmul.mubr.f32.gmra.mrb[54].mxu1 %v13383_v63  ;;  %8739 = vmatmul.mubr.f32.gmra.mrb[54].mxu0 %v13383_v63  ;;  %v13389_v63 = vld [vmem:[#allocation123_spill] sm:$0xff] }
 0x1cd   : > { %8069 = vmatprep.mubr.f32.mxu1 %v13384_v46  ;;  %8741 = vmatprep.mubr.f32.mxu0 %v13384_v46  ;;  %v13390_v46 = vld [vmem:[#allocation125_spill] sm:$0xff] }
 0x1d0   : > { %8070 = vmatmul.mubr.f32.gmra.mrb[56].mxu1 %v13385_v40  ;;  %8742 = vmatmul.mubr.f32.gmra.mrb[56].mxu0 %v13385_v40  ;;  %v13391_v40 = vld [vmem:[#allocation127_spill] sm:$0xff] }
 0x1d1   : > { %8072 = vmatprep.mubr.f32.mxu1 %v13386_v49  ;;  %8744 = vmatprep.mubr.f32.mxu0 %v13386_v49  ;;  %v13392_v49 = vld [vmem:[#allocation129_spill] sm:$0xff] }
 0x1d4   : > { %8073 = vmatmul.mubr.f32.gmra.mrb[58].mxu1 %v13387_v41  ;;  %8745 = vmatmul.mubr.f32.gmra.mrb[58].mxu0 %v13387_v41  ;;  %v13393_v41 = vld [vmem:[#allocation131_spill] sm:$0xff] }
 0x1d5   : > { %8075 = vmatprep.mubr.f32.mxu1 %v13388_v22  ;;  %8747 = vmatprep.mubr.f32.mxu0 %v13388_v22  ;;  %v13394_v22 = vld [vmem:[#allocation133_spill] sm:$0xff] }
 0x1d8   : > { %8076 = vmatmul.mubr.f32.gmra.mrb[60].mxu1 %v13389_v63  ;;  %8748 = vmatmul.mubr.f32.gmra.mrb[60].mxu0 %v13389_v63  ;;  %v13395_v63 = vld [vmem:[#allocation135_spill] sm:$0xff] }
 0x1d9   : > { %8078 = vmatprep.mubr.f32.mxu1 %v13390_v46  ;;  %8750 = vmatprep.mubr.f32.mxu0 %v13390_v46  ;;  %v13396_v46 = vld [vmem:[#allocation136_spill] sm:$0xff] }
 0x1dc   : > { %8079 = vmatmul.mubr.f32.gmra.mrb[62].mxu1 %v13391_v40  ;;  %8751 = vmatmul.mubr.f32.gmra.mrb[62].mxu0 %v13391_v40  ;;  %v13397_v40 = vld [vmem:[#allocation138_spill] sm:$0xff] }
 0x1dd   : > { %8081 = vmatprep.mubr.f32.mxu1 %v13392_v49  ;;  %8753 = vmatprep.mubr.f32.mxu0 %v13392_v49  ;;  %v13398_v49 = vld [vmem:[#allocation139_spill] sm:$0xff] }
 0x1e0   : > { %8082 = vmatmul.mubr.f32.gmra.mrb[64].mxu1 %v13393_v41  ;;  %8754 = vmatmul.mubr.f32.gmra.mrb[64].mxu0 %v13393_v41  ;;  %v13399_v41 = vld [vmem:[#allocation143_spill] sm:$0xff] }
 0x1e1   : > { %8084 = vmatprep.mubr.f32.mxu1 %v13394_v22  ;;  %8756 = vmatprep.mubr.f32.mxu0 %v13394_v22  ;;  %v13400_v22 = vld [vmem:[#allocation145_spill] sm:$0xff] }
 0x1e4   : > { %8085 = vmatmul.mubr.f32.gmra.mrb[66].mxu1 %v13395_v63  ;;  %8757 = vmatmul.mubr.f32.gmra.mrb[66].mxu0 %v13395_v63  ;;  %v13401_v63 = vld [vmem:[#allocation147_spill] sm:$0xff] }
 0x1e5   : > { %8087 = vmatprep.mubr.f32.mxu1 %v13396_v46  ;;  %8759 = vmatprep.mubr.f32.mxu0 %v13396_v46  ;;  %v13402_v46 = vld [vmem:[#allocation149_spill] sm:$0xff] }
 0x1e8   : > { %8088 = vmatmul.mubr.f32.gmra.mrb[68].mxu1 %v13397_v40  ;;  %8760 = vmatmul.mubr.f32.gmra.mrb[68].mxu0 %v13397_v40  ;;  %v13403_v40 = vld [vmem:[#allocation150_spill] sm:$0xff] }
 0x1e9   : > { %8090 = vmatprep.mubr.f32.mxu1 %v13398_v49  ;;  %8762 = vmatprep.mubr.f32.mxu0 %v13398_v49 }
 0x1ec   : > { %8091 = vmatmul.mubr.f32.gmra.mrb[70].mxu1 %v13399_v41  ;;  %8763 = vmatmul.mubr.f32.gmra.mrb[70].mxu0 %v13399_v41 }
 0x1ed   : > { %8093 = vmatprep.mubr.f32.mxu1 %v13400_v22  ;;  %8765 = vmatprep.mubr.f32.mxu0 %v13400_v22 }
 0x1f0   : > { %8094 = vmatmul.mubr.f32.gmra.mrb[72].mxu1 %v13401_v63  ;;  %8766 = vmatmul.mubr.f32.gmra.mrb[72].mxu0 %v13401_v63 }
 0x1f1   : > { %8096 = vmatprep.mubr.f32.mxu1 %v13402_v46  ;;  %8768 = vmatprep.mubr.f32.mxu0 %v13402_v46 }
 0x1f4   : > { %8097 = vmatmul.mubr.f32.gmra.mrb[74].mxu1 %v13403_v40  ;;  %8769 = vmatmul.mubr.f32.gmra.mrb[74].mxu0 %v13403_v40  ;;  %v13404_v40 = vld [vmem:[#allocation163_spill] sm:$0xff] }
 0x1f5   : > { %8099 = vmatprep.mubr.f32.mxu1 %v11287_v9  ;;  %8771 = vmatprep.mubr.f32.mxu0 %v11287_v9  ;;  %v13405_v9 = vld [vmem:[#allocation165_spill] sm:$0xff] }
 0x1f8   : > { %8100 = vmatmul.mubr.f32.gmra.mrb[76].mxu1 %v11298_v21  ;;  %8772 = vmatmul.mubr.f32.gmra.mrb[76].mxu0 %v11298_v21  ;;  %v13406_v21 = vld [vmem:[#allocation167_spill] sm:$0xff] }
 0x1f9   : > { %8102 = vmatprep.mubr.f32.mxu1 %v11302_v29  ;;  %8774 = vmatprep.mubr.f32.mxu0 %v11302_v29  ;;  %v13407_v29 = vld [vmem:[#allocation169_spill] sm:$0xff] }
 0x1fc   : > { %8103 = vmatmul.mubr.f32.gmra.mrb[78].mxu1 %v11315_v34  ;;  %8775 = vmatmul.mubr.f32.gmra.mrb[78].mxu0 %v11315_v34  ;;  %v13408_v34 = vld [vmem:[#allocation171_spill] sm:$0xff] }
 0x1fd   : > { %8105 = vmatprep.mubr.f32.mxu1 %v11328_v59  ;;  %8777 = vmatprep.mubr.f32.mxu0 %v11328_v59  ;;  %v13409_v59 = vld [vmem:[#allocation173_spill] sm:$0xff] }
 0x200   : > { %8106 = vmatmul.mubr.f32.gmra.mrb[80].mxu1 %v13404_v40  ;;  %8778 = vmatmul.mubr.f32.gmra.mrb[80].mxu0 %v13404_v40  ;;  %v13410_v40 = vld [vmem:[#allocation174_spill] sm:$0xff] }
 0x201   : > { %8108 = vmatprep.mubr.f32.mxu1 %v13405_v9  ;;  %8780 = vmatprep.mubr.f32.mxu0 %v13405_v9  ;;  %v13411_v9 = vld [vmem:[#allocation176_spill] sm:$0xff] }
 0x204   : > { %8109 = vmatmul.mubr.f32.gmra.mrb[82].mxu1 %v13406_v21  ;;  %8781 = vmatmul.mubr.f32.gmra.mrb[82].mxu0 %v13406_v21  ;;  %v13412_v21 = vld [vmem:[#allocation179_spill] sm:$0xff] }
 0x205   : > { %8111 = vmatprep.mubr.f32.mxu1 %v13407_v29  ;;  %8783 = vmatprep.mubr.f32.mxu0 %v13407_v29  ;;  %v13413_v29 = vld [vmem:[#allocation181_spill] sm:$0xff] }
 0x208   : > { %8112 = vmatmul.mubr.f32.gmra.mrb[84].mxu1 %v13408_v34  ;;  %8784 = vmatmul.mubr.f32.gmra.mrb[84].mxu0 %v13408_v34  ;;  %v13414_v34 = vld [vmem:[#allocation183_spill] sm:$0xff] }
 0x209   : > { %8114 = vmatprep.mubr.f32.mxu1 %v13409_v59  ;;  %8786 = vmatprep.mubr.f32.mxu0 %v13409_v59  ;;  %v13415_v59 = vld [vmem:[#allocation185_spill] sm:$0xff] }
 0x20c   : > { %8115 = vmatmul.mubr.f32.gmra.mrb[86].mxu1 %v13410_v40  ;;  %8787 = vmatmul.mubr.f32.gmra.mrb[86].mxu0 %v13410_v40  ;;  %v13416_v40 = vld [vmem:[#allocation187_spill] sm:$0xff] }
 0x20d   : > { %8117 = vmatprep.mubr.f32.mxu1 %v13411_v9  ;;  %8789 = vmatprep.mubr.f32.mxu0 %v13411_v9  ;;  %v13417_v9 = vld [vmem:[#allocation189_spill] sm:$0xff] }
 0x210   : > { %8118 = vmatmul.mubr.f32.gmra.mrb[88].mxu1 %v13412_v21  ;;  %8790 = vmatmul.mubr.f32.gmra.mrb[88].mxu0 %v13412_v21  ;;  %v13418_v21 = vld [vmem:[#allocation191_spill] sm:$0xff] }
 0x211   : > { %8120 = vmatprep.mubr.f32.mxu1 %v13413_v29  ;;  %8792 = vmatprep.mubr.f32.mxu0 %v13413_v29  ;;  %v13419_v29 = vld [vmem:[#allocation193_spill] sm:$0xff] }
 0x214   : > { %8121 = vmatmul.mubr.f32.gmra.mrb[90].mxu1 %v13414_v34  ;;  %8793 = vmatmul.mubr.f32.gmra.mrb[90].mxu0 %v13414_v34  ;;  %v13420_v34 = vld [vmem:[#allocation194_spill] sm:$0xff] }
 0x215   : > { %8123 = vmatprep.mubr.f32.mxu1 %v13415_v59  ;;  %8795 = vmatprep.mubr.f32.mxu0 %v13415_v59  ;;  %v13421_v59 = vld [vmem:[#allocation196_spill] sm:$0xff] }
 0x218   : > { %8124 = vmatmul.mubr.f32.gmra.mrb[92].mxu1 %v13416_v40  ;;  %8796 = vmatmul.mubr.f32.gmra.mrb[92].mxu0 %v13416_v40  ;;  %v13422_v40 = vld [vmem:[#allocation199_spill] sm:$0xff] }
 0x219   : > { %8126 = vmatprep.mubr.f32.mxu1 %v13417_v9  ;;  %8798 = vmatprep.mubr.f32.mxu0 %v13417_v9  ;;  %v13423_v9 = vld [vmem:[#allocation201_spill] sm:$0xff] }
 0x21c   : > { %8127 = vmatmul.mubr.f32.gmra.mrb[94].mxu1 %v13418_v21  ;;  %8799 = vmatmul.mubr.f32.gmra.mrb[94].mxu0 %v13418_v21  ;;  %v13424_v21 = vld [vmem:[#allocation203_spill] sm:$0xff] }
 0x21d   : > { %8129 = vmatprep.mubr.f32.mxu1 %v13419_v29  ;;  %8801 = vmatprep.mubr.f32.mxu0 %v13419_v29  ;;  %v13425_v29 = vld [vmem:[#allocation205_spill] sm:$0xff] }
 0x220   : > { %8130 = vmatmul.mubr.f32.gmra.mrb[96].mxu1 %v13420_v34  ;;  %8802 = vmatmul.mubr.f32.gmra.mrb[96].mxu0 %v13420_v34  ;;  %v13426_v34 = vld [vmem:[#allocation207_spill] sm:$0xff] }
 0x221   : > { %8132 = vmatprep.mubr.f32.mxu1 %v13421_v59  ;;  %8804 = vmatprep.mubr.f32.mxu0 %v13421_v59  ;;  %v13427_v59 = vld [vmem:[#allocation209_spill] sm:$0xff] }
 0x224   : > { %8133 = vmatmul.mubr.f32.gmra.mrb[98].mxu1 %v13422_v40  ;;  %8805 = vmatmul.mubr.f32.gmra.mrb[98].mxu0 %v13422_v40  ;;  %v13428_v40 = vld [vmem:[#allocation211_spill] sm:$0xff] }
 0x225   : > { %8135 = vmatprep.mubr.f32.mxu1 %v13423_v9  ;;  %8807 = vmatprep.mubr.f32.mxu0 %v13423_v9  ;;  %v13429_v9 = vld [vmem:[#allocation213_spill] sm:$0xff] }
 0x228   : > { %8136 = vmatmul.mubr.f32.gmra.mrb[100].mxu1 %v13424_v21  ;;  %8808 = vmatmul.mubr.f32.gmra.mrb[100].mxu0 %v13424_v21  ;;  %v13430_v21 = vld [vmem:[#allocation214_spill] sm:$0xff] }
 0x229   : > { %8138 = vmatprep.mubr.f32.mxu1 %v13425_v29  ;;  %8810 = vmatprep.mubr.f32.mxu0 %v13425_v29  ;;  %v13431_v29 = vld [vmem:[#allocation216_spill] sm:$0xff] }
 0x22c   : > { %8139 = vmatmul.mubr.f32.gmra.mrb[102].mxu1 %v13426_v34  ;;  %8811 = vmatmul.mubr.f32.gmra.mrb[102].mxu0 %v13426_v34  ;;  %v13432_v34 = vld [vmem:[#allocation219_spill] sm:$0xff] }
 0x22d   : > { %8141 = vmatprep.mubr.f32.mxu1 %v13427_v59  ;;  %8813 = vmatprep.mubr.f32.mxu0 %v13427_v59  ;;  %v13433_v59 = vld [vmem:[#allocation221_spill] sm:$0xff] }
 0x230   : > { %8142 = vmatmul.mubr.f32.gmra.mrb[104].mxu1 %v13428_v40  ;;  %8814 = vmatmul.mubr.f32.gmra.mrb[104].mxu0 %v13428_v40  ;;  %v13434_v40 = vld [vmem:[#allocation223_spill] sm:$0xff] }
 0x231   : > { %8144 = vmatprep.mubr.f32.mxu1 %v13429_v9  ;;  %8816 = vmatprep.mubr.f32.mxu0 %v13429_v9  ;;  %v13435_v9 = vld [vmem:[#allocation225_spill] sm:$0xff] }
 0x234   : > { %8145 = vmatmul.mubr.f32.gmra.mrb[106].mxu1 %v13430_v21  ;;  %8817 = vmatmul.mubr.f32.gmra.mrb[106].mxu0 %v13430_v21  ;;  %v13436_v21 = vld [vmem:[#allocation227_spill] sm:$0xff] }
 0x235   : > { %8147 = vmatprep.mubr.f32.mxu1 %v13431_v29  ;;  %8819 = vmatprep.mubr.f32.mxu0 %v13431_v29  ;;  %v13437_v29 = vld [vmem:[#allocation229_spill] sm:$0xff] }
 0x238   : > { %8148 = vmatmul.mubr.f32.gmra.mrb[108].mxu1 %v13432_v34  ;;  %8820 = vmatmul.mubr.f32.gmra.mrb[108].mxu0 %v13432_v34  ;;  %v13438_v34 = vld [vmem:[#allocation231_spill] sm:$0xff] }
 0x239   : > { %8150 = vmatprep.mubr.f32.mxu1 %v13433_v59  ;;  %8822 = vmatprep.mubr.f32.mxu0 %v13433_v59  ;;  %v13439_v59 = vld [vmem:[#allocation233_spill] sm:$0xff] }
 0x23c   : > { %8151 = vmatmul.mubr.f32.gmra.mrb[110].mxu1 %v13434_v40  ;;  %8823 = vmatmul.mubr.f32.gmra.mrb[110].mxu0 %v13434_v40  ;;  %v13440_v40 = vld [vmem:[#allocation234_spill] sm:$0xff] }
 0x23d   : > { %8153 = vmatprep.mubr.f32.mxu1 %v13435_v9  ;;  %8825 = vmatprep.mubr.f32.mxu0 %v13435_v9  ;;  %v13441_v9 = vld [vmem:[#allocation236_spill] sm:$0xff] }
 0x240   : > { %8154 = vmatmul.mubr.f32.gmra.mrb[112].mxu1 %v13436_v21  ;;  %8826 = vmatmul.mubr.f32.gmra.mrb[112].mxu0 %v13436_v21 }
 0x241   : > { %8156 = vmatprep.mubr.f32.mxu1 %v13437_v29  ;;  %8828 = vmatprep.mubr.f32.mxu0 %v13437_v29  ;;  %v13442_v29 = vld [vmem:[#allocation240_spill] sm:$0xff] }
 0x244   : > { %8157 = vmatmul.mubr.f32.gmra.mrb[114].mxu1 %v13438_v34  ;;  %8829 = vmatmul.mubr.f32.gmra.mrb[114].mxu0 %v13438_v34 }
 0x245   : > { %8159 = vmatprep.mubr.f32.mxu1 %v13439_v59  ;;  %8831 = vmatprep.mubr.f32.mxu0 %v13439_v59  ;;  %v13443_v59 = vld [vmem:[#allocation243_spill] sm:$0xff] }
 0x248   : > { %8160 = vmatmul.mubr.f32.gmra.mrb[116].mxu1 %v13440_v40  ;;  %8832 = vmatmul.mubr.f32.gmra.mrb[116].mxu0 %v13440_v40 }
 0x249   : > { %8162 = vmatprep.mubr.f32.mxu1 %v13441_v9  ;;  %8834 = vmatprep.mubr.f32.mxu0 %v13441_v9  ;;  %v13444_v9 = vld [vmem:[#allocation247_spill] sm:$0xff] }
 0x24c   : > { %8163 = vmatmul.mubr.f32.gmra.mrb[118].mxu1 %v11647_v7  ;;  %8835 = vmatmul.mubr.f32.gmra.mrb[118].mxu0 %v11647_v7 }
 0x24d   : > { %8165 = vmatprep.mubr.f32.mxu1 %v13442_v29  ;;  %8837 = vmatprep.mubr.f32.mxu0 %v13442_v29 }
 0x250   : > { %8166 = vmatmul.mubr.f32.gmra.mrb[120].mxu1 %v11666_v32  ;;  %8838 = vmatmul.mubr.f32.gmra.mrb[120].mxu0 %v11666_v32 }
 0x251   : > { %8168 = vmatprep.mubr.f32.mxu1 %v13443_v59  ;;  %8840 = vmatprep.mubr.f32.mxu0 %v13443_v59  ;;  %v13445_v59 = vld [vmem:[#allocation8_spill] sm:$0xff] }
 0x254   : > { %8169 = vmatmul.mubr.f32.gmra.mrb[122].mxu1 %v11682_v57  ;;  %8841 = vmatmul.mubr.f32.gmra.mrb[122].mxu0 %v11682_v57  ;;  %v13446_v57 = vld [vmem:[#allocation11_spill] sm:$0xff] }
 0x255   : > { %8171 = vmatprep.mubr.f32.mxu1 %v13444_v9  ;;  %8843 = vmatprep.mubr.f32.mxu0 %v13444_v9  ;;  %v13447_v9 = vld [vmem:[#allocation12_spill] sm:$0xff] }
 0x258   : > { %8172 = vmatmul.mubr.f32.gmra.mrb[124].mxu1 %v11697_v6  ;;  %8844 = vmatmul.mubr.f32.gmra.mrb[124].mxu0 %v11697_v6  ;;  %v13448_v6 = vld [vmem:[#allocation14_spill] sm:$0xff] }
 0x259   : > { %8174 = vmatprep.mubr.f32.mxu1 %v11704_v12  ;;  %8846 = vmatprep.mubr.f32.mxu0 %v11704_v12  ;;  %v13449_v12 = vld [vmem:[#allocation15_spill] sm:$0xff] }
 0x25c   : > { %8175 = vmatmul.mubr.f32.gmra.mrb[126].mxu1 %v11712_v2  ;;  %8847 = vmatmul.mubr.f32.gmra.mrb[126].mxu0 %v11712_v2  ;;  %v13450_v2 = vld [vmem:[#allocation17_spill] sm:$0xff] }
 0x25d   : > { %8209 = vmatprep.mubr.f32.mxu1 %v13445_v59  ;;  %8881 = vmatprep.mubr.f32.mxu0 %v10401_v17  ;;  %v13451_v17 = vld [vmem:[#allocation18_spill] sm:$0xff]  ;;  %v13461_v59 = vld [vmem:[#allocation36_spill] sm:$0xff] }
 0x260   : > { %8210 = vmatmul.mubr.f32.vlgmr.msra.gmra.mrb[0].mxu1 %v13446_v57  ;;  %8882 = vmatmul.mubr.f32.vlgmr.msra.gmra.mrb[0].mxu0 %v10474_v39  ;;  %v13452_v39 = vld [vmem:[#allocation20_spill] sm:$0xff]  ;;  %v13463_v57 = vld [vmem:[#allocation41_spill] sm:$0xff] }
 0x261   : > { %8212 = vmatprep.mubr.f32.mxu1 %v13447_v9  ;;  %8884 = vmatprep.mubr.f32.mxu0 %v10480_v42  ;;  %v13453_v42 = vld [vmem:[#allocation21_spill] sm:$0xff]  ;;  %v13459_v9 = vld [vmem:[#allocation34_spill] sm:$0xff] }
 0x264   : > { %8213 = vmatmul.mubr.f32.gmra.mrb[2].mxu1 %v13448_v6  ;;  %8885 = vmatmul.mubr.f32.gmra.mrb[2].mxu0 %v10511_v53  ;;  %v13454_v53 = vld [vmem:[#allocation24_spill] sm:$0xff]  ;;  %v13464_v6 = vld [vmem:[#allocation42_spill] sm:$0xff] }
 0x265   : > { %8215 = vmatprep.mubr.f32.mxu1 %v13449_v12  ;;  %8887 = vmatprep.mubr.f32.mxu0 %v10513_v54  ;;  %v13455_v54 = vld [vmem:[#allocation26_spill] sm:$0xff]  ;;  %v13462_v12 = vld [vmem:[#allocation39_spill] sm:$0xff] }
 0x268   : > { %8216 = vmatmul.mubr.f32.gmra.mrb[4].mxu1 %v13450_v2  ;;  %8888 = vmatmul.mubr.f32.gmra.mrb[4].mxu0 %v10541_v3  ;;  %v13456_v3 = vld [vmem:[#allocation28_spill] sm:$0xff] }
 0x269   : > { %8218 = vmatprep.mubr.f32.mxu1 %v13451_v17  ;;  %8890 = vmatprep.mubr.f32.mxu0 %v10546_v16  ;;  %v13457_v16 = vld [vmem:[#allocation29_spill] sm:$0xff]  ;;  %v13465_v2 = vld [vmem:[#allocation44_spill] sm:$0xff] }
 0x26a   : > { %v13502_v17 = vld [vmem:[#allocation108_spill] sm:$0xff] }
 0x26c   : > { %8219 = vmatmul.mubr.f32.gmra.mrb[6].mxu1 %v13452_v39  ;;  %8891 = vmatmul.mubr.f32.gmra.mrb[6].mxu0 %v10574_v61  ;;  %v13458_v61 = vld [vmem:[#allocation31_spill] sm:$0xff]  ;;  %v13503_v39 = vld [vmem:[#allocation105_spill] sm:$0xff] }
 0x26d   : > { %8221 = vmatprep.mubr.f32.mxu1 %v13453_v42  ;;  %8893 = vmatprep.mubr.f32.mxu0 %v13334_v55  ;;  %v13466_v55 = vld [vmem:[#allocation46_spill] sm:$0xff] }
 0x26e   : > { %v13504_v42 = vld [vmem:[#allocation110_spill] sm:$0xff] }
 0x270   : > { %8222 = vmatmul.mubr.f32.gmra.mrb[8].mxu1 %v13454_v53  ;;  %8894 = vmatmul.mubr.f32.gmra.mrb[8].mxu0 %v10605_v51  ;;  %v13460_v51 = vld [vmem:[#allocation35_spill] sm:$0xff]  ;;  %v13505_v53 = vld [vmem:[#allocation106_spill] sm:$0xff] }
 0x271   : > { %8224 = vmatprep.mubr.f32.mxu1 %v13455_v54  ;;  %8896 = vmatprep.mubr.f32.mxu0 %v13336_v18  ;;  %v13467_v18 = vld [vmem:[#allocation48_spill] sm:$0xff] }
 0x272   : > { %v13506_v54 = vld [vmem:[#allocation112_spill] sm:$0xff] }
 0x274   : > { %8225 = vmatmul.mubr.f32.gmra.mrb[10].mxu1 %v13456_v3  ;;  %8897 = vmatmul.mubr.f32.gmra.mrb[10].mxu0 %v13338_v45  ;;  %v13468_v45 = vld [vmem:[#allocation52_spill] sm:$0xff]  ;;  %v13507_v3 = vld [vmem:[#allocation109_spill] sm:$0xff] }
 0x275   : > { %8227 = vmatprep.mubr.f32.mxu1 %v13457_v16  ;;  %8899 = vmatprep.mubr.f32.mxu0 %v13339_v25  ;;  %v13469_v25 = vld [vmem:[#allocation53_spill] sm:$0xff]  ;;  %v13508_v16 = vld [vmem:[#allocation115_spill] sm:$0xff] }
 0x278   : > { %8228 = vmatmul.mubr.f32.gmra.mrb[12].mxu1 %v13458_v61  ;;  %8900 = vmatmul.mubr.f32.gmra.mrb[12].mxu0 %v13341_v44  ;;  %v13470_v44 = vld [vmem:[#allocation54_spill] sm:$0xff]  ;;  %v13509_v61 = vld [vmem:[#allocation111_spill] sm:$0xff] }
 0x279   : > { %8230 = vmatprep.mubr.f32.mxu1 %v13459_v9  ;;  %8902 = vmatprep.mubr.f32.mxu0 %v13342_v60  ;;  %v13472_v60 = vld [vmem:[#allocation58_spill] sm:$0xff]  ;;  %v13511_v9 = vld [vmem:[#allocation113_spill] sm:$0xff] }
 0x27c   : > { %8231 = vmatmul.mubr.f32.gmra.mrb[14].mxu1 %v13460_v51  ;;  %8903 = vmatmul.mubr.f32.gmra.mrb[14].mxu0 %v13344_v8  ;;  %v13473_v8 = vld [vmem:[#allocation61_spill] sm:$0xff]  ;;  %v13513_v51 = vld [vmem:[#allocation114_spill] sm:$0xff] }
 0x27d   : > { %8233 = vmatprep.mubr.f32.mxu1 %v13461_v59  ;;  %8905 = vmatprep.mubr.f32.mxu0 %v13345_v20  ;;  %v13474_v20 = vld [vmem:[#allocation63_spill] sm:$0xff]  ;;  %v13514_v59 = vld [vmem:[#allocation120_spill] sm:$0xff] }
 0x280   : > { %8234 = vmatmul.mubr.f32.gmra.mrb[16].mxu1 %v13462_v12  ;;  %8906 = vmatmul.mubr.f32.gmra.mrb[16].mxu0 %v13346_v30  ;;  %v13475_v30 = vld [vmem:[#allocation64_spill] sm:$0xff] }
 0x281   : > { %8236 = vmatprep.mubr.f32.mxu1 %v13463_v57  ;;  %8908 = vmatprep.mubr.f32.mxu0 %v13347_v47  ;;  %v13476_v47 = vld [vmem:[#allocation66_spill] sm:$0xff]  ;;  %v13515_v12 = vld [vmem:[#allocation116_spill] sm:$0xff] }
 0x282   : > { %v13516_v57 = vld [vmem:[#allocation122_spill] sm:$0xff] }
 0x284   : > { %8237 = vmatmul.mubr.f32.gmra.mrb[18].mxu1 %v13464_v6  ;;  %8909 = vmatmul.mubr.f32.gmra.mrb[18].mxu0 %v13348_v50  ;;  %v13477_v50 = vld [vmem:[#allocation68_spill] sm:$0xff]  ;;  %v13517_v6 = vld [vmem:[#allocation118_spill] sm:$0xff] }
 0x285   : > { %8239 = vmatprep.mubr.f32.mxu1 %v13465_v2  ;;  %8911 = vmatprep.mubr.f32.mxu0 %v10715_v0  ;;  %v13471_v0 = vld [vmem:[#allocation55_spill] sm:$0xff]  ;;  %v13518_v2 = vld [vmem:[#allocation124_spill] sm:$0xff] }
 0x288   : > { %8240 = vmatmul.mubr.f32.gmra.mrb[20].mxu1 %v13466_v55  ;;  %8912 = vmatmul.mubr.f32.gmra.mrb[20].mxu0 %v13349_v38  ;;  %v13478_v38 = vld [vmem:[#allocation72_spill] sm:$0xff]  ;;  %v13519_v55 = vld [vmem:[#allocation121_spill] sm:$0xff] }
 0x289   : > { %8242 = vmatprep.mubr.f32.mxu1 %v13467_v18  ;;  %8914 = vmatprep.mubr.f32.mxu0 %v13350_v36  ;;  %v13479_v36 = vld [vmem:[#allocation73_spill] sm:$0xff]  ;;  %v13520_v18 = vld [vmem:[#allocation126_spill] sm:$0xff] }
 0x28c   : > { %8243 = vmatmul.mubr.f32.gmra.mrb[22].mxu1 %v13468_v45  ;;  %8915 = vmatmul.mubr.f32.gmra.mrb[22].mxu0 %v13351_v14  ;;  %v13480_v14 = vld [vmem:[#allocation74_spill] sm:$0xff]  ;;  %v13521_v45 = vld [vmem:[#allocation123_spill] sm:$0xff] }
 0x28d   : > { %8245 = vmatprep.mubr.f32.mxu1 %v13469_v25  ;;  %8917 = vmatprep.mubr.f32.mxu0 %v13352_v1  ;;  %v13481_v1 = vld [vmem:[#allocation75_spill] sm:$0xff]  ;;  %v13522_v25 = vld [vmem:[#allocation128_spill] sm:$0xff] }
 0x290   : > { %8246 = vmatmul.mubr.f32.gmra.mrb[24].mxu1 %v13470_v44  ;;  %8918 = vmatmul.mubr.f32.gmra.mrb[24].mxu0 %v13353_v48  ;;  %v13482_v48 = vld [vmem:[#allocation79_spill] sm:$0xff]  ;;  %v13523_v44 = vld [vmem:[#allocation125_spill] sm:$0xff] }
 0x291   : > { %8248 = vmatprep.mubr.f32.mxu1 %v13471_v0  ;;  %8920 = vmatprep.mubr.f32.mxu0 %v13354_v37  ;;  %v13483_v37 = vld [vmem:[#allocation80_spill] sm:$0xff]  ;;  %v13524_v0 = vld [vmem:[#allocation130_spill] sm:$0xff] }
 0x294   : > { %8249 = vmatmul.mubr.f32.gmra.mrb[26].mxu1 %v13472_v60  ;;  %8921 = vmatmul.mubr.f32.gmra.mrb[26].mxu0 %v13355_v28  ;;  %v13484_v28 = vld [vmem:[#allocation82_spill] sm:$0xff]  ;;  %v13525_v60 = vld [vmem:[#allocation127_spill] sm:$0xff] }
 0x295   : > { %8251 = vmatprep.mubr.f32.mxu1 %v13473_v8  ;;  %8923 = vmatprep.mubr.f32.mxu0 %v13356_v23  ;;  %v13485_v23 = vld [vmem:[#allocation84_spill] sm:$0xff] }
 0x296   : > { %v13526_v8 = vld [vmem:[#allocation132_spill] sm:$0xff] }
 0x298   : > { %8252 = vmatmul.mubr.f32.gmra.mrb[28].mxu1 %v13474_v20  ;;  %8924 = vmatmul.mubr.f32.gmra.mrb[28].mxu0 %v13357_v4  ;;  %v13486_v4 = vld [vmem:[#allocation86_spill] sm:$0xff]  ;;  %v13527_v20 = vld [vmem:[#allocation129_spill] sm:$0xff] }
 0x299   : > { %8254 = vmatprep.mubr.f32.mxu1 %v13475_v30  ;;  %8926 = vmatprep.mubr.f32.mxu0 %v13358_v35  ;;  %v13487_v35 = vld [vmem:[#allocation89_spill] sm:$0xff]  ;;  %v13528_v30 = vld [vmem:[#allocation134_spill] sm:$0xff] }
 0x29c   : > { %8255 = vmatmul.mubr.f32.gmra.mrb[30].mxu1 %v13476_v47  ;;  %8927 = vmatmul.mubr.f32.gmra.mrb[30].mxu0 %v13359_v33  ;;  %v13488_v33 = vld [vmem:[#allocation90_spill] sm:$0xff]  ;;  %v13529_v47 = vld [vmem:[#allocation131_spill] sm:$0xff] }
 0x29d   : > { %8257 = vmatprep.mubr.f32.mxu1 %v13477_v50  ;;  %8929 = vmatprep.mubr.f32.mxu0 %v13360_v11  ;;  %v13489_v11 = vld [vmem:[#allocation92_spill] sm:$0xff]  ;;  %v13530_v50 = vld [vmem:[#allocation137_spill] sm:$0xff] }
 0x2a0   : > { %8258 = vmatmul.mubr.f32.gmra.mrb[32].mxu1 %v13478_v38  ;;  %8930 = vmatmul.mubr.f32.gmra.mrb[32].mxu0 %v13361_v26  ;;  %v13490_v26 = vld [vmem:[#allocation96_spill] sm:$0xff]  ;;  %v13531_v38 = vld [vmem:[#allocation133_spill] sm:$0xff] }
 0x2a1   : > { %8260 = vmatprep.mubr.f32.mxu1 %v13479_v36  ;;  %8932 = vmatprep.mubr.f32.mxu0 %v13362_v15  ;;  %v13491_v15 = vld [vmem:[#allocation91_spill] sm:$0xff]  ;;  %v13532_v36 = vld [vmem:[#allocation140_spill] sm:$0xff] }
 0x2a4   : > { %8261 = vmatmul.mubr.f32.gmra.mrb[34].mxu1 %v13480_v14  ;;  %8933 = vmatmul.mubr.f32.gmra.mrb[34].mxu0 %v13363_v10  ;;  %v13492_v10 = vld [vmem:[#allocation97_spill] sm:$0xff]  ;;  %v13533_v14 = vld [vmem:[#allocation135_spill] sm:$0xff] }
 0x2a5   : > { %8263 = vmatprep.mubr.f32.mxu1 %v13481_v1  ;;  %8935 = vmatprep.mubr.f32.mxu0 %v13364_v13  ;;  %v13493_v13 = vld [vmem:[#allocation93_spill] sm:$0xff] }
 0x2a6   : > { %v13534_v1 = vld [vmem:[#allocation141_spill] sm:$0xff] }
 0x2a8   : > { %8264 = vmatmul.mubr.f32.gmra.mrb[36].mxu1 %v13482_v48  ;;  %8936 = vmatmul.mubr.f32.gmra.mrb[36].mxu0 %v13365_v58  ;;  %v13494_v58 = vld [vmem:[#allocation98_spill] sm:$0xff]  ;;  %v13535_v48 = vld [vmem:[#allocation136_spill] sm:$0xff] }
 0x2a9   : > { %8266 = vmatprep.mubr.f32.mxu1 %v13483_v37  ;;  %8938 = vmatprep.mubr.f32.mxu0 %v13366_v62  ;;  %v13495_v62 = vld [vmem:[#allocation94_spill] sm:$0xff] }
 0x2aa   : > { %v13536_v37 = vld [vmem:[#allocation142_spill] sm:$0xff] }
 0x2ac   : > { %8267 = vmatmul.mubr.f32.gmra.mrb[38].mxu1 %v13484_v28  ;;  %8939 = vmatmul.mubr.f32.gmra.mrb[38].mxu0 %v13367_v5  ;;  %v13496_v5 = vld [vmem:[#allocation99_spill] sm:$0xff]  ;;  %v13537_v28 = vld [vmem:[#allocation138_spill] sm:$0xff] }
 0x2ad   : > { %8269 = vmatprep.mubr.f32.mxu1 %v13485_v23  ;;  %8941 = vmatprep.mubr.f32.mxu0 %v13368_v19  ;;  %v13497_v19 = vld [vmem:[#allocation95_spill] sm:$0xff]  ;;  %v13538_v23 = vld [vmem:[#allocation144_spill] sm:$0xff] }
 0x2b0   : > { %8270 = vmatmul.mubr.f32.gmra.mrb[40].mxu1 %v13486_v4  ;;  %8942 = vmatmul.mubr.f32.gmra.mrb[40].mxu0 %v13369_v43  ;;  %v13498_v43 = vld [vmem:[#allocation102_spill] sm:$0xff] }
 0x2b1   : > { %8272 = vmatprep.mubr.f32.mxu1 %v13487_v35  ;;  %8944 = vmatprep.mubr.f32.mxu0 %v13370_v31  ;;  %v13499_v31 = vld [vmem:[#allocation100_spill] sm:$0xff]  ;;  %v13539_v4 = vld [vmem:[#allocation146_spill] sm:$0xff] }
 0x2b2   : > { %v13540_v35 = vld [vmem:[#allocation148_spill] sm:$0xff] }
 0x2b4   : > { %8273 = vmatmul.mubr.f32.gmra.mrb[42].mxu1 %v13488_v33  ;;  %8945 = vmatmul.mubr.f32.gmra.mrb[42].mxu0 %v13371_v27  ;;  %v13500_v27 = vld [vmem:[#allocation104_spill] sm:$0xff]  ;;  %v13541_v33 = vld [vmem:[#allocation151_spill] sm:$0xff] }
 0x2b5   : > { %8275 = vmatprep.mubr.f32.mxu1 %v13489_v11  ;;  %8947 = vmatprep.mubr.f32.mxu0 %v13372_v24  ;;  %v13501_v24 = vld [vmem:[#allocation107_spill] sm:$0xff]  ;;  %v13542_v11 = vld [vmem:[#allocation152_spill] sm:$0xff] }
 0x2b8   : > { %8276 = vmatmul.mubr.f32.gmra.mrb[44].mxu1 %v13490_v26  ;;  %8948 = vmatmul.mubr.f32.gmra.mrb[44].mxu0 %v13491_v15  ;;  %v13543_v26 = vld [vmem:[#allocation154_spill] sm:$0xff] }
 0x2b9   : > { %8278 = vmatprep.mubr.f32.mxu1 %v13492_v10  ;;  %8950 = vmatprep.mubr.f32.mxu0 %v13493_v13  ;;  %v13544_v15 = vld [vmem:[#allocation150_spill] sm:$0xff]  ;;  %v13546_v10 = vld [vmem:[#allocation153_spill] sm:$0xff]  ;;  %v13548_v13 = vld [vmem:[#allocation155_spill] sm:$0xff] }
 0x2bc   : > { %8279 = vmatmul.mubr.f32.gmra.mrb[46].mxu1 %v13494_v58  ;;  %8951 = vmatmul.mubr.f32.gmra.mrb[46].mxu0 %v13495_v62  ;;  %v13550_v58 = vld [vmem:[#allocation156_spill] sm:$0xff]  ;;  %v13552_v62 = vld [vmem:[#allocation159_spill] sm:$0xff] }
 0x2bd   : > { %8281 = vmatprep.mubr.f32.mxu1 %v13496_v5  ;;  %8953 = vmatprep.mubr.f32.mxu0 %v13497_v19  ;;  %v13554_v5 = vld [vmem:[#allocation161_spill] sm:$0xff]  ;;  %v13555_v19 = vld [vmem:[#allocation166_spill] sm:$0xff] }
 0x2c0   : > { %8282 = vmatmul.mubr.f32.gmra.mrb[48].mxu1 %v13498_v43  ;;  %8954 = vmatmul.mubr.f32.gmra.mrb[48].mxu0 %v13499_v31  ;;  %v13556_v43 = vld [vmem:[#allocation163_spill] sm:$0xff]  ;;  %v13557_v31 = vld [vmem:[#allocation168_spill] sm:$0xff] }
 0x2c1   : > { %8284 = vmatprep.mubr.f32.mxu1 %v13500_v27  ;;  %8956 = vmatprep.mubr.f32.mxu0 %v13378_v56  ;;  %v13510_v56 = vld [vmem:[#allocation117_spill] sm:$0xff] }
 0x2c2   : > { %v13558_v27 = vld [vmem:[#allocation165_spill] sm:$0xff] }
 0x2c4   : > { %8285 = vmatmul.mubr.f32.gmra.mrb[50].mxu1 %v13501_v24  ;;  %8957 = vmatmul.mubr.f32.gmra.mrb[50].mxu0 %v13379_v52  ;;  %v13512_v52 = vld [vmem:[#allocation119_spill] sm:$0xff]  ;;  %v13559_v24 = vld [vmem:[#allocation170_spill] sm:$0xff] }
 0x2c5   : > { %8287 = vmatprep.mubr.f32.mxu1 %v13502_v17  ;;  %8959 = vmatprep.mubr.f32.mxu0 %v13503_v39  ;;  %v13560_v17 = vld [vmem:[#allocation167_spill] sm:$0xff]  ;;  %v13561_v39 = vld [vmem:[#allocation172_spill] sm:$0xff] }
 0x2c8   : > { %8288 = vmatmul.mubr.f32.gmra.mrb[52].mxu1 %v13504_v42  ;;  %8960 = vmatmul.mubr.f32.gmra.mrb[52].mxu0 %v13505_v53  ;;  %v13562_v42 = vld [vmem:[#allocation169_spill] sm:$0xff]  ;;  %v13563_v53 = vld [vmem:[#allocation175_spill] sm:$0xff] }
 0x2c9   : > { %8290 = vmatprep.mubr.f32.mxu1 %v13506_v54  ;;  %8962 = vmatprep.mubr.f32.mxu0 %v13507_v3  ;;  %v13564_v54 = vld [vmem:[#allocation171_spill] sm:$0xff]  ;;  %v13565_v3 = vld [vmem:[#allocation177_spill] sm:$0xff] }
 0x2cc   : > { %8291 = vmatmul.mubr.f32.gmra.mrb[54].mxu1 %v13508_v16  ;;  %8963 = vmatmul.mubr.f32.gmra.mrb[54].mxu0 %v13509_v61  ;;  %v13566_v16 = vld [vmem:[#allocation173_spill] sm:$0xff]  ;;  %v13567_v61 = vld [vmem:[#allocation178_spill] sm:$0xff] }
 0x2cd   : > { %8293 = vmatprep.mubr.f32.mxu1 %v13510_v56  ;;  %8965 = vmatprep.mubr.f32.mxu0 %v13511_v9  ;;  %v13568_v56 = vld [vmem:[#allocation174_spill] sm:$0xff]  ;;  %v13569_v9 = vld [vmem:[#allocation180_spill] sm:$0xff] }
 0x2d0   : > { %8294 = vmatmul.mubr.f32.gmra.mrb[56].mxu1 %v13512_v52  ;;  %8966 = vmatmul.mubr.f32.gmra.mrb[56].mxu0 %v13513_v51  ;;  %v13570_v52 = vld [vmem:[#allocation176_spill] sm:$0xff]  ;;  %v13571_v51 = vld [vmem:[#allocation182_spill] sm:$0xff] }
 0x2d1   : > { %8296 = vmatprep.mubr.f32.mxu1 %v13514_v59  ;;  %8968 = vmatprep.mubr.f32.mxu0 %v13515_v12  ;;  %v13572_v59 = vld [vmem:[#allocation179_spill] sm:$0xff]  ;;  %v13573_v12 = vld [vmem:[#allocation184_spill] sm:$0xff] }
 0x2d4   : > { %8297 = vmatmul.mubr.f32.gmra.mrb[58].mxu1 %v13516_v57  ;;  %8969 = vmatmul.mubr.f32.gmra.mrb[58].mxu0 %v13517_v6  ;;  %v13574_v57 = vld [vmem:[#allocation181_spill] sm:$0xff]  ;;  %v13575_v6 = vld [vmem:[#allocation186_spill] sm:$0xff] }
 0x2d5   : > { %8299 = vmatprep.mubr.f32.mxu1 %v13518_v2  ;;  %8971 = vmatprep.mubr.f32.mxu0 %v13519_v55  ;;  %v13576_v2 = vld [vmem:[#allocation183_spill] sm:$0xff]  ;;  %v13577_v55 = vld [vmem:[#allocation188_spill] sm:$0xff] }
 0x2d8   : > { %8300 = vmatmul.mubr.f32.gmra.mrb[60].mxu1 %v13520_v18  ;;  %8972 = vmatmul.mubr.f32.gmra.mrb[60].mxu0 %v13521_v45  ;;  %v13578_v18 = vld [vmem:[#allocation185_spill] sm:$0xff]  ;;  %v13579_v45 = vld [vmem:[#allocation190_spill] sm:$0xff] }
 0x2d9   : > { %8302 = vmatprep.mubr.f32.mxu1 %v13522_v25  ;;  %8974 = vmatprep.mubr.f32.mxu0 %v13523_v44  ;;  %v13580_v25 = vld [vmem:[#allocation187_spill] sm:$0xff]  ;;  %v13581_v44 = vld [vmem:[#allocation192_spill] sm:$0xff] }
 0x2dc   : > { %8303 = vmatmul.mubr.f32.gmra.mrb[62].mxu1 %v13524_v0  ;;  %8975 = vmatmul.mubr.f32.gmra.mrb[62].mxu0 %v13525_v60  ;;  %v13582_v0 = vld [vmem:[#allocation189_spill] sm:$0xff]  ;;  %v13583_v60 = vld [vmem:[#allocation195_spill] sm:$0xff] }
 0x2dd   : > { %8305 = vmatprep.mubr.f32.mxu1 %v13526_v8  ;;  %8977 = vmatprep.mubr.f32.mxu0 %v13527_v20  ;;  %v13584_v8 = vld [vmem:[#allocation191_spill] sm:$0xff]  ;;  %v13585_v20 = vld [vmem:[#allocation197_spill] sm:$0xff] }
 0x2e0   : > { %8306 = vmatmul.mubr.f32.gmra.mrb[64].mxu1 %v13528_v30  ;;  %8978 = vmatmul.mubr.f32.gmra.mrb[64].mxu0 %v13529_v47  ;;  %v13586_v30 = vld [vmem:[#allocation193_spill] sm:$0xff]  ;;  %v13587_v47 = vld [vmem:[#allocation198_spill] sm:$0xff] }
 0x2e1   : > { %8308 = vmatprep.mubr.f32.mxu1 %v13530_v50  ;;  %8980 = vmatprep.mubr.f32.mxu0 %v13531_v38  ;;  %v13588_v50 = vld [vmem:[#allocation194_spill] sm:$0xff]  ;;  %v13589_v38 = vld [vmem:[#allocation200_spill] sm:$0xff] }
 0x2e4   : > { %8309 = vmatmul.mubr.f32.gmra.mrb[66].mxu1 %v13532_v36  ;;  %8981 = vmatmul.mubr.f32.gmra.mrb[66].mxu0 %v13533_v14  ;;  %v13590_v36 = vld [vmem:[#allocation196_spill] sm:$0xff]  ;;  %v13591_v14 = vld [vmem:[#allocation202_spill] sm:$0xff] }
 0x2e5   : > { %8311 = vmatprep.mubr.f32.mxu1 %v13534_v1  ;;  %8983 = vmatprep.mubr.f32.mxu0 %v13535_v48  ;;  %v13592_v1 = vld [vmem:[#allocation199_spill] sm:$0xff]  ;;  %v13593_v48 = vld [vmem:[#allocation204_spill] sm:$0xff] }
 0x2e8   : > { %8312 = vmatmul.mubr.f32.gmra.mrb[68].mxu1 %v13536_v37  ;;  %8984 = vmatmul.mubr.f32.gmra.mrb[68].mxu0 %v13537_v28  ;;  %v13594_v37 = vld [vmem:[#allocation201_spill] sm:$0xff]  ;;  %v13595_v28 = vld [vmem:[#allocation206_spill] sm:$0xff] }
 0x2e9   : > { %8314 = vmatprep.mubr.f32.mxu1 %v13538_v23  ;;  %8986 = vmatprep.mubr.f32.mxu0 %v13398_v49  ;;  %v13545_v49 = vld [vmem:[#allocation157_spill] sm:$0xff]  ;;  %v13596_v23 = vld [vmem:[#allocation203_spill] sm:$0xff] }
 0x2ec   : > { %8315 = vmatmul.mubr.f32.gmra.mrb[70].mxu1 %v13539_v4  ;;  %8987 = vmatmul.mubr.f32.gmra.mrb[70].mxu0 %v13399_v41  ;;  %v13547_v41 = vld [vmem:[#allocation158_spill] sm:$0xff]  ;;  %v13597_v4 = vld [vmem:[#allocation208_spill] sm:$0xff] }
 0x2ed   : > { %8317 = vmatprep.mubr.f32.mxu1 %v13540_v35  ;;  %8989 = vmatprep.mubr.f32.mxu0 %v13400_v22  ;;  %v13549_v22 = vld [vmem:[#allocation160_spill] sm:$0xff]  ;;  %v13598_v35 = vld [vmem:[#allocation205_spill] sm:$0xff] }
 0x2f0   : > { %8318 = vmatmul.mubr.f32.gmra.mrb[72].mxu1 %v13541_v33  ;;  %8990 = vmatmul.mubr.f32.gmra.mrb[72].mxu0 %v13401_v63  ;;  %v13551_v63 = vld [vmem:[#allocation162_spill] sm:$0xff] }
 0x2f1   : > { %8320 = vmatprep.mubr.f32.mxu1 %v13542_v11  ;;  %8992 = vmatprep.mubr.f32.mxu0 %v13402_v46  ;;  %v13553_v46 = vld [vmem:[#allocation164_spill] sm:$0xff]  ;;  %v13599_v33 = vld [vmem:[#allocation210_spill] sm:$0xff]  ;;  %v13600_v11 = vld [vmem:[#allocation207_spill] sm:$0xff] }
 0x2f4   : > { %8321 = vmatmul.mubr.f32.gmra.mrb[74].mxu1 %v13543_v26  ;;  %8993 = vmatmul.mubr.f32.gmra.mrb[74].mxu0 %v13544_v15  ;;  %v13601_v26 = vld [vmem:[#allocation212_spill] sm:$0xff]  ;;  %v13602_v15 = vld [vmem:[#allocation209_spill] sm:$0xff] }
 0x2f5   : > { %8323 = vmatprep.mubr.f32.mxu1 %v13545_v49  ;;  %8995 = vmatprep.mubr.f32.mxu0 %v13546_v10  ;;  %v13603_v49 = vld [vmem:[#allocation215_spill] sm:$0xff] }
 0x2f6   : > { %v13604_v10 = vld [vmem:[#allocation211_spill] sm:$0xff] }
 0x2f8   : > { %8324 = vmatmul.mubr.f32.gmra.mrb[76].mxu1 %v13547_v41  ;;  %8996 = vmatmul.mubr.f32.gmra.mrb[76].mxu0 %v13548_v13  ;;  %v12231_v41 = vld [vmem:[%s12598_s1 + $0x80] ss:$0 sm:$0xff]  ;;  %v13605_v13 = vld [vmem:[#allocation217_spill] sm:$0xff] }
 0x2f9   : > { %8326 = vmatprep.mubr.f32.mxu1 %v13549_v22  ;;  %8998 = vmatprep.mubr.f32.mxu0 %v13550_v58  ;;  %v13606_v22 = vld [vmem:[#allocation213_spill] sm:$0xff] }
 0x2fc   : > { %8327 = vmatmul.mubr.f32.gmra.mrb[78].mxu1 %v13551_v63  ;;  %8999 = vmatmul.mubr.f32.gmra.mrb[78].mxu0 %v13552_v62 }
 0x2fd   : > { %8329 = vmatprep.mubr.f32.mxu1 %v13553_v46  ;;  %9001 = vmatprep.mubr.f32.mxu0 %v13554_v5  ;;  %v13607_v5 = vld [vmem:[#allocation218_spill] sm:$0xff] }
 0x300   : > { %8330 = vmatmul.mubr.f32.gmra.mrb[80].mxu1 %v13555_v19  ;;  %9002 = vmatmul.mubr.f32.gmra.mrb[80].mxu0 %v13556_v43  ;;  %v13608_v43 = vld [vmem:[#allocation214_spill] sm:$0xff] }
 0x301   : > { %8332 = vmatprep.mubr.f32.mxu1 %v13557_v31  ;;  %9004 = vmatprep.mubr.f32.mxu0 %v13558_v27  ;;  %v13609_v27 = vld [vmem:[#allocation220_spill] sm:$0xff] }
 0x304   : > { %8333 = vmatmul.mubr.f32.gmra.mrb[82].mxu1 %v13559_v24  ;;  %9005 = vmatmul.mubr.f32.gmra.mrb[82].mxu0 %v13560_v17  ;;  %v13610_v24 = vld [vmem:[#allocation216_spill] sm:$0xff] }
 0x305   : > { %8335 = vmatprep.mubr.f32.mxu1 %v13561_v39  ;;  %9007 = vmatprep.mubr.f32.mxu0 %v13562_v42 }
 0x308   : > { %8336 = vmatmul.mubr.f32.gmra.mrb[84].mxu1 %v13563_v53  ;;  %9008 = vmatmul.mubr.f32.gmra.mrb[84].mxu0 %v13564_v54 }
 0x309   : > { %8338 = vmatprep.mubr.f32.mxu1 %v13565_v3  ;;  %9010 = vmatprep.mubr.f32.mxu0 %v13566_v16  ;;  %v13611_v16 = vld [vmem:[#allocation222_spill] sm:$0xff] }
 0x30c   : > { %8339 = vmatmul.mubr.f32.gmra.mrb[86].mxu1 %v13567_v61  ;;  %9011 = vmatmul.mubr.f32.gmra.mrb[86].mxu0 %v13568_v56  ;;  %v13612_v56 = vld [vmem:[#allocation219_spill] sm:$0xff] }
 0x30d   : > { %8341 = vmatprep.mubr.f32.mxu1 %v13569_v9  ;;  %9013 = vmatprep.mubr.f32.mxu0 %v13570_v52  ;;  %v13613_v52 = vld [vmem:[#allocation224_spill] sm:$0xff] }
 0x310   : > { %8342 = vmatmul.mubr.f32.gmra.mrb[88].mxu1 %v13571_v51  ;;  %9014 = vmatmul.mubr.f32.gmra.mrb[88].mxu0 %v13572_v59  ;;  %v13614_v59 = vld [vmem:[#allocation221_spill] sm:$0xff] }
 0x311   : > { %8344 = vmatprep.mubr.f32.mxu1 %v13573_v12  ;;  %9016 = vmatprep.mubr.f32.mxu0 %v13574_v57 }
 0x314   : > { %8345 = vmatmul.mubr.f32.gmra.mrb[90].mxu1 %v13575_v6  ;;  %9017 = vmatmul.mubr.f32.gmra.mrb[90].mxu0 %v13576_v2 }
 0x315   : > { %8347 = vmatprep.mubr.f32.mxu1 %v13577_v55  ;;  %9019 = vmatprep.mubr.f32.mxu0 %v13578_v18  ;;  %v13615_v18 = vld [vmem:[#allocation226_spill] sm:$0xff] }
 0x318   : > { %8348 = vmatmul.mubr.f32.gmra.mrb[92].mxu1 %v13579_v45  ;;  %9020 = vmatmul.mubr.f32.gmra.mrb[92].mxu0 %v13580_v25  ;;  %v13616_v25 = vld [vmem:[#allocation223_spill] sm:$0xff] }
 0x319   : > { %8350 = vmatprep.mubr.f32.mxu1 %v13581_v44  ;;  %9022 = vmatprep.mubr.f32.mxu0 %v13582_v0  ;;  %v13617_v0 = vld [vmem:[#allocation228_spill] sm:$0xff] }
 0x31c   : > { %8351 = vmatmul.mubr.f32.gmra.mrb[94].mxu1 %v13583_v60  ;;  %9023 = vmatmul.mubr.f32.gmra.mrb[94].mxu0 %v13584_v8  ;;  %v13618_v8 = vld [vmem:[#allocation225_spill] sm:$0xff] }
 0x31d   : > { %8353 = vmatprep.mubr.f32.mxu1 %v13585_v20  ;;  %9025 = vmatprep.mubr.f32.mxu0 %v13586_v30 }
 0x320   : > { %8354 = vmatmul.mubr.f32.gmra.mrb[96].mxu1 %v13587_v47  ;;  %9026 = vmatmul.mubr.f32.gmra.mrb[96].mxu0 %v13588_v50 }
 0x321   : > { %8356 = vmatprep.mubr.f32.mxu1 %v13589_v38  ;;  %9028 = vmatprep.mubr.f32.mxu0 %v13590_v36  ;;  %v13619_v36 = vld [vmem:[#allocation230_spill] sm:$0xff] }
 0x324   : > { %8357 = vmatmul.mubr.f32.gmra.mrb[98].mxu1 %v13591_v14  ;;  %9029 = vmatmul.mubr.f32.gmra.mrb[98].mxu0 %v13592_v1 }
 0x325   : > { %8359 = vmatprep.mubr.f32.mxu1 %v13593_v48  ;;  %9031 = vmatprep.mubr.f32.mxu0 %v13594_v37  ;;  %v13620_v48 = vld [vmem:[#allocation232_spill] sm:$0xff] }
 0x328   : > { %8360 = vmatmul.mubr.f32.gmra.mrb[100].mxu1 %v13595_v28  ;;  %9032 = vmatmul.mubr.f32.gmra.mrb[100].mxu0 %v13596_v23  ;;  %v13621_v28 = vld [vmem:[#allocation229_spill] sm:$0xff] }
 0x329   : > { %8362 = vmatprep.mubr.f32.mxu1 %v13597_v4  ;;  %9034 = vmatprep.mubr.f32.mxu0 %v13598_v35 }
 0x32c   : > { %8363 = vmatmul.mubr.f32.gmra.mrb[102].mxu1 %v13599_v33  ;;  %9035 = vmatmul.mubr.f32.gmra.mrb[102].mxu0 %v13600_v11 }
 0x32d   : > { %8365 = vmatprep.mubr.f32.mxu1 %v13601_v26  ;;  %9037 = vmatprep.mubr.f32.mxu0 %v13602_v15  ;;  %v13622_v26 = vld [vmem:[#allocation235_spill] sm:$0xff] }
 0x330   : > { %8366 = vmatmul.mubr.f32.gmra.mrb[104].mxu1 %v13603_v49  ;;  %9038 = vmatmul.mubr.f32.gmra.mrb[104].mxu0 %v13604_v10  ;;  %v13623_v49 = vld [vmem:[#allocation237_spill] sm:$0xff] }
 0x331   : > { %8368 = vmatprep.mubr.f32.mxu1 %v13605_v13  ;;  %9040 = vmatprep.mubr.f32.mxu0 %v13606_v22  ;;  %v13624_v13 = vld [vmem:[#allocation233_spill] sm:$0xff] }
 0x333   : > { %v8211_v58 = vpop.f32.mrb[0].mxu1  ;;  %v8883_v63 = vpop.f32.mrb[0].mxu0 }
 0x334   : > { %v9265_v62 = vadd.f32 %v8211_v58, %v12231_v41  ;;  %v2687_v46 = vpop.f32.mrb[1].mxu1  ;;  %8369 = vmatmul.mubr.f32.gmra.mrb[106].mxu1 %v13607_v5  ;;  %v5649_v19 = vpop.f32.mrb[1].mxu0  ;;  %9041 = vmatmul.mubr.f32.gmra.mrb[106].mxu0 %v13608_v43  ;;  %v13625_v5 = vld [vmem:[#allocation238_spill] sm:$0xff]  ;;  %v13626_v43 = vld [vmem:[#allocation239_spill] sm:$0xff] }
 0x335   : > { %v9267_v31 = vadd.f32 %v12231_v41, %v2687_v46  ;;  %8371 = vmatprep.mubr.f32.mxu1 %v13609_v27  ;;  %9043 = vmatprep.mubr.f32.mxu0 %v13610_v24  ;;  %v13627_v27 = vld [vmem:[#allocation236_spill] sm:$0xff] }
 0x336   : > { %v9266_v17 = vadd.f32 %v9265_v62, %v8883_v63 }
 0x337   : > { %v8214_v39 = vpop.f32.mrb[2].mxu1  ;;  %v8886_v42 = vpop.f32.mrb[2].mxu0  ;;  %v9268_v53 = vadd.f32 %v9267_v31, %v5649_v19 }
 0x338   : > { %v9269_v54 = vadd.f32 %v8214_v39, %v12231_v41  ;;  %v2701_v3 = vpop.f32.mrb[3].mxu1  ;;  %8372 = vmatmul.mubr.f32.gmra.mrb[108].mxu1 %v13611_v16  ;;  %v5661_v61 = vpop.f32.mrb[3].mxu0  ;;  %9044 = vmatmul.mubr.f32.gmra.mrb[108].mxu0 %v13612_v56  ;;  %v13629_v16 = vld [vmem:[#allocation242_spill] sm:$0xff] }
 0x339   : > { %v9271_v9 = vadd.f32 %v12231_v41, %v2701_v3  ;;  %6415 = vxpose.xlu0.b32.start [1/16] (narrow) %v9268_v53, 8  ;;  %8374 = vmatprep.mubr.f32.mxu1 %v13613_v52 }
 0x33a   : > { %v9270_v51 = vadd.f32 %v9269_v54, %v8886_v42  ;;  %9046 = vmatprep.mubr.f32.mxu0 %v13614_v59  ;;  %v13628_v54 = vld [vmem:[#allocation241_spill] sm:$0xff] }
 0x33b   : > { %v9272_v12 = vadd.f32 %v9271_v9, %v5661_v61  ;;  %v8217_v57 = vpop.f32.mrb[4].mxu1  ;;  %v8889_v6 = vpop.f32.mrb[4].mxu0 }
 0x33c   : > { %v9273_v2 = vadd.f32 %v8217_v57, %v12231_v41  ;;  %v2715_v55 = vpop.f32.mrb[5].mxu1  ;;  %8375 = vmatmul.mubr.f32.gmra.mrb[110].mxu1 %v13615_v18  ;;  %v5673_v45 = vpop.f32.mrb[5].mxu0  ;;  %9047 = vmatmul.mubr.f32.gmra.mrb[110].mxu0 %v13616_v25 }
 0x33d   : > { %v9275_v44 = vadd.f32 %v12231_v41, %v2715_v55  ;;  %6416 = vxpose.xlu0.b32.cont [2/16] (narrow) %v9266_v17, 8  ;;  %8377 = vmatprep.mubr.f32.mxu1 %v13617_v0  ;;  %v13633_v0 = vld [vmem:[#allocation248_spill] sm:$0xff] }
 0x33e   : > { %v9274_v60 = vadd.f32 %v9273_v2, %v8889_v6  ;;  %9049 = vmatprep.mubr.f32.mxu0 %v13618_v8  ;;  %v13631_v6 = vld [vmem:[#allocation246_spill] sm:$0xff] }
 0x33f   : > { %v9276_v20 = vadd.f32 %v9275_v44, %v5673_v45  ;;  %v8220_v30 = vpop.f32.mrb[6].mxu1  ;;  %v8892_v47 = vpop.f32.mrb[6].mxu0 }
 0x340   : > { %v9277_v50 = vadd.f32 %v8220_v30, %v12231_v41  ;;  %v2729_v38 = vpop.f32.mrb[7].mxu1  ;;  %8378 = vmatmul.mubr.f32.gmra.mrb[112].mxu1 %v13619_v36  ;;  %v5685_v14 = vpop.f32.mrb[7].mxu0  ;;  %9050 = vmatmul.mubr.f32.gmra.mrb[112].mxu0 %v13436_v21 }
 0x341   : > { %v9279_v1 = vadd.f32 %v12231_v41, %v2729_v38  ;;  %6417 = vxpose.xlu0.b32.cont [3/16] (narrow) %v9272_v12, 8  ;;  %8380 = vmatprep.mubr.f32.mxu1 %v13620_v48  ;;  %v13630_v12 = vld [vmem:[#allocation244_spill] sm:$0xff] }
 0x342   : > { %v12258_v37 = vadd.f32 %v9277_v50, %v8892_v47  ;;  %9052 = vmatprep.mubr.f32.mxu0 %v13621_v28  ;;  %v13636_v47 = vld [vmem:[#allocation247_spill] sm:$0xff]  ;;  %v13637_v48 = vld [vmem:[#allocation252_spill] sm:$0xff] }
 0x343   : > { %v9280_v23 = vadd.f32 %v9279_v1, %v5685_v14  ;;  %v8223_v4 = vpop.f32.mrb[8].mxu1  ;;  %v8895_v35 = vpop.f32.mrb[8].mxu0 }
 0x344   : > { %v9281_v33 = vadd.f32 %v8223_v4, %v12231_v41  ;;  %v2743_v11 = vpop.f32.mrb[9].mxu1  ;;  %8381 = vmatmul.mubr.f32.gmra.mrb[114].mxu1 %v13622_v26  ;;  %v5697_v15 = vpop.f32.mrb[9].mxu0  ;;  %9053 = vmatmul.mubr.f32.gmra.mrb[114].mxu0 %v13438_v34 }
 0x345   : > { %v9283_v21 = vadd.f32 %v12231_v41, %v2743_v11  ;;  %6418 = vxpose.xlu0.b32.cont [4/16] (narrow) %v9270_v51, 8  ;;  %8383 = vmatprep.mubr.f32.mxu1 %v13623_v49 }
 0x346   : > { %v12266_v10 = vadd.f32 %v9281_v33, %v8895_v35  ;;  %9055 = vmatprep.mubr.f32.mxu0 %v13624_v13  ;;  %v13639_v35 = vld [vmem:[#allocation254_spill] sm:$0xff]  ;;  %v13640_v33 = vld [vmem:[#allocation251_spill] sm:$0xff] }
 0x347   : > { %v9284_v22 = vadd.f32 %v9283_v21, %v5697_v15  ;;  %v8226_v58 = vpop.f32.mrb[10].mxu1  ;;  %v8898_v63 = vpop.f32.mrb[10].mxu0  ;;  %v13641_v13 = vld [vmem:[#allocation255_spill] sm:$0xff] }
 0x348   : > { %v9285_v62 = vadd.f32 %v8226_v58, %v12231_v41  ;;  %v2757_v46 = vpop.f32.mrb[11].mxu1  ;;  %8384 = vmatmul.mubr.f32.gmra.mrb[116].mxu1 %v13625_v5  ;;  %v5709_v19 = vpop.f32.mrb[11].mxu0  ;;  %9056 = vmatmul.mubr.f32.gmra.mrb[116].mxu0 %v13440_v40 }
 0x349   : > { %v9287_v34 = vadd.f32 %v12231_v41, %v2757_v46  ;;  %6419 = vxpose.xlu0.b32.cont [5/16] (narrow) %v9276_v20, 8  ;;  %8386 = vmatprep.mubr.f32.mxu1 %v13626_v43  ;;  %v13635_v20 = vld [vmem:[#allocation250_spill] sm:$0xff] }
 0x34a   : > { %v12274_v31 = vadd.f32 %v9285_v62, %v8898_v63  ;;  %9058 = vmatprep.mubr.f32.mxu0 %v13627_v27  ;;  %v13642_v63 = vld [vmem:[#allocation253_spill] sm:$0xff] }
 0x34b   : > { %v12277_v24 = vadd.f32 %v9287_v34, %v5709_v19  ;;  %v8229_v17 = vpop.f32.mrb[12].mxu1  ;;  %v8901_v39 = vpop.f32.mrb[12].mxu0 }
 0x34c   : > { %v9289_v42 = vadd.f32 %v8229_v17, %v12231_v41  ;;  %v2771_v53 = vpop.f32.mrb[13].mxu1  ;;  %8387 = vmatmul.mubr.f32.gmra.mrb[118].mxu1 %v13628_v54  ;;  %v5721_v3 = vpop.f32.mrb[13].mxu0  ;;  %9059 = vmatmul.mubr.f32.gmra.mrb[118].mxu0 %v11647_v7 }
 0x34d   : > { %v9291_v40 = vadd.f32 %v12231_v41, %v2771_v53  ;;  %6420 = vxpose.xlu0.b32.cont [6/16] (narrow) %v9274_v60, 8  ;;  %8389 = vmatprep.mubr.f32.mxu1 %v13629_v16 }
 0x34e   : > { %v12284_v61 = vadd.f32 %v9289_v42, %v8901_v39  ;;  %9061 = vmatprep.mubr.f32.mxu0 %v13442_v29  ;;  %v13632_v29 = vld [vmem:[#allocation243_spill] sm:$0xff] }
 0x34f   : > { %v12287_v56 = vadd.f32 %v9291_v40, %v5721_v3  ;;  %v8232_v9 = vpop.f32.mrb[14].mxu1  ;;  %v8904_v52 = vpop.f32.mrb[14].mxu0 }
 0x350   : > { %v9293_v51 = vadd.f32 %v8232_v9, %v12231_v41  ;;  %v2785_v59 = vpop.f32.mrb[15].mxu1  ;;  %8390 = vmatmul.mubr.f32.gmra.mrb[120].mxu1 %v13630_v12  ;;  %v5733_v57 = vpop.f32.mrb[15].mxu0  ;;  %9062 = vmatmul.mubr.f32.gmra.mrb[120].mxu0 %v11666_v32  ;;  %v13634_v32 = vld [vmem:[#allocation245_spill] sm:$0xff] }
 0x351   : > { %v9295_v7 = vadd.f32 %v12231_v41, %v2785_v59  ;;  %6421 = vxpose.xlu0.b32.cont [7/16] (narrow) %v9280_v23, 8  ;;  %8392 = vmatprep.mubr.f32.mxu1 %v13631_v6  ;;  %v13638_v23 = vld [vmem:[#allocation249_spill] sm:$0xff] }
 0x352   : > { %v12294_v2 = vadd.f32 %v9293_v51, %v8904_v52  ;;  %9064 = vmatprep.mubr.f32.mxu0 %v13632_v29 }
 0x353   : > { %v12297_v55 = vadd.f32 %v9295_v7, %v5733_v57  ;;  %v8235_v18 = vpop.f32.mrb[16].mxu1  ;;  %v8907_v45 = vpop.f32.mrb[16].mxu0 }
 0x354   : > { %v9297_v25 = vadd.f32 %v8235_v18, %v12231_v41  ;;  %v2799_v44 = vpop.f32.mrb[17].mxu1  ;;  %8393 = vmatmul.mubr.f32.gmra.mrb[122].mxu1 %v13633_v0  ;;  %v5745_v60 = vpop.f32.mrb[17].mxu0  ;;  %9065 = vmatmul.mubr.f32.gmra.mrb[122].mxu0 %v13634_v32 }
 0x355   : > { %v9299_v8 = vadd.f32 %v12231_v41, %v2799_v44  ;;  %6422 = vxpose.xlu0.b32.cont [8/16] (narrow) %v12258_v37, 8  ;;  %8395 = vmatprep.mubr.f32.mxu1 %v13635_v20 }
 0x356   : > { %v9298_v30 = vadd.f32 %v9297_v25, %v8907_v45  ;;  %9067 = vmatprep.mubr.f32.mxu0 %v13636_v47 }
 0x357   : > { %v8238_v50 = vpop.f32.mrb[18].mxu1  ;;  %v8910_v38 = vpop.f32.mrb[18].mxu0  ;;  %v9300_v36 = vadd.f32 %v9299_v8, %v5745_v60 }
 0x358   : > { %v9301_v14 = vadd.f32 %v8238_v50, %v12231_v41  ;;  %v2813_v1 = vpop.f32.mrb[19].mxu1  ;;  %8396 = vmatmul.mubr.f32.gmra.mrb[124].mxu1 %v13637_v48  ;;  %v5757_v28 = vpop.f32.mrb[19].mxu0  ;;  %9068 = vmatmul.mubr.f32.gmra.mrb[124].mxu0 %v13638_v23 }
 0x359   : > { %v9303_v4 = vadd.f32 %v12231_v41, %v2813_v1  ;;  %6423 = vxpose.xlu0.b32.cont [9/16] (narrow) %v9284_v22, 8  ;;  %6447 = vxpose.xlu1.b32.start [1/16] (narrow) %v9300_v36, 8 }
 0x35a   : > { %v9302_v37 = vadd.f32 %v9301_v14, %v8910_v38  ;;  %8398 = vmatprep.mubr.f32.mxu1 %v13639_v35  ;;  %9070 = vmatprep.mubr.f32.mxu0 %v13640_v33 }
 0x35b   : > { %v9304_v11 = vadd.f32 %v9303_v4, %v5757_v28  ;;  %v8241_v26 = vpop.f32.mrb[20].mxu1  ;;  %v8913_v15 = vpop.f32.mrb[20].mxu0 }
 0x35c   : > { %v9305_v21 = vadd.f32 %v8241_v26, %v12231_v41  ;;  %v2827_v49 = vpop.f32.mrb[21].mxu1  ;;  %8399 = vmatmul.mubr.f32.gmra.mrb[126].mxu1 %v13641_v13  ;;  %v5769_v58 = vpop.f32.mrb[21].mxu0  ;;  %9071 = vmatmul.mubr.f32.gmra.mrb[126].mxu0 %v13642_v63 }
 0x35d   : > { %v9307_v62 = vadd.f32 %v12231_v41, %v2827_v49  ;;  %6424 = vxpose.xlu0.b32.cont [10/16] (narrow) %v12266_v10, 8  ;;  %6448 = vxpose.xlu1.b32.cont [2/16] (narrow) %v9298_v30, 8 }
 0x35e   : > { %v9306_v22 = vadd.f32 %v9305_v21, %v8913_v15 }
 0x35f   : > { %v9308_v46 = vadd.f32 %v9307_v62, %v5769_v58  ;;  %v8244_v5 = vpop.f32.mrb[22].mxu1  ;;  %v8916_v19 = vpop.f32.mrb[22].mxu0 }
 0x360   : > { %v9309_v34 = vadd.f32 %v8244_v5, %v12231_v41  ;;  %v2841_v43 = vpop.f32.mrb[23].mxu1  ;;  %v5781_v27 = vpop.f32.mrb[23].mxu0 }
 0x361   : > { %v9311_v17 = vadd.f32 %v12231_v41, %v2841_v43  ;;  %6425 = vxpose.xlu0.b32.cont [11/16] (narrow) %v12277_v24, 8  ;;  %6449 = vxpose.xlu1.b32.cont [3/16] (narrow) %v9304_v11, 8 }
 0x362   : > { %v9310_v39 = vadd.f32 %v9309_v34, %v8916_v19 }
 0x363   : > { %v9312_v42 = vadd.f32 %v9311_v17, %v5781_v27  ;;  %v8247_v53 = vpop.f32.mrb[24].mxu1  ;;  %v8919_v54 = vpop.f32.mrb[24].mxu0 }
 0x364   : > { %v9313_v10 = vadd.f32 %v8247_v53, %v12231_v41  ;;  %v2855_v3 = vpop.f32.mrb[25].mxu1  ;;  %v5793_v40 = vpop.f32.mrb[25].mxu0 }
 0x365   : > { %v9315_v16 = vadd.f32 %v12231_v41, %v2855_v3  ;;  %6426 = vxpose.xlu0.b32.cont [12/16] (narrow) %v12274_v31, 8  ;;  %6450 = vxpose.xlu1.b32.cont [4/16] (narrow) %v9302_v37, 8 }
 0x366   : > { %v9314_v9 = vadd.f32 %v9313_v10, %v8919_v54 }
 0x367   : > { %v9316_v52 = vadd.f32 %v9315_v16, %v5793_v40  ;;  %v8250_v51 = vpop.f32.mrb[26].mxu1  ;;  %v8922_v59 = vpop.f32.mrb[26].mxu0 }
 0x368   : > { %v9317_v24 = vadd.f32 %v8250_v51, %v12231_v41  ;;  %v2869_v12 = vpop.f32.mrb[27].mxu1  ;;  %v5805_v57 = vpop.f32.mrb[27].mxu0 }
 0x369   : > { %v9319_v7 = vadd.f32 %v12231_v41, %v2869_v12  ;;  %6427 = vxpose.xlu0.b32.cont [13/16] (narrow) %v12287_v56, 8  ;;  %6451 = vxpose.xlu1.b32.cont [5/16] (narrow) %v9308_v46, 8 }
 0x36a   : > { %v12326_v6 = vadd.f32 %v9317_v24, %v8922_v59 }
 0x36b   : > { %v9320_v29 = vadd.f32 %v9319_v7, %v5805_v57  ;;  %v8253_v18 = vpop.f32.mrb[28].mxu1  ;;  %v8925_v45 = vpop.f32.mrb[28].mxu0 }
 0x36c   : > { %v9321_v31 = vadd.f32 %v8253_v18, %v12231_v41  ;;  %v2883_v25 = vpop.f32.mrb[29].mxu1  ;;  %v5817_v44 = vpop.f32.mrb[29].mxu0 }
 0x36d   : > { %v9323_v0 = vadd.f32 %v12231_v41, %v2883_v25  ;;  %6428 = vxpose.xlu0.b32.cont [14/16] (narrow) %v12284_v61, 8  ;;  %6452 = vxpose.xlu1.b32.cont [6/16] (narrow) %v9306_v22, 8 }
 0x36e   : > { %v12331_v60 = vadd.f32 %v9321_v31, %v8925_v45 }
 0x36f   : > { %v12333_v32 = vadd.f32 %v9323_v0, %v5817_v44  ;;  %v8256_v56 = vpop.f32.mrb[30].mxu1  ;;  %v8928_v8 = vpop.f32.mrb[30].mxu0 }
 0x370   : > { %v9325_v20 = vadd.f32 %v8256_v56, %v12231_v41  ;;  %v2897_v30 = vpop.f32.mrb[31].mxu1  ;;  %v5829_v47 = vpop.f32.mrb[31].mxu0 }
 0x371   : > { %v9327_v50 = vadd.f32 %v12231_v41, %v2897_v30  ;;  %6429 = vxpose.xlu0.b32.cont [15/16] (narrow) %v12297_v55, 8  ;;  %6453 = vxpose.xlu1.b32.cont [7/16] (narrow) %v9312_v42, 8 }
 0x372   : > { %v12338_v38 = vadd.f32 %v9325_v20, %v8928_v8 }
 0x373   : > { %v12340_v36 = vadd.f32 %v9327_v50, %v5829_v47  ;;  %v8259_v61 = vpop.f32.mrb[32].mxu1  ;;  %v8931_v14 = vpop.f32.mrb[32].mxu0 }
 0x374   : > { %v9329_v1 = vadd.f32 %v8259_v61, %v12231_v41  ;;  %v2911_v48 = vpop.f32.mrb[33].mxu1  ;;  %v5841_v28 = vpop.f32.mrb[33].mxu0 }
 0x375   : > { %v9331_v23 = vadd.f32 %v12231_v41, %v2911_v48  ;;  %6430 = vxpose.xlu0.b32.end [16/16] (narrow) %v12294_v2, 8  ;;  %6454 = vxpose.xlu1.b32.cont [8/16] (narrow) %v9310_v39, 8 }
 0x376   : > { %v9330_v4 = vadd.f32 %v9329_v1, %v8931_v14 }
 0x377   : > { %v9332_v37 = vadd.f32 %v9331_v23, %v5841_v28  ;;  %v8262_v35 = vpop.f32.mrb[34].mxu1  ;;  %v8934_v55 = vpop.f32.mrb[34].mxu0 }
 0x378   : > { %v9333_v33 = vadd.f32 %v8262_v35, %v12231_v41  ;;  %v2925_v11 = vpop.f32.mrb[35].mxu1  ;;  %v5853_v26 = vpop.f32.mrb[35].mxu0 }
 0x379   : > { %v9335_v15 = vadd.f32 %v12231_v41, %v2925_v11  ;;  %6455 = vxpose.xlu1.b32.cont [9/16] (narrow) %v9316_v52, 8  ;;  %6479 = vxpose.xlu0.b32.start [1/16] (narrow) %v9332_v37, 8 }
 0x37a   : > { %v9334_v21 = vadd.f32 %v9333_v33, %v8934_v55 }
 0x37b   : > { %v9336_v49 = vadd.f32 %v9335_v15, %v5853_v26  ;;  %v8265_v13 = vpop.f32.mrb[36].mxu1  ;;  %v8937_v58 = vpop.f32.mrb[36].mxu0 }
 0x37c   : > { %v9337_v63 = vadd.f32 %v8265_v13, %v12231_v41  ;;  %v2939_v2 = vpop.f32.mrb[37].mxu1  ;;  %v5865_v62 = vpop.f32.mrb[37].mxu0 }
 0x37d   : > { %v9339_v22 = vadd.f32 %v12231_v41, %v2939_v2  ;;  %6456 = vxpose.xlu1.b32.cont [10/16] (narrow) %v9314_v9, 8  ;;  %6480 = vxpose.xlu0.b32.cont [2/16] (narrow) %v9330_v4, 8 }
 0x37e   : > { %v9338_v46 = vadd.f32 %v9337_v63, %v8937_v58 }
 0x37f   : > { %v9340_v5 = vadd.f32 %v9339_v22, %v5865_v62  ;;  %v8268_v19 = vpop.f32.mrb[38].mxu1  ;;  %v8940_v34 = vpop.f32.mrb[38].mxu0 }
 0x380   : > { %v9341_v43 = vadd.f32 %v8268_v19, %v12231_v41  ;;  %v2953_v27 = vpop.f32.mrb[39].mxu1  ;;  %v5877_v17 = vpop.f32.mrb[39].mxu0 }
 0x381   : > { %v9343_v39 = vadd.f32 %v12231_v41, %v2953_v27  ;;  %6457 = vxpose.xlu1.b32.cont [11/16] (narrow) %v9320_v29, 8  ;;  %6481 = vxpose.xlu0.b32.cont [3/16] (narrow) %v9336_v49, 8 }
 0x382   : > { %v9342_v42 = vadd.f32 %v9341_v43, %v8940_v34 }
 0x383   : > { %v9344_v53 = vadd.f32 %v9343_v39, %v5877_v17  ;;  %v8271_v54 = vpop.f32.mrb[40].mxu1  ;;  %v8943_v10 = vpop.f32.mrb[40].mxu0 }
 0x384   : > { %v9345_v3 = vadd.f32 %v8271_v54, %v12231_v41  ;;  %v2967_v40 = vpop.f32.mrb[41].mxu1  ;;  %v5889_v16 = vpop.f32.mrb[41].mxu0 }
 0x385   : > { %v9347_v9 = vadd.f32 %v12231_v41, %v2967_v40  ;;  %6458 = vxpose.xlu1.b32.cont [12/16] (narrow) %v12326_v6, 8  ;;  %6482 = vxpose.xlu0.b32.cont [4/16] (narrow) %v9334_v21, 8 }
 0x386   : > { %v9346_v52 = vadd.f32 %v9345_v3, %v8943_v10 }
 0x387   : > { %v9348_v51 = vadd.f32 %v9347_v9, %v5889_v16  ;;  %v8274_v59 = vpop.f32.mrb[42].mxu1  ;;  %v8946_v24 = vpop.f32.mrb[42].mxu0 }
 0x388   : > { %v9349_v12 = vadd.f32 %v8274_v59, %v12231_v41  ;;  %v2981_v57 = vpop.f32.mrb[43].mxu1  ;;  %v5901_v7 = vpop.f32.mrb[43].mxu0 }
 0x389   : > { %v9351_v29 = vadd.f32 %v12231_v41, %v2981_v57  ;;  %6459 = vxpose.xlu1.b32.cont [13/16] (narrow) %v12333_v32, 8  ;;  %6483 = vxpose.xlu0.b32.cont [5/16] (narrow) %v9340_v5, 8 }
 0x38a   : > { %v12357_v18 = vadd.f32 %v9349_v12, %v8946_v24 }
 0x38b   : > { %v9352_v45 = vadd.f32 %v9351_v29, %v5901_v7  ;;  %v8277_v31 = vpop.f32.mrb[44].mxu1  ;;  %v8949_v25 = vpop.f32.mrb[44].mxu0 }
 0x38c   : > { %v9353_v6 = vadd.f32 %v8277_v31, %v12231_v41  ;;  %v2995_v44 = vpop.f32.mrb[45].mxu1  ;;  %v5913_v0 = vpop.f32.mrb[45].mxu0 }
 0x38d   : > { %v9355_v56 = vadd.f32 %v12231_v41, %v2995_v44  ;;  %6460 = vxpose.xlu1.b32.cont [14/16] (narrow) %v12331_v60, 8  ;;  %6484 = vxpose.xlu0.b32.cont [6/16] (narrow) %v9338_v46, 8 }
 0x38e   : > { %v12362_v8 = vadd.f32 %v9353_v6, %v8949_v25 }
 0x38f   : > { %v12364_v20 = vadd.f32 %v9355_v56, %v5913_v0  ;;  %v8280_v32 = vpop.f32.mrb[46].mxu1  ;;  %v8952_v30 = vpop.f32.mrb[46].mxu0 }
 0x390   : > { %v9357_v47 = vadd.f32 %v8280_v32, %v12231_v41  ;;  %v3009_v50 = vpop.f32.mrb[47].mxu1  ;;  %v5925_v61 = vpop.f32.mrb[47].mxu0 }
 0x391   : > { %v9359_v14 = vadd.f32 %v12231_v41, %v3009_v50  ;;  %6461 = vxpose.xlu1.b32.cont [15/16] (narrow) %v12340_v36, 8  ;;  %6485 = vxpose.xlu0.b32.cont [7/16] (narrow) %v9344_v53, 8 }
 0x392   : > { %v12369_v1 = vadd.f32 %v9357_v47, %v8952_v30 }
 0x393   : > { %v12371_v48 = vadd.f32 %v9359_v14, %v5925_v61  ;;  %v8283_v60 = vpop.f32.mrb[48].mxu1  ;;  %v8955_v28 = vpop.f32.mrb[48].mxu0 }
 0x394   : > { %v9361_v23 = vadd.f32 %v8283_v60, %v12231_v41  ;;  %v3023_v4 = vpop.f32.mrb[49].mxu1  ;;  %v5937_v37 = vpop.f32.mrb[49].mxu0 }
 0x395   : > { %v9363_v35 = vadd.f32 %v12231_v41, %v3023_v4  ;;  %6462 = vxpose.xlu1.b32.end [16/16] (narrow) %v12338_v38, 8  ;;  %6486 = vxpose.xlu0.b32.cont [8/16] (narrow) %v9342_v42, 8 }
 0x396   : > { %v9362_v55 = vadd.f32 %v9361_v23, %v8955_v28 }
 0x397   : > { %v9364_v33 = vadd.f32 %v9363_v35, %v5937_v37  ;;  %v8286_v11 = vpop.f32.mrb[50].mxu1  ;;  %v8958_v36 = vpop.f32.mrb[50].mxu0 }
 0x398   : > { %v9365_v26 = vadd.f32 %v8286_v11, %v12231_v41  ;;  %v3037_v15 = vpop.f32.mrb[51].mxu1  ;;  %v5949_v21 = vpop.f32.mrb[51].mxu0 }
 0x399   : > { %v9367_v49 = vadd.f32 %v12231_v41, %v3037_v15  ;;  %6487 = vxpose.xlu0.b32.cont [9/16] (narrow) %v9348_v51, 8  ;;  %6511 = vxpose.xlu1.b32.start [1/16] (narrow) %v9364_v33, 8 }
 0x39a   : > { %v9366_v13 = vadd.f32 %v9365_v26, %v8958_v36 }
 0x39b   : > { %v9368_v58 = vadd.f32 %v9367_v49, %v5949_v21  ;;  %v8289_v63 = vpop.f32.mrb[52].mxu1  ;;  %v8961_v2 = vpop.f32.mrb[52].mxu0 }
 0x39c   : > { %v9369_v62 = vadd.f32 %v8289_v63, %v12231_v41  ;;  %v3051_v38 = vpop.f32.mrb[53].mxu1  ;;  %v5961_v22 = vpop.f32.mrb[53].mxu0 }
 0x39d   : > { %v9371_v46 = vadd.f32 %v12231_v41, %v3051_v38  ;;  %6488 = vxpose.xlu0.b32.cont [10/16] (narrow) %v9346_v52, 8  ;;  %6512 = vxpose.xlu1.b32.cont [2/16] (narrow) %v9362_v55, 8 }
 0x39e   : > { %v9370_v5 = vadd.f32 %v9369_v62, %v8961_v2 }
 0x39f   : > { %v9372_v19 = vadd.f32 %v9371_v46, %v5961_v22  ;;  %v8292_v34 = vpop.f32.mrb[54].mxu1  ;;  %v8964_v43 = vpop.f32.mrb[54].mxu0 }
 0x3a0   : > { %v9373_v27 = vadd.f32 %v8292_v34, %v12231_v41  ;;  %v3065_v17 = vpop.f32.mrb[55].mxu1  ;;  %v5973_v39 = vpop.f32.mrb[55].mxu0 }
 0x3a1   : > { %v9375_v42 = vadd.f32 %v12231_v41, %v3065_v17  ;;  %6489 = vxpose.xlu0.b32.cont [11/16] (narrow) %v9352_v45, 8  ;;  %6513 = vxpose.xlu1.b32.cont [3/16] (narrow) %v9368_v58, 8 }
 0x3a2   : > { %v9374_v53 = vadd.f32 %v9373_v27, %v8964_v43 }
 0x3a3   : > { %v9376_v54 = vadd.f32 %v9375_v42, %v5973_v39  ;;  %v8295_v10 = vpop.f32.mrb[56].mxu1  ;;  %v8967_v3 = vpop.f32.mrb[56].mxu0 }
 0x3a4   : > { %v9377_v40 = vadd.f32 %v8295_v10, %v12231_v41  ;;  %v3079_v16 = vpop.f32.mrb[57].mxu1  ;;  %v5985_v9 = vpop.f32.mrb[57].mxu0 }
 0x3a5   : > { %v9379_v52 = vadd.f32 %v12231_v41, %v3079_v16  ;;  %6490 = vxpose.xlu0.b32.cont [12/16] (narrow) %v12357_v18, 8  ;;  %6514 = vxpose.xlu1.b32.cont [4/16] (narrow) %v9366_v13, 8 }
 0x3a6   : > { %v9378_v51 = vadd.f32 %v9377_v40, %v8967_v3 }
 0x3a7   : > { %v9380_v59 = vadd.f32 %v9379_v52, %v5985_v9  ;;  %v8298_v24 = vpop.f32.mrb[58].mxu1  ;;  %v8970_v12 = vpop.f32.mrb[58].mxu0 }
 0x3a8   : > { %v9381_v57 = vadd.f32 %v8298_v24, %v12231_v41  ;;  %v3093_v7 = vpop.f32.mrb[59].mxu1  ;;  %v5997_v29 = vpop.f32.mrb[59].mxu0 }
 0x3a9   : > { %v9383_v45 = vadd.f32 %v12231_v41, %v3093_v7  ;;  %6491 = vxpose.xlu0.b32.cont [13/16] (narrow) %v12364_v20, 8  ;;  %6515 = vxpose.xlu1.b32.cont [5/16] (narrow) %v9372_v19, 8 }
 0x3aa   : > { %v12388_v31 = vadd.f32 %v9381_v57, %v8970_v12 }
 0x3ab   : > { %v9384_v25 = vadd.f32 %v9383_v45, %v5997_v29  ;;  %v8301_v6 = vpop.f32.mrb[60].mxu1  ;;  %v8973_v44 = vpop.f32.mrb[60].mxu0 }
 0x3ac   : > { %v9385_v18 = vadd.f32 %v8301_v6, %v12231_v41  ;;  %v3107_v0 = vpop.f32.mrb[61].mxu1  ;;  %v6009_v56 = vpop.f32.mrb[61].mxu0 }
 0x3ad   : > { %v9387_v32 = vadd.f32 %v12231_v41, %v3107_v0  ;;  %6492 = vxpose.xlu0.b32.cont [14/16] (narrow) %v12362_v8, 8  ;;  %6516 = vxpose.xlu1.b32.cont [6/16] (narrow) %v9370_v5, 8 }
 0x3ae   : > { %v12393_v30 = vadd.f32 %v9385_v18, %v8973_v44 }
 0x3af   : > { %v12395_v47 = vadd.f32 %v9387_v32, %v6009_v56  ;;  %v8304_v20 = vpop.f32.mrb[62].mxu1  ;;  %v8976_v50 = vpop.f32.mrb[62].mxu0 }
 0x3b0   : > { %v9389_v61 = vadd.f32 %v8304_v20, %v12231_v41  ;;  %v3121_v14 = vpop.f32.mrb[63].mxu1  ;;  %v6021_v60 = vpop.f32.mrb[63].mxu0 }
 0x3b1   : > { %v9391_v28 = vadd.f32 %v12231_v41, %v3121_v14  ;;  %6493 = vxpose.xlu0.b32.cont [15/16] (narrow) %v12371_v48, 8  ;;  %6517 = vxpose.xlu1.b32.cont [7/16] (narrow) %v9376_v54, 8 }
 0x3b2   : > { %v12400_v23 = vadd.f32 %v9389_v61, %v8976_v50 }
 0x3b3   : > { %v12402_v4 = vadd.f32 %v9391_v28, %v6021_v60  ;;  %v8307_v8 = vpop.f32.mrb[64].mxu1  ;;  %v8979_v37 = vpop.f32.mrb[64].mxu0 }
 0x3b4   : > { %v9393_v35 = vadd.f32 %v8307_v8, %v12231_v41  ;;  %v3135_v55 = vpop.f32.mrb[65].mxu1  ;;  %v6033_v33 = vpop.f32.mrb[65].mxu0 }
 0x3b5   : > { %v9395_v11 = vadd.f32 %v12231_v41, %v3135_v55  ;;  %6494 = vxpose.xlu0.b32.end [16/16] (narrow) %v12369_v1, 8  ;;  %6518 = vxpose.xlu1.b32.cont [8/16] (narrow) %v9374_v53, 8 }
 0x3b6   : > { %v9394_v36 = vadd.f32 %v9393_v35, %v8979_v37 }
 0x3b7   : > { %v9396_v26 = vadd.f32 %v9395_v11, %v6033_v33  ;;  %v8310_v15 = vpop.f32.mrb[66].mxu1  ;;  %v8982_v48 = vpop.f32.mrb[66].mxu0 }
 0x3b8   : > { %v9397_v21 = vadd.f32 %v8310_v15, %v12231_v41  ;;  %v3149_v49 = vpop.f32.mrb[67].mxu1  ;;  %v6045_v13 = vpop.f32.mrb[67].mxu0 }
 0x3b9   : > { %v9399_v58 = vadd.f32 %v12231_v41, %v3149_v49  ;;  %6519 = vxpose.xlu1.b32.cont [9/16] (narrow) %v9380_v59, 8  ;;  %6543 = vxpose.xlu0.b32.start [1/16] (narrow) %v9396_v26, 8 }
 0x3ba   : > { %v9398_v63 = vadd.f32 %v9397_v21, %v8982_v48  ;;  %v6431_v48 = vpop.trf.xlu0 }
 0x3bb   : > { %v9400_v2 = vadd.f32 %v9399_v58, %v6045_v13  ;;  %v8313_v62 = vpop.f32.mrb[68].mxu1  ;;  %v8985_v38 = vpop.f32.mrb[68].mxu0  ;;  %v6850_v49 = vmul.f32 -1.442695, %v6431_v48 }
 0x3bc   : > { %v9401_v22 = vadd.f32 %v8313_v62, %v12231_v41  ;;  %v3163_v1 = vpop.f32.mrb[69].mxu1  ;;  %v6057_v46 = vpop.f32.mrb[69].mxu0 }
 0x3bd   : > { %v9403_v5 = vadd.f32 %v12231_v41, %v3163_v1  ;;  %6520 = vxpose.xlu1.b32.cont [10/16] (narrow) %v9378_v51, 8  ;;  %6544 = vxpose.xlu0.b32.cont [2/16] (narrow) %v9394_v36, 8  ;;  %10081 = vpow2.f32 %v6850_v49 }
 0x3be   : > { %v9402_v19 = vadd.f32 %v9401_v22, %v8985_v38 }
 0x3bf   : > { %v9404_v34 = vadd.f32 %v9403_v5, %v6057_v46  ;;  %v8316_v43 = vpop.f32.mrb[70].mxu1  ;;  %v8988_v27 = vpop.f32.mrb[70].mxu0 }
 0x3c0   : > { %v9405_v17 = vadd.f32 %v8316_v43, %v12231_v41  ;;  %v3177_v39 = vpop.f32.mrb[71].mxu1  ;;  %v6069_v42 = vpop.f32.mrb[71].mxu0 }
 0x3c1   : > { %v9407_v53 = vadd.f32 %v12231_v41, %v3177_v39  ;;  %6521 = vxpose.xlu1.b32.cont [11/16] (narrow) %v9384_v25, 8  ;;  %6545 = vxpose.xlu0.b32.cont [3/16] (narrow) %v9400_v2, 8 }
 0x3c2   : > { %v9406_v54 = vadd.f32 %v9405_v17, %v8988_v27 }
 0x3c3   : > { %v9408_v10 = vadd.f32 %v9407_v53, %v6069_v42  ;;  %v8319_v3 = vpop.f32.mrb[72].mxu1  ;;  %v8991_v40 = vpop.f32.mrb[72].mxu0 }
 0x3c4   : > { %v9409_v16 = vadd.f32 %v8319_v3, %v12231_v41  ;;  %v3191_v9 = vpop.f32.mrb[73].mxu1  ;;  %v6081_v52 = vpop.f32.mrb[73].mxu0 }
 0x3c5   : > { %v9411_v51 = vadd.f32 %v12231_v41, %v3191_v9  ;;  %6522 = vxpose.xlu1.b32.cont [12/16] (narrow) %v12388_v31, 8  ;;  %6546 = vxpose.xlu0.b32.cont [4/16] (narrow) %v9398_v63, 8 }
 0x3c6   : > { %v12416_v59 = vadd.f32 %v9409_v16, %v8991_v40 }
 0x3c7   : > { %v9412_v24 = vadd.f32 %v9411_v51, %v6081_v52  ;;  %v8322_v12 = vpop.f32.mrb[74].mxu1  ;;  %v8994_v57 = vpop.f32.mrb[74].mxu0 }
 0x3c8   : > { %v9413_v7 = vadd.f32 %v8322_v12, %v12231_v41  ;;  %v3205_v29 = vpop.f32.mrb[75].mxu1  ;;  %v6093_v45 = vpop.f32.mrb[75].mxu0 }
 0x3c9   : > { %v9415_v25 = vadd.f32 %v12231_v41, %v3205_v29  ;;  %6523 = vxpose.xlu1.b32.cont [13/16] (narrow) %v12395_v47, 8  ;;  %6547 = vxpose.xlu0.b32.cont [5/16] (narrow) %v9404_v34, 8  ;;  %v10082_v9 = vpop.eup %10081 }
 0x3ca   : > { %v12421_v6 = vadd.f32 %v9413_v7, %v8994_v57 }
 0x3cb   : > { %v12423_v44 = vadd.f32 %v9415_v25, %v6093_v45  ;;  %v8325_v31 = vpop.f32.mrb[76].mxu1  ;;  %v8997_v18 = vpop.f32.mrb[76].mxu0 }
 0x3cc   : > { %v9417_v0 = vadd.f32 %v8325_v31, %v12231_v41  ;;  %v3219_v56 = vpop.f32.mrb[77].mxu1  ;;  %v6105_v32 = vpop.f32.mrb[77].mxu0 }
 0x3cd   : > { %v9419_v20 = vadd.f32 %v12231_v41, %v3219_v56  ;;  %6524 = vxpose.xlu1.b32.cont [14/16] (narrow) %v12393_v30, 8  ;;  %6548 = vxpose.xlu0.b32.cont [6/16] (narrow) %v9402_v19, 8 }
 0x3ce   : > { %v12428_v50 = vadd.f32 %v9417_v0, %v8997_v18 }
 0x3cf   : > { %v12430_v61 = vadd.f32 %v9419_v20, %v6105_v32  ;;  %v8328_v47 = vpop.f32.mrb[78].mxu1  ;;  %v9000_v14 = vpop.f32.mrb[78].mxu0 }
 0x3d0   : > { %v9421_v60 = vadd.f32 %v8328_v47, %v12231_v41  ;;  %v3233_v28 = vpop.f32.mrb[79].mxu1  ;;  %v6117_v8 = vpop.f32.mrb[79].mxu0 }
 0x3d1   : > { %v9423_v37 = vadd.f32 %v12231_v41, %v3233_v28  ;;  %6525 = vxpose.xlu1.b32.cont [15/16] (narrow) %v12402_v4, 8  ;;  %6549 = vxpose.xlu0.b32.cont [7/16] (narrow) %v9408_v10, 8 }
 0x3d2   : > { %v12435_v35 = vadd.f32 %v9421_v60, %v9000_v14 }
 0x3d3   : > { %v12437_v55 = vadd.f32 %v9423_v37, %v6117_v8  ;;  %v8331_v30 = vpop.f32.mrb[80].mxu1  ;;  %v9003_v33 = vpop.f32.mrb[80].mxu0 }
 0x3d4   : > { %v9425_v11 = vadd.f32 %v8331_v30, %v12231_v41  ;;  %v3247_v36 = vpop.f32.mrb[81].mxu1  ;;  %v6129_v26 = vpop.f32.mrb[81].mxu0 }
 0x3d5   : > { %v9427_v15 = vadd.f32 %v12231_v41, %v3247_v36  ;;  %6526 = vxpose.xlu1.b32.end [16/16] (narrow) %v12400_v23, 8  ;;  %6550 = vxpose.xlu0.b32.cont [8/16] (narrow) %v9406_v54, 8 }
 0x3d6   : > { %v9426_v21 = vadd.f32 %v9425_v11, %v9003_v33  ;;  %v12466_v11 = vld [vmem:[%s12598_s1 + $0x80] ss:$0 sm:$0xff] }
 0x3d7   : > { %v9428_v4 = vadd.f32 %v9427_v15, %v6129_v26  ;;  %v8334_v13 = vpop.f32.mrb[82].mxu1  ;;  %v9006_v58 = vpop.f32.mrb[82].mxu0 }
 0x3d8   : > { %v9429_v63 = vadd.f32 %v8334_v13, %v12231_v41  ;;  %v3261_v2 = vpop.f32.mrb[83].mxu1  ;;  %v6141_v62 = vpop.f32.mrb[83].mxu0 }
 0x3d9   : > { %v9431_v38 = vadd.f32 %v12231_v41, %v3261_v2  ;;  %6551 = vxpose.xlu0.b32.cont [9/16] (narrow) %v9412_v24, 8  ;;  %6575 = vxpose.xlu1.b32.start [1/16] (narrow) %v9428_v4, 8  ;;  %v6463_v22 = vpop.trf.xlu1 }
 0x3da   : > { %v9430_v1 = vadd.f32 %v9429_v63, %v9006_v58  ;;  %v6851_v46 = vmul.f32 -1.442695, %v6463_v22 }
 0x3db   : > { %v9432_v23 = vadd.f32 %v9431_v38, %v6141_v62  ;;  %v8337_v5 = vpop.f32.mrb[84].mxu1  ;;  %v9009_v19 = vpop.f32.mrb[84].mxu0 }
 0x3dc   : > { %v9433_v34 = vadd.f32 %v8337_v5, %v12231_v41  ;;  %v3275_v43 = vpop.f32.mrb[85].mxu1  ;;  %v6153_v27 = vpop.f32.mrb[85].mxu0  ;;  %10083 = vpow2.f32 %v6851_v46 }
 0x3dd   : > { %v9435_v17 = vadd.f32 %v12231_v41, %v3275_v43  ;;  %6552 = vxpose.xlu0.b32.cont [10/16] (narrow) %v12416_v59, 8  ;;  %6576 = vxpose.xlu1.b32.cont [2/16] (narrow) %v9426_v21, 8  ;;  %v6695_v59 = vadd.f32 1.0, %v10082_v9 }
 0x3de   : > { %v9434_v39 = vadd.f32 %v9433_v34, %v9009_v19 }
 0x3df   : > { %v9436_v42 = vadd.f32 %v9435_v17, %v6153_v27  ;;  %v8340_v53 = vpop.f32.mrb[86].mxu1  ;;  %v9012_v54 = vpop.f32.mrb[86].mxu0  ;;  %10085 = vrcp.f32 %v6695_v59 }
 0x3e0   : > { %v9437_v10 = vadd.f32 %v8340_v53, %v12231_v41  ;;  %v3289_v3 = vpop.f32.mrb[87].mxu1  ;;  %v6165_v40 = vpop.f32.mrb[87].mxu0 }
 0x3e1   : > { %v9439_v16 = vadd.f32 %v12231_v41, %v3289_v3  ;;  %6553 = vxpose.xlu0.b32.cont [11/16] (narrow) %v12423_v44, 8  ;;  %6577 = vxpose.xlu1.b32.cont [3/16] (narrow) %v9432_v23, 8 }
 0x3e2   : > { %v9438_v52 = vadd.f32 %v9437_v10, %v9012_v54 }
 0x3e3   : > { %v9440_v51 = vadd.f32 %v9439_v16, %v6165_v40  ;;  %v8343_v24 = vpop.f32.mrb[88].mxu1  ;;  %v9015_v12 = vpop.f32.mrb[88].mxu0 }
 0x3e4   : > { %v9441_v57 = vadd.f32 %v8343_v24, %v12231_v41  ;;  %v3303_v7 = vpop.f32.mrb[89].mxu1  ;;  %v6177_v29 = vpop.f32.mrb[89].mxu0 }
 0x3e5   : > { %v9443_v45 = vadd.f32 %v12231_v41, %v3303_v7  ;;  %6554 = vxpose.xlu0.b32.cont [12/16] (narrow) %v12421_v6, 8  ;;  %6578 = vxpose.xlu1.b32.cont [4/16] (narrow) %v9430_v1, 8 }
 0x3e6   : > { %v10084_v25 = vpop.eup %10083  ;;  %v12453_v31 = vadd.f32 %v9441_v57, %v9015_v12 }
 0x3e7   : > { %v9444_v44 = vadd.f32 %v9443_v45, %v6177_v29  ;;  %v8346_v18 = vpop.f32.mrb[90].mxu1  ;;  %v9018_v0 = vpop.f32.mrb[90].mxu0  ;;  %v6696_v56 = vadd.f32 1.0, %v10084_v25 }
 0x3e8   : > { %v9445_v32 = vadd.f32 %v8346_v18, %v12231_v41  ;;  %v3317_v20 = vpop.f32.mrb[91].mxu1  ;;  %v6189_v47 = vpop.f32.mrb[91].mxu0 }
 0x3e9   : > { %v9447_v14 = vadd.f32 %v12231_v41, %v3317_v20  ;;  %6555 = vxpose.xlu0.b32.cont [13/16] (narrow) %v12430_v61, 8  ;;  %6579 = vxpose.xlu1.b32.cont [5/16] (narrow) %v9436_v42, 8  ;;  %10087 = vrcp.f32 %v6696_v56  ;;  %v10086_v26 = vpop.eup %10085 }
 0x3ea   : > { %v12458_v6 = vadd.f32 %v9445_v32, %v9018_v0  ;;  %v6719_v13 = vmul.f32 10.0, %v10086_v26 }
 0x3eb   : > { %v12460_v60 = vadd.f32 %v9447_v14, %v6189_v47  ;;  %v8349_v28 = vpop.f32.mrb[92].mxu1  ;;  %v9021_v8 = vpop.f32.mrb[92].mxu0 }
 0x3ec   : > { %v9449_v37 = vadd.f32 %v8349_v28, %v12231_v41  ;;  %v3331_v30 = vpop.f32.mrb[93].mxu1  ;;  %v6201_v33 = vpop.f32.mrb[93].mxu0  ;;  %v6727_v23 = vadd.f32 0.05, %v6719_v13 }
 0x3ed   : > { %v9451_v36 = vadd.f32 %v12466_v11, %v3331_v30  ;;  %6556 = vxpose.xlu0.b32.cont [14/16] (narrow) %v12428_v50, 8  ;;  %6580 = vxpose.xlu1.b32.cont [6/16] (narrow) %v9434_v39, 8 }
 0x3ee   : > { %v12470_v61 = vadd.f32 %v9449_v37, %v9021_v8 }
 0x3ef   : > { %v12472_v15 = vadd.f32 %v9451_v36, %v6201_v33  ;;  %v8352_v48 = vpop.f32.mrb[94].mxu1  ;;  %v9024_v21 = vpop.f32.mrb[94].mxu0 }
 0x3f0   : > { %v9453_v41 = vadd.f32 %v12466_v11, %v8352_v48  ;;  %v3345_v49 = vpop.f32.mrb[95].mxu1  ;;  %v6213_v4 = vpop.f32.mrb[95].mxu0 }
 0x3f1   : > { %v9455_v58 = vadd.f32 %v12466_v11, %v3345_v49  ;;  %6557 = vxpose.xlu0.b32.cont [15/16] (narrow) %v12437_v55, 8  ;;  %6581 = vxpose.xlu1.b32.cont [7/16] (narrow) %v9440_v51, 8 }
 0x3f2   : > { %v12477_v50 = vadd.f32 %v9453_v41, %v9024_v21 }
 0x3f3   : > { %v10088_v63 = vpop.eup %10087  ;;  %v12479_v2 = vadd.f32 %v9455_v58, %v6213_v4  ;;  %v8355_v62 = vpop.f32.mrb[96].mxu1 }
 0x3f4   : > { %v9027_v38 = vpop.f32.mrb[96].mxu0  ;;  %v9457_v22 = vadd.f32 %v12466_v11, %v8355_v62  ;;  %v3359_v1 = vpop.f32.mrb[97].mxu1  ;;  %v6720_v5 = vmul.f32 10.0, %v10088_v63 }
 0x3f5   : > { %v6225_v46 = vpop.f32.mrb[97].mxu0  ;;  %v9459_v19 = vadd.f32 %v12466_v11, %v3359_v1  ;;  %6558 = vxpose.xlu0.b32.end [16/16] (narrow) %v12435_v35, 8  ;;  %6582 = vxpose.xlu1.b32.cont [8/16] (narrow) %v9438_v52, 8 }
 0x3f6   : > { %v9458_v55 = vadd.f32 %v9457_v22, %v9027_v38  ;;  %v6728_v34 = vadd.f32 0.05, %v6720_v5 }
 0x3f7   : > { %v9460_v43 = vadd.f32 %v9459_v19, %v6225_v46  ;;  %v8358_v27 = vpop.f32.mrb[98].mxu1  ;;  %v9030_v17 = vpop.f32.mrb[98].mxu0 }
 0x3f8   : > { %v9461_v39 = vadd.f32 %v12466_v11, %v8358_v27  ;;  %v3373_v42 = vpop.f32.mrb[99].mxu1  ;;  %v6237_v53 = vpop.f32.mrb[99].mxu0  ;;  %v6743_v54 = vcombine.low %v6727_v23, %v6728_v34 }
 0x3f9   : > { %v9463_v10 = vadd.f32 %v12466_v11, %v3373_v42  ;;  %6583 = vxpose.xlu1.b32.cont [9/16] (narrow) %v9444_v44, 8  ;;  %6607 = vxpose.xlu0.b32.start [1/16] (narrow) %v9460_v43, 8  ;;  %v6495_v21 = vpop.trf.xlu0 }
 0x3fa   : > { %v9462_v3 = vadd.f32 %v9461_v39, %v9030_v17  ;;  %6751 = vst [vmem:[%s12487_s19] sm:$0x77] %v6743_v54 }
 0x3fb   : > { %v9464_v35 = vadd.f32 %v9463_v10, %v6237_v53  ;;  %v8361_v40 = vpop.f32.mrb[100].mxu1  ;;  %v9033_v16 = vpop.f32.mrb[100].mxu0 }
 0x3fc   : > { %v9465_v9 = vadd.f32 %v12466_v11, %v8361_v40  ;;  %v3387_v52 = vpop.f32.mrb[101].mxu1  ;;  %v6249_v51 = vpop.f32.mrb[101].mxu0 }
 0x3fd   : > { %v9467_v24 = vadd.f32 %v12466_v11, %v3387_v52  ;;  %6584 = vxpose.xlu1.b32.cont [10/16] (narrow) %v12453_v31, 8  ;;  %6608 = vxpose.xlu0.b32.cont [2/16] (narrow) %v9458_v55, 8 }
 0x3fe   : > { %v9466_v12 = vadd.f32 %v9465_v9, %v9033_v16 }
 0x3ff   : > { %v9468_v59 = vadd.f32 %v9467_v24, %v6249_v51  ;;  %v8364_v57 = vpop.f32.mrb[102].mxu1  ;;  %v9036_v7 = vpop.f32.mrb[102].mxu0 }
 0x400   : > { %v9469_v29 = vadd.f32 %v12466_v11, %v8364_v57  ;;  %v3401_v45 = vpop.f32.mrb[103].mxu1  ;;  %v6261_v25 = vpop.f32.mrb[103].mxu0 }
 0x401   : > { %v9471_v44 = vadd.f32 %v12466_v11, %v3401_v45  ;;  %6585 = vxpose.xlu1.b32.cont [11/16] (narrow) %v12460_v60, 8  ;;  %6609 = vxpose.xlu0.b32.cont [3/16] (narrow) %v9464_v35, 8 }
 0x402   : > { %v9470_v18 = vadd.f32 %v9469_v29, %v9036_v7 }
 0x403   : > { %v9472_v0 = vadd.f32 %v9471_v44, %v6261_v25  ;;  %v8367_v56 = vpop.f32.mrb[104].mxu1  ;;  %v9039_v32 = vpop.f32.mrb[104].mxu0 }
 0x404   : > { %v9473_v31 = vadd.f32 %v12466_v11, %v8367_v56  ;;  %v3415_v20 = vpop.f32.mrb[105].mxu1  ;;  %v6273_v47 = vpop.f32.mrb[105].mxu0 }
 0x405   : > { %v9475_v14 = vadd.f32 %v12466_v11, %v3415_v20  ;;  %6586 = vxpose.xlu1.b32.cont [12/16] (narrow) %v12458_v6, 8  ;;  %6610 = vxpose.xlu0.b32.cont [4/16] (narrow) %v9462_v3, 8 }
 0x406   : > { %v12499_v28 = vadd.f32 %v9473_v31, %v9039_v32 }
 0x407   : > { %v9476_v8 = vadd.f32 %v9475_v14, %v6273_v47  ;;  %v8370_v37 = vpop.f32.mrb[106].mxu1  ;;  %v9042_v30 = vpop.f32.mrb[106].mxu0 }
 0x408   : > { %v9477_v60 = vadd.f32 %v12466_v11, %v8370_v37  ;;  %v3429_v33 = vpop.f32.mrb[107].mxu1  ;;  %v6285_v36 = vpop.f32.mrb[107].mxu0 }
 0x409   : > { %v9479_v26 = vadd.f32 %v12466_v11, %v3429_v33  ;;  %6587 = vxpose.xlu1.b32.cont [13/16] (narrow) %v12472_v15, 8  ;;  %6611 = vxpose.xlu0.b32.cont [5/16] (narrow) %v9468_v59, 8  ;;  %v6852_v15 = vmul.f32 -1.442695, %v6495_v21 }
 0x40a   : > { %v12504_v48 = vadd.f32 %v9477_v60, %v9042_v30 }
 0x40b   : > { %v12506_v41 = vadd.f32 %v9479_v26, %v6285_v36  ;;  %v8373_v6 = vpop.f32.mrb[108].mxu1  ;;  %v9045_v49 = vpop.f32.mrb[108].mxu0  ;;  %10089 = vpow2.f32 %v6852_v15 }
 0x40c   : > { %v9481_v4 = vadd.f32 %v12466_v11, %v8373_v6  ;;  %v3443_v13 = vpop.f32.mrb[109].mxu1  ;;  %v6297_v58 = vpop.f32.mrb[109].mxu0 }
 0x40d   : > { %v9483_v63 = vadd.f32 %v12466_v11, %v3443_v13  ;;  %6588 = vxpose.xlu1.b32.cont [14/16] (narrow) %v12470_v61, 8  ;;  %6612 = vxpose.xlu0.b32.cont [6/16] (narrow) %v9466_v12, 8 }
 0x40e   : > { %v12511_v62 = vadd.f32 %v9481_v4, %v9045_v49 }
 0x40f   : > { %v12513_v38 = vadd.f32 %v9483_v63, %v6297_v58  ;;  %v8376_v22 = vpop.f32.mrb[110].mxu1  ;;  %v9048_v1 = vpop.f32.mrb[110].mxu0 }
 0x410   : > { %v9485_v46 = vadd.f32 %v12466_v11, %v8376_v22  ;;  %v3457_v23 = vpop.f32.mrb[111].mxu1  ;;  %v6309_v5 = vpop.f32.mrb[111].mxu0 }
 0x411   : > { %v9487_v19 = vadd.f32 %v12466_v11, %v3457_v23  ;;  %6589 = vxpose.xlu1.b32.cont [15/16] (narrow) %v12479_v2, 8  ;;  %6613 = vxpose.xlu0.b32.cont [7/16] (narrow) %v9472_v0, 8 }
 0x412   : > { %v12518_v55 = vadd.f32 %v9485_v46, %v9048_v1 }
 0x413   : > { %v12520_v61 = vadd.f32 %v9487_v19, %v6309_v5  ;;  %v8379_v34 = vpop.f32.mrb[112].mxu1  ;;  %v9051_v43 = vpop.f32.mrb[112].mxu0 }
 0x414   : > { %v9489_v27 = vadd.f32 %v12466_v11, %v8379_v34  ;;  %v3471_v17 = vpop.f32.mrb[113].mxu1  ;;  %v6321_v39 = vpop.f32.mrb[113].mxu0 }
 0x415   : > { %v9491_v42 = vadd.f32 %v12466_v11, %v3471_v17  ;;  %6590 = vxpose.xlu1.b32.end [16/16] (narrow) %v12477_v50, 8  ;;  %6614 = vxpose.xlu0.b32.cont [8/16] (narrow) %v9470_v18, 8  ;;  %v10090_v50 = vpop.eup %10089 }
 0x416   : > { %v9490_v53 = vadd.f32 %v9489_v27, %v9051_v43  ;;  %v6697_v56 = vadd.f32 1.0, %v10090_v50 }
 0x417   : > { %v9492_v54 = vadd.f32 %v9491_v42, %v6321_v39  ;;  %v8382_v2 = vpop.f32.mrb[114].mxu1  ;;  %v9054_v10 = vpop.f32.mrb[114].mxu0 }
 0x418   : > { %v9493_v3 = vadd.f32 %v12466_v11, %v8382_v2  ;;  %v3485_v35 = vpop.f32.mrb[115].mxu1  ;;  %v6333_v40 = vpop.f32.mrb[115].mxu0 }
 0x419   : > { %v9495_v16 = vadd.f32 %v12466_v11, %v3485_v35  ;;  %6615 = vxpose.xlu0.b32.cont [9/16] (narrow) %v9476_v8, 8  ;;  %6639 = vxpose.xlu1.b32.start [1/16] (narrow) %v9492_v54, 8  ;;  %v6527_v9 = vpop.trf.xlu1 }
 0x41a   : > { %v9494_v52 = vadd.f32 %v9493_v3, %v9054_v10  ;;  %v6853_v51 = vmul.f32 -1.442695, %v6527_v9 }
 0x41b   : > { %v9496_v24 = vadd.f32 %v9495_v16, %v6333_v40  ;;  %v8385_v12 = vpop.f32.mrb[116].mxu1  ;;  %v9057_v59 = vpop.f32.mrb[116].mxu0 }
 0x41c   : > { %v9497_v57 = vadd.f32 %v12466_v11, %v8385_v12  ;;  %v3499_v7 = vpop.f32.mrb[117].mxu1  ;;  %v6345_v29 = vpop.f32.mrb[117].mxu0  ;;  %10091 = vpow2.f32 %v6853_v51 }
 0x41d   : > { %v9499_v45 = vadd.f32 %v12466_v11, %v3499_v7  ;;  %6616 = vxpose.xlu0.b32.cont [10/16] (narrow) %v12499_v28, 8  ;;  %6640 = vxpose.xlu1.b32.cont [2/16] (narrow) %v9490_v53, 8  ;;  %10093 = vrcp.f32 %v6697_v56 }
 0x41e   : > { %v9498_v25 = vadd.f32 %v9497_v57, %v9057_v59 }
 0x41f   : > { %v9500_v44 = vadd.f32 %v9499_v45, %v6345_v29  ;;  %v8388_v18 = vpop.f32.mrb[118].mxu1  ;;  %v9060_v0 = vpop.f32.mrb[118].mxu0 }
 0x420   : > { %v9501_v32 = vadd.f32 %v12466_v11, %v8388_v18  ;;  %v3513_v31 = vpop.f32.mrb[119].mxu1  ;;  %v6357_v20 = vpop.f32.mrb[119].mxu0 }
 0x421   : > { %v9503_v47 = vadd.f32 %v12466_v11, %v3513_v31  ;;  %6617 = vxpose.xlu0.b32.cont [11/16] (narrow) %v12506_v41, 8  ;;  %6641 = vxpose.xlu1.b32.cont [3/16] (narrow) %v9496_v24, 8 }
 0x422   : > { %v9502_v14 = vadd.f32 %v9501_v32, %v9060_v0 }
 0x423   : > { %v9504_v8 = vadd.f32 %v9503_v47, %v6357_v20  ;;  %v8391_v37 = vpop.f32.mrb[120].mxu1  ;;  %v9063_v30 = vpop.f32.mrb[120].mxu0 }
 0x424   : > { %v9505_v28 = vadd.f32 %v12466_v11, %v8391_v37  ;;  %v3527_v60 = vpop.f32.mrb[121].mxu1  ;;  %v6369_v33 = vpop.f32.mrb[121].mxu0 }
 0x425   : > { %v9507_v36 = vadd.f32 %v12466_v11, %v3527_v60  ;;  %6618 = vxpose.xlu0.b32.cont [12/16] (narrow) %v12504_v48, 8  ;;  %6642 = vxpose.xlu1.b32.cont [4/16] (narrow) %v9494_v52, 8 }
 0x426   : > { %v10092_v26 = vpop.eup %10091  ;;  %v9506_v21 = vadd.f32 %v9505_v28, %v9063_v30 }
 0x427   : > { %v9508_v6 = vadd.f32 %v9507_v36, %v6369_v33  ;;  %v8394_v49 = vpop.f32.mrb[122].mxu1  ;;  %v9066_v41 = vpop.f32.mrb[122].mxu0  ;;  %v6698_v4 = vadd.f32 1.0, %v10092_v26 }
 0x428   : > { %v9509_v13 = vadd.f32 %v12466_v11, %v8394_v49  ;;  %v3541_v58 = vpop.f32.mrb[123].mxu1  ;;  %v6381_v63 = vpop.f32.mrb[123].mxu0 }
 0x429   : > { %v9511_v15 = vadd.f32 %v12466_v11, %v3541_v58  ;;  %6619 = vxpose.xlu0.b32.cont [13/16] (narrow) %v12513_v38, 8  ;;  %6643 = vxpose.xlu1.b32.cont [5/16] (narrow) %v9500_v44, 8  ;;  %10095 = vrcp.f32 %v6698_v4  ;;  %v10094_v34 = vpop.eup %10093 }
 0x42a   : > { %v9510_v22 = vadd.f32 %v9509_v13, %v9066_v41  ;;  %v6721_v2 = vmul.f32 10.0, %v10094_v34 }
 0x42b   : > { %v9512_v1 = vadd.f32 %v9511_v15, %v6381_v63  ;;  %v8397_v48 = vpop.f32.mrb[124].mxu1  ;;  %v9069_v46 = vpop.f32.mrb[124].mxu0 }
 0x42c   : > { %v9513_v23 = vadd.f32 %v12466_v11, %v8397_v48  ;;  %v3555_v5 = vpop.f32.mrb[125].mxu1  ;;  %v6393_v19 = vpop.f32.mrb[125].mxu0 }
 0x42d   : > { %v9515_v43 = vadd.f32 %v12466_v11, %v3555_v5  ;;  %6620 = vxpose.xlu0.b32.cont [14/16] (narrow) %v12511_v62, 8  ;;  %6644 = vxpose.xlu1.b32.cont [6/16] (narrow) %v9498_v25, 8  ;;  %v6729_v62 = vadd.f32 0.05, %v6721_v2 }
 0x42e   : > { %v9514_v27 = vadd.f32 %v9513_v23, %v9069_v46 }
 0x42f   : > { %v9516_v17 = vadd.f32 %v9515_v43, %v6393_v19  ;;  %v8400_v39 = vpop.f32.mrb[126].mxu1  ;;  %v9072_v38 = vpop.f32.mrb[126].mxu0 }
 0x430   : > { %v9517_v42 = vadd.f32 %v12466_v11, %v8400_v39  ;;  %v3569_v53 = vpop.f32.mrb[127].mxu1  ;;  %v6405_v54 = vpop.f32.mrb[127].mxu0 }
 0x431   : > { %v9519_v10 = vadd.f32 %v12466_v11, %v3569_v53  ;;  %6621 = vxpose.xlu0.b32.cont [15/16] (narrow) %v12520_v61, 8  ;;  %6645 = vxpose.xlu1.b32.cont [7/16] (narrow) %v9504_v8, 8 }
 0x432   : > { %v9518_v3 = vadd.f32 %v9517_v42, %v9072_v38 }
 0x433   : > { %v10096_v35 = vpop.eup %10095  ;;  %v9520_v40 = vadd.f32 %v9519_v10, %v6405_v54 }
 0x434   : > { %v6722_v16 = vmul.f32 10.0, %v10096_v35 }
 0x435   : > { %6622 = vxpose.xlu0.b32.end [16/16] (narrow) %v12518_v55, 8  ;;  %6646 = vxpose.xlu1.b32.cont [8/16] (narrow) %v9502_v14, 8 }
 0x436   : > { %v6730_v9 = vadd.f32 0.05, %v6722_v16 }
 0x438   : > { %v6744_v52 = vcombine.low %v6729_v62, %v6730_v9 }
 0x439   : > { %6647 = vxpose.xlu1.b32.cont [9/16] (narrow) %v9508_v6, 8  ;;  %v6559_v11 = vpop.trf.xlu0 }
 0x43a   : > { %6752 = vst [vmem:[%s12487_s19 + $0x8] sm:$0x77] %v6744_v52  ;;  %v6854_v61 = vmul.f32 -1.442695, %v6559_v11 }
 0x43c   : > { %10097 = vpow2.f32 %v6854_v61 }
 0x43d   : > { %6648 = vxpose.xlu1.b32.cont [10/16] (narrow) %v9506_v21, 8 }
 0x441   : > { %6649 = vxpose.xlu1.b32.cont [11/16] (narrow) %v9512_v1, 8 }
 0x445   : > { %6650 = vxpose.xlu1.b32.cont [12/16] (narrow) %v9510_v22, 8 }
 0x446   : > { %v10098_v12 = vpop.eup %10097 }
 0x447   : > { %v6699_v55 = vadd.f32 1.0, %v10098_v12 }
 0x449   : > { %6651 = vxpose.xlu1.b32.cont [13/16] (narrow) %v9516_v17, 8 }
 0x44d   : > { %6652 = vxpose.xlu1.b32.cont [14/16] (narrow) %v9514_v27, 8 }
 0x451   : > { %6653 = vxpose.xlu1.b32.cont [15/16] (narrow) %v9520_v40, 8 }
 0x455   : > { %6654 = vxpose.xlu1.b32.end [16/16] (narrow) %v9518_v3, 8 }
 0x459   : > { %v6591_v51 = vpop.trf.xlu1 }
 0x45a   : > { %v6855_v24 = vmul.f32 -1.442695, %v6591_v51 }
 0x45c   : > { %10099 = vpow2.f32 %v6855_v24 }
 0x45d   : > { %10101 = vrcp.f32 %v6699_v55 }
 0x466   : > { %v10100_v59 = vpop.eup %10099 }
 0x467   : > { %v6700_v50 = vadd.f32 1.0, %v10100_v59  ;;  %v10102_v57 = vpop.eup %10101 }
 0x468   : > { %v6723_v7 = vmul.f32 10.0, %v10102_v57 }
 0x469   : > { %10103 = vrcp.f32 %v6700_v50 }
 0x46a   : > { %v6731_v45 = vadd.f32 0.05, %v6723_v7 }
 0x473   : > { %v10104_v29 = vpop.eup %10103 }
 0x474   : > { %v6724_v25 = vmul.f32 10.0, %v10104_v29 }
 0x476   : > { %v6732_v44 = vadd.f32 0.05, %v6724_v25 }
 0x478   : > { %v6745_v18 = vcombine.low %v6731_v45, %v6732_v44 }
 0x479   : > { %v6623_v0 = vpop.trf.xlu0 }
 0x47a   : > { %6753 = vst [vmem:[%s12487_s19 + $0x10] sm:$0x77] %v6745_v18  ;;  %v6856_v56 = vmul.f32 -1.442695, %v6623_v0 }
 0x47c   : > { %10105 = vpow2.f32 %v6856_v56 }
 0x486   : > { %v10106_v20 = vpop.eup %10105 }
 0x487   : > { %v6701_v47 = vadd.f32 1.0, %v10106_v20 }
 0x499   : > { %v6655_v32 = vpop.trf.xlu1 }
 0x49a   : > { %v6857_v31 = vmul.f32 -1.442695, %v6655_v32 }
 0x49c   : > { %10107 = vpow2.f32 %v6857_v31 }
 0x49d   : > { %10109 = vrcp.f32 %v6701_v47 }
 0x4a6   : > { %v10108_v14 = vpop.eup %10107 }
 0x4a7   : > { %v6702_v8 = vadd.f32 1.0, %v10108_v14  ;;  %v10110_v37 = vpop.eup %10109 }
 0x4a8   : > { %v6725_v30 = vmul.f32 10.0, %v10110_v37 }
 0x4a9   : > { %10111 = vrcp.f32 %v6702_v8 }
 0x4aa   : > { %v6733_v60 = vadd.f32 0.05, %v6725_v30 }
 0x4b3   : > { %v10112_v28 = vpop.eup %10111 }
 0x4b4   : > { %v6726_v33 = vmul.f32 10.0, %v10112_v28 }
 0x4b6   : > { %v6734_v36 = vadd.f32 0.05, %v6726_v33 }
 0x4b8   : > { %v6746_v26 = vcombine.low %v6733_v60, %v6734_v36 }
 0x4ba   : > { %6754 = vst [vmem:[%s12487_s19 + $0x18] sm:$0x77] %v6746_v26 }
 0x4bb   : > { %10161 = shalt.err (!%p10158_p1)
}
 0x4bc   : > { %s10162_s27 = scalar_lea.hbm %s12553_s29, 512  ;;  %s10166_s8 = scalar_lea.hbm %s12599_s2, 2048 }
 0x4bd   : > { %p10163_p3 = scmp.ne.s32.totalorder %s12553_s29, %s10162_s27  ;;  %p10167_p0 = scmp.lt.u32.totalorder %s12553_s29, %s12599_s2 }
 0x4be   : > { %p10168_p2 = scmp.lt.u32.totalorder %s10166_s8, %s10162_s27  ;;  %p10170_p6 = scmp.lt.u32.totalorder %s10162_s27, %s12553_s29 }
 0x4bf   : > { %p10164_p4 = pnand %p10163_p3, %p13643_p10 }
 0x4c0   : > { %p10169_p7 = por %p10168_p2, %p10167_p0 }
 0x4c1   : > { %p10165_p5 = pneg %p10164_p4 }
 0x4c2   : > { %p10171_p11 = por %p10170_p6, %p10169_p7 }
 0x4c4   : > { %p10172_p12 = pnand %p10171_p11, %p10165_p5 }
 0x4c6   : > { %10175 = shalt.err (!%p10172_p12)
}
 0x4c7   : > { %10035 = dma.vmem_to_hbm [thread:$0]  (%p13643_p10), %s12555_s24, 512, %s12553_s29, %s6756_s5  }
 0x4c8 PF: > { %p10046_p8 = scmp.ge.s32.totalorder %s10214_s12, 2  ;;  %s6782_s16 = sand.u32 1, %s10202_s9  }
 0x4c9   : > { %p13644_p9 = scmp.ne.s32.totalorder %s13040_s22, 0  ;;  %s6783_s20 = scalar_lea.sflag [#allocation4], %s6782_s16 }
 0x4cb   : > { %p10042_p13 = pnand %p10046_p8, %p13644_p9 }
 0x4cd   : > { %10197 = dma.done.wait (!%p10042_p13), %s6783_s20, 512  }
 0x4ce   : > { %10199 = vsyncadd (!%p10042_p13), %s6783_s20, 4294966784  ;;  %p15_p1 = scmp.ge.s32.totalorder %s10260_s15, 6   ;;  %s13645_s9 = smov %s10206_s10 }
 0x4cf   : > { %s13646_s10 = smov %s10210_s11  ;;  %s13647_s11 = smov %s10272_s18 }
 0x4d0   : > { %s13648_s12 = smov %s10260_s15  ;;  %17 = sbr.rel (!%p15_p1) target bundleno = 5 (0x5), region = 73 }
 0x4d7   :  { %6788 = vsyncpa [#allocation3], 1 }
 0x4d8   :  { %6790 = vsyncpa [#allocation3 + $0x1], 1 }
 0x4d9   :  { %6791 = vsyncpa [#allocation4], 1 }
 0x4da   :  { %6793 = vsyncpa [#allocation4 + $0x1], 1 }

</bundles_post_ra>
